<compile_context>
chip_gen: v7x
topology: tpu7x:2x2x1
jax: 0.10.0
libtpu: 0.0.40
codegen_flags: <defaults>
</compile_context>

<pallas_src>
import functools

import jax
import jax.numpy as jnp
import numpy as np
from jax import lax
from jax.experimental import pallas as pl
from jax.experimental.pallas import tpu as pltpu


# 3x3 tap order (dh, dw); row-major, matches the (3, 3) -> 9 reshape of weights.
_TAPS = ((-1, -1), (-1, 0), (-1, 1),
         (0, -1),  (0, 0),  (0, 1),
         (1, -1),  (1, 0),  (1, 1))


def reverse_stage_kernel(x_ref, y_ref, mask_ref, w1_ref, w2_ref, yout_ref,
                         taps_ref, *, W, n_stages):
    """One batch element of the fused ReverseStage forward (stages unrolled)."""
    C = x_ref.shape[1]
    HWp = x_ref.shape[2]
    Kp = taps_ref.shape[0]
    n_xtap = 9 * C

    x = x_ref[0]                                    # (C, HWp) f32 state
    # 1 - sigmoid(t) == 1 / (1 + exp(t))
    y = 1.0 / (1.0 + jnp.exp(y_ref[0]))             # (1, HWp) f32 state
    masks = [mask_ref[t] for t in range(9)]         # (1, HWp) each, loaded once

    # Constant rows of the stacked operand: bias (ones) row + zeroed tail
    # (tail columns of w1/w2 are zero; rows must be finite to avoid 0*inf).
    taps_ref[n_xtap + 9:n_xtap + 10, :] = jnp.ones((1, HWp), jnp.bfloat16)
    if Kp > n_xtap + 10:
        taps_ref[n_xtap + 10:, :] = jnp.zeros((Kp - n_xtap - 10, HWp),
                                              jnp.bfloat16)

    def shifted(v, t):
        """Tap t of v in the flat (rows, H*W) layout: roll on lanes + edge mask."""
        dh, dw = _TAPS[t]
        off = dh * W + dw
        if off == 0:
            return v
        return pltpu.roll(v, (-off) % HWp, axis=1) * masks[t]

    def fill_x_taps(v):
        # 9 vreg-aligned (C, HWp) blocks at sublane offsets t*C.
        for t in range(9):
            taps_ref[t * C:(t + 1) * C, :] = shifted(v, t).astype(jnp.bfloat16)

    for s in range(n_stages):
        # --- conv3x3 over x_cat (x part + folded replicated-y part + bias),
        #     as a single K = 9*C + 10 MXU matmul, then ReLU + residual. ---
        fill_x_taps(x)
        for t in range(9):
            taps_ref[n_xtap + t:n_xtap + t + 1, :] = (
                shifted(y, t).astype(jnp.bfloat16))
        c1 = jnp.dot(w1_ref[s], taps_ref[...],
                     preferred_element_type=jnp.float32)        # (C, HWp) f32
        x = x + jnp.maximum(c1, 0.0)

        # --- score conv3x3(x) + bias (y-tap rows are stale but their weight
        #     columns are zero), residual into y. ---
        fill_x_taps(x)
        c2 = jnp.dot(w2_ref[s], taps_ref[...],
                     preferred_element_type=jnp.float32)        # (1, HWp) f32
        y = y + c2

    yout_ref[0] = y                                  # lane-dense (1, HWp) store


def _fold_stage_weights(w1, b1, w2, b2, group, C, Kp):
    """Fold x_cat interleave / replicated-y / bias into stacked-K weights.

    w1: (3,3,C+group,C) HWIO acting on the interleaved x_cat, w2: (3,3,C,1).
    Returns (C, Kp) and (1, Kp) matrices matching the taps-scratch row layout:
      [9 x-tap blocks of C | 9 y-tap rows | ones (bias) row | zero pad].
    """
    sub = C // group
    x_idx = np.array([(c // sub) * (sub + 1) + (c % sub) for c in range(C)])
    y_idx = np.array([g * (sub + 1) + sub for g in range(group)])

    w_x = w1[:, :, x_idx, :].reshape(9, C, C)                 # [tap, ci, co]
    w_y = jnp.sum(w1[:, :, y_idx, :], axis=2).reshape(9, C)   # [tap, co]
    w1x = jnp.transpose(w_x, (2, 0, 1)).reshape(C, 9 * C)     # [co, tap*C + ci]
    w1y = jnp.transpose(w_y, (1, 0))                          # (C, 9)
    pad_w = Kp - 9 * C - 10
    w1_full = jnp.concatenate(
        [w1x, w1y, b1[:, None], jnp.zeros((C, pad_w), jnp.float32)], axis=1)

    w2x = w2.reshape(9 * C)[None, :]                          # [0, tap*C + ci]
    w2_full = jnp.concatenate(
        [w2x, jnp.zeros((1, 9), jnp.float32), b2[None, :],
         jnp.zeros((1, pad_w), jnp.float32)], axis=1)
    return w1_full, w2_full


def _tap_masks(H, W, HWp):
    """(9, 1, HWp) f32 masks: 1 where the shifted tap stays inside the image."""
    hh, ww = np.meshgrid(np.arange(H), np.arange(W), indexing="ij")
    m = np.zeros((9, 1, HWp), np.float32)
    for t, (dh, dw) in enumerate(_TAPS):
        valid = ((hh + dh >= 0) & (hh + dh < H) &
                 (ww + dw >= 0) & (ww + dw < W))
        m[t, 0, :H * W] = valid.reshape(-1).astype(np.float32)
    return jnp.asarray(m)


def reverse_stage_pallas(x, y, stage_params):
    """x: (N, C, H, W) f32, y: (N, 1, H, W) f32 (NCHW, like the PyTorch module).

    stage_params: list of (group, w1_hwio, b1, w2_hwio, b2) for the GRA stages.
    Returns the final y, shape (N, 1, H, W).
    """
    N, C, H, W = x.shape
    HW = H * W
    HWp = ((HW + 127) // 128) * 128              # lane-dense spatial axis
    S = len(stage_params)
    Kp = ((9 * C + 10 + 15) // 16) * 16          # stacked-K (taps + y + bias)

    # NCHW -> (N, C, H*W): spatial on the lane axis; pad HW to a 128 multiple.
    x2 = x.reshape(N, C, HW)
    y2 = y.reshape(N, 1, HW)
    if HWp != HW:
        x2 = jnp.pad(x2, ((0, 0), (0, 0), (0, HWp - HW)))
        y2 = jnp.pad(y2, ((0, 0), (0, 0), (0, HWp - HW)))

    w1_list, w2_list = [], []
    for (group, w1, b1, w2, b2) in stage_params:
        w1f, w2f = _fold_stage_weights(w1, b1, w2, b2, group, C, Kp)
        w1_list.append(w1f)
        w2_list.append(w2f)
    w1_all = jnp.stack(w1_list).astype(jnp.bfloat16)   # (S, C, Kp) bf16, MXU side
    w2_all = jnp.stack(w2_list).astype(jnp.bfloat16)   # (S, 1, Kp) bf16
    masks = _tap_masks(H, W, HWp)                      # (9, 1, HWp) f32

    kernel = functools.partial(reverse_stage_kernel, W=W, n_stages=S)
    y_out = pl.pallas_call(
        kernel,
        out_shape=jax.ShapeDtypeStruct((N, 1, HWp), jnp.float32),
        grid=(N,),
        in_specs=[
            pl.BlockSpec((1, C, HWp), lambda n: (n, 0, 0)),   # x (per batch)
            pl.BlockSpec((1, 1, HWp), lambda n: (n, 0, 0)),   # y (per batch)
            pl.BlockSpec((9, 1, HWp), lambda n: (0, 0, 0)),   # tap edge masks
            pl.BlockSpec((S, C, Kp), lambda n: (0, 0, 0)),    # folded w1 (+bias)
            pl.BlockSpec((S, 1, Kp), lambda n: (0, 0, 0)),    # folded w2 (+bias)
        ],
        out_specs=pl.BlockSpec((1, 1, HWp), lambda n: (n, 0, 0)),
        scratch_shapes=[pltpu.VMEM((Kp, HWp), jnp.bfloat16)],  # stacked taps
        compiler_params=pltpu.CompilerParams(
            dimension_semantics=("parallel",)),                # megacore on v7x
    )(x2, y2, masks, w1_all, w2_all)
    return y_out[:, :, :HW].reshape(N, 1, H, W)


# ----------------------------- pure-JAX reference ---------------------------

def _gra_ref(x, y, group, w1, b1, w2, b2):
    xs = jnp.split(x, group, axis=1)
    x_cat = jnp.concatenate([t for c in xs for t in (c, y)], axis=1)
    dn = ("NCHW", "HWIO", "NCHW")
    c1 = lax.conv_general_dilated(x_cat, w1, (1, 1), "SAME",
                                  dimension_numbers=dn,
                                  precision=lax.Precision.HIGHEST)
    x_out = x + jnp.maximum(c1 + b1[None, :, None, None], 0.0)
    sc = lax.conv_general_dilated(x_out, w2, (1, 1), "SAME",
                                  dimension_numbers=dn,
                                  precision=lax.Precision.HIGHEST)
    return x_out, y + sc + b2[None, :, None, None]


def reverse_stage_ref(x, y, stage_params):
    y = 1.0 - jax.nn.sigmoid(y)
    for (group, w1, b1, w2, b2) in stage_params:
        x, y = _gra_ref(x, y, group, w1, b1, w2, b2)
    return y


if __name__ == "__main__":
    # channel = 32 (as in SINetV2), spatial 16x16, batch 2.
    N, C, H, W = 2, 32, 16, 16
    key = jax.random.PRNGKey(0)
    keys = jax.random.split(key, 14)

    x = jax.random.normal(keys[0], (N, C, H, W), jnp.float32)
    y = jax.random.normal(keys[1], (N, 1, H, W), jnp.float32)

    # ReverseStage = weak (subchannel=C), medium (8), strong (1) GRA blocks.
    stage_params = []
    ki = 2
    for subchannel in (C, 8, 1):
        group = C // subchannel
        cin = C + group
        w1 = 0.1 * jax.random.normal(keys[ki + 0], (3, 3, cin, C), jnp.float32)
        b1 = 0.1 * jax.random.normal(keys[ki + 1], (C,), jnp.float32)
        w2 = 0.1 * jax.random.normal(keys[ki + 2], (3, 3, C, 1), jnp.float32)
        b2 = 0.1 * jax.random.normal(keys[ki + 3], (1,), jnp.float32)
        stage_params.append((group, w1, b1, w2, b2))
        ki += 4

    y_out = reverse_stage_pallas(x, y, stage_params)
    jax.block_until_ready(y_out)

    y_ref = reverse_stage_ref(x, y, stage_params)
    # bf16 MXU operands (f32 accumulation) give ~1e-3 scale-relative error across
    # the 3 cascaded stages; any structural bug (tap/fold/roll/mask) is O(1).
    scale = float(jnp.max(jnp.abs(y_ref)))
    err = float(jnp.max(jnp.abs(y_out - y_ref))) / (scale + 1e-6)
    if not np.isfinite(err) or err > 2e-2:
        raise AssertionError(f"ReverseStage mismatch: relative max error {err:.3e}")
    print("KERNEL_OK")
</pallas_src>

<mosaic_0001>
module attributes {stable_mosaic.version = 11 : i64} {
  func.func @reverse_stage_kernel(%arg0: i32, %arg1: memref<1x32x256xf32, #tpu.memory_space<vmem>>, %arg2: memref<1x1x256xf32, #tpu.memory_space<vmem>>, %arg3: memref<9x1x256xf32, #tpu.memory_space<vmem>>, %arg4: memref<3x32x304xbf16, #tpu.memory_space<vmem>>, %arg5: memref<3x1x304xbf16, #tpu.memory_space<vmem>>, %arg6: memref<1x1x256xf32, #tpu.memory_space<vmem>>, %arg7: memref<304x256xbf16, #tpu.memory_space<vmem>>) attributes {dimension_semantics = [#tpu.dimension_semantics<parallel>], iteration_bounds = array<i64: 2>, scalar_prefetch = 0 : i64, scratch_operands = 1 : i64, tpu.core_type = #tpu.core_type<tc>, window_params = [{transform_indices = @transform_0, window_bounds = array<i64: 1, 32, 256>}, {transform_indices = @transform_1, window_bounds = array<i64: 1, 1, 256>}, {pipeline_mode = #tpu.pipeline_mode<synchronous>, transform_indices = @transform_2, window_bounds = array<i64: 9, 1, 256>}, {pipeline_mode = #tpu.pipeline_mode<synchronous>, transform_indices = @transform_3, window_bounds = array<i64: 3, 32, 304>}, {pipeline_mode = #tpu.pipeline_mode<synchronous>, transform_indices = @transform_4, window_bounds = array<i64: 3, 1, 304>}, {transform_indices = @transform_5, window_bounds = array<i64: 1, 1, 256>}]} {
    %c0 = arith.constant 0 : index
    %c0_0 = arith.constant 0 : index
    %c0_1 = arith.constant 0 : index
    %0 = vector.load %arg1[%c0, %c0_0, %c0_1] : memref<1x32x256xf32, #tpu.memory_space<vmem>>, vector<1x32x256xf32>
    %1 = vector.shape_cast %0 : vector<1x32x256xf32> to vector<32x256xf32>
    %c0_2 = arith.constant 0 : index
    %c0_3 = arith.constant 0 : index
    %c0_4 = arith.constant 0 : index
    %2 = vector.load %arg2[%c0_2, %c0_3, %c0_4] : memref<1x1x256xf32, #tpu.memory_space<vmem>>, vector<1x1x256xf32>
    %3 = vector.shape_cast %2 : vector<1x1x256xf32> to vector<1x256xf32>
    %4 = math.exp %3 : vector<1x256xf32>
    %cst = arith.constant 1.000000e+00 : f32
    %5 = vector.broadcast %cst : f32 to vector<1x256xf32>
    %6 = arith.addf %5, %4 : vector<1x256xf32>
    %cst_5 = arith.constant 1.000000e+00 : f32
    %7 = vector.broadcast %cst_5 : f32 to vector<1x256xf32>
    %8 = arith.divf %7, %6 : vector<1x256xf32>
    %c0_6 = arith.constant 0 : index
    %c0_7 = arith.constant 0 : index
    %c0_8 = arith.constant 0 : index
    %9 = vector.load %arg3[%c0_6, %c0_7, %c0_8] : memref<9x1x256xf32, #tpu.memory_space<vmem>>, vector<1x1x256xf32>
    %10 = vector.shape_cast %9 : vector<1x1x256xf32> to vector<1x256xf32>
    %c1 = arith.constant 1 : index
    %c0_9 = arith.constant 0 : index
    %c0_10 = arith.constant 0 : index
    %11 = vector.load %arg3[%c1, %c0_9, %c0_10] : memref<9x1x256xf32, #tpu.memory_space<vmem>>, vector<1x1x256xf32>
    %12 = vector.shape_cast %11 : vector<1x1x256xf32> to vector<1x256xf32>
    %c2 = arith.constant 2 : index
    %c0_11 = arith.constant 0 : index
    %c0_12 = arith.constant 0 : index
    %13 = vector.load %arg3[%c2, %c0_11, %c0_12] : memref<9x1x256xf32, #tpu.memory_space<vmem>>, vector<1x1x256xf32>
    %14 = vector.shape_cast %13 : vector<1x1x256xf32> to vector<1x256xf32>
    %c3 = arith.constant 3 : index
    %c0_13 = arith.constant 0 : index
    %c0_14 = arith.constant 0 : index
    %15 = vector.load %arg3[%c3, %c0_13, %c0_14] : memref<9x1x256xf32, #tpu.memory_space<vmem>>, vector<1x1x256xf32>
    %16 = vector.shape_cast %15 : vector<1x1x256xf32> to vector<1x256xf32>
    %c5 = arith.constant 5 : index
    %c0_15 = arith.constant 0 : index
    %c0_16 = arith.constant 0 : index
    %17 = vector.load %arg3[%c5, %c0_15, %c0_16] : memref<9x1x256xf32, #tpu.memory_space<vmem>>, vector<1x1x256xf32>
    %18 = vector.shape_cast %17 : vector<1x1x256xf32> to vector<1x256xf32>
    %c6 = arith.constant 6 : index
    %c0_17 = arith.constant 0 : index
    %c0_18 = arith.constant 0 : index
    %19 = vector.load %arg3[%c6, %c0_17, %c0_18] : memref<9x1x256xf32, #tpu.memory_space<vmem>>, vector<1x1x256xf32>
    %20 = vector.shape_cast %19 : vector<1x1x256xf32> to vector<1x256xf32>
    %c7 = arith.constant 7 : index
    %c0_19 = arith.constant 0 : index
    %c0_20 = arith.constant 0 : index
    %21 = vector.load %arg3[%c7, %c0_19, %c0_20] : memref<9x1x256xf32, #tpu.memory_space<vmem>>, vector<1x1x256xf32>
    %22 = vector.shape_cast %21 : vector<1x1x256xf32> to vector<1x256xf32>
    %c8 = arith.constant 8 : index
    %c0_21 = arith.constant 0 : index
    %c0_22 = arith.constant 0 : index
    %23 = vector.load %arg3[%c8, %c0_21, %c0_22] : memref<9x1x256xf32, #tpu.memory_space<vmem>>, vector<1x1x256xf32>
    %24 = vector.shape_cast %23 : vector<1x1x256xf32> to vector<1x256xf32>
    %cst_23 = arith.constant 1.000000e+00 : bf16
    %25 = vector.broadcast %cst_23 : bf16 to vector<1x256xbf16>
    %c297 = arith.constant 297 : index
    %c0_24 = arith.constant 0 : index
    %26 = vector.load %arg7[%c297, %c0_24] : memref<304x256xbf16, #tpu.memory_space<vmem>>, vector<1x256xbf16>
    tpu.vector_store %arg7[%c297, %c0_24], %25 {strides = array<i32>} : memref<304x256xbf16, #tpu.memory_space<vmem>>, vector<1x256xbf16>,
    %cst_25 = arith.constant 0.000000e+00 : bf16
    %27 = vector.broadcast %cst_25 : bf16 to vector<6x256xbf16>
    %c298 = arith.constant 298 : index
    %c0_26 = arith.constant 0 : index
    %28 = vector.load %arg7[%c298, %c0_26] : memref<304x256xbf16, #tpu.memory_space<vmem>>, vector<6x256xbf16>
    tpu.vector_store %arg7[%c298, %c0_26], %27 {strides = array<i32>} : memref<304x256xbf16, #tpu.memory_space<vmem>>, vector<6x256xbf16>,
    %c17_i32 = arith.constant 17 : i32
    %29 = tpu.dynamic_rotate %1 by %c17_i32 dim 1 : vector<32x256xf32>, i32 -> vector<32x256xf32>
    %30 = vector.broadcast %10 : vector<1x256xf32> to vector<32x256xf32>
    %31 = arith.mulf %29, %30 : vector<32x256xf32>
    %32 = arith.truncf %31 : vector<32x256xf32> to vector<32x256xbf16>
    %c0_27 = arith.constant 0 : index
    %c0_28 = arith.constant 0 : index
    %33 = vector.load %arg7[%c0_27, %c0_28] : memref<304x256xbf16, #tpu.memory_space<vmem>>, vector<32x256xbf16>
    tpu.vector_store %arg7[%c0_27, %c0_28], %32 {strides = array<i32>} : memref<304x256xbf16, #tpu.memory_space<vmem>>, vector<32x256xbf16>,
    %c16_i32 = arith.constant 16 : i32
    %34 = tpu.dynamic_rotate %1 by %c16_i32 dim 1 : vector<32x256xf32>, i32 -> vector<32x256xf32>
    %35 = vector.broadcast %12 : vector<1x256xf32> to vector<32x256xf32>
    %36 = arith.mulf %34, %35 : vector<32x256xf32>
    %37 = arith.truncf %36 : vector<32x256xf32> to vector<32x256xbf16>
    %c32 = arith.constant 32 : index
    %c0_29 = arith.constant 0 : index
    %38 = vector.load %arg7[%c32, %c0_29] : memref<304x256xbf16, #tpu.memory_space<vmem>>, vector<32x256xbf16>
    tpu.vector_store %arg7[%c32, %c0_29], %37 {strides = array<i32>} : memref<304x256xbf16, #tpu.memory_space<vmem>>, vector<32x256xbf16>,
    %c15_i32 = arith.constant 15 : i32
    %39 = tpu.dynamic_rotate %1 by %c15_i32 dim 1 : vector<32x256xf32>, i32 -> vector<32x256xf32>
    %40 = vector.broadcast %14 : vector<1x256xf32> to vector<32x256xf32>
    %41 = arith.mulf %39, %40 : vector<32x256xf32>
    %42 = arith.truncf %41 : vector<32x256xf32> to vector<32x256xbf16>
    %c64 = arith.constant 64 : index
    %c0_30 = arith.constant 0 : index
    %43 = vector.load %arg7[%c64, %c0_30] : memref<304x256xbf16, #tpu.memory_space<vmem>>, vector<32x256xbf16>
    tpu.vector_store %arg7[%c64, %c0_30], %42 {strides = array<i32>} : memref<304x256xbf16, #tpu.memory_space<vmem>>, vector<32x256xbf16>,
    %c1_i32 = arith.constant 1 : i32
    %44 = tpu.dynamic_rotate %1 by %c1_i32 dim 1 : vector<32x256xf32>, i32 -> vector<32x256xf32>
    %45 = vector.broadcast %16 : vector<1x256xf32> to vector<32x256xf32>
    %46 = arith.mulf %44, %45 : vector<32x256xf32>
    %47 = arith.truncf %46 : vector<32x256xf32> to vector<32x256xbf16>
    %c96 = arith.constant 96 : index
    %c0_31 = arith.constant 0 : index
    %48 = vector.load %arg7[%c96, %c0_31] : memref<304x256xbf16, #tpu.memory_space<vmem>>, vector<32x256xbf16>
    tpu.vector_store %arg7[%c96, %c0_31], %47 {strides = array<i32>} : memref<304x256xbf16, #tpu.memory_space<vmem>>, vector<32x256xbf16>,
    %49 = arith.truncf %1 : vector<32x256xf32> to vector<32x256xbf16>
    %c128 = arith.constant 128 : index
    %c0_32 = arith.constant 0 : index
    %50 = vector.load %arg7[%c128, %c0_32] : memref<304x256xbf16, #tpu.memory_space<vmem>>, vector<32x256xbf16>
    tpu.vector_store %arg7[%c128, %c0_32], %49 {strides = array<i32>} : memref<304x256xbf16, #tpu.memory_space<vmem>>, vector<32x256xbf16>,
    %c255_i32 = arith.constant 255 : i32
    %51 = tpu.dynamic_rotate %1 by %c255_i32 dim 1 : vector<32x256xf32>, i32 -> vector<32x256xf32>
    %52 = vector.broadcast %18 : vector<1x256xf32> to vector<32x256xf32>
    %53 = arith.mulf %51, %52 : vector<32x256xf32>
    %54 = arith.truncf %53 : vector<32x256xf32> to vector<32x256xbf16>
    %c160 = arith.constant 160 : index
    %c0_33 = arith.constant 0 : index
    %55 = vector.load %arg7[%c160, %c0_33] : memref<304x256xbf16, #tpu.memory_space<vmem>>, vector<32x256xbf16>
    tpu.vector_store %arg7[%c160, %c0_33], %54 {strides = array<i32>} : memref<304x256xbf16, #tpu.memory_space<vmem>>, vector<32x256xbf16>,
    %c241_i32 = arith.constant 241 : i32
    %56 = tpu.dynamic_rotate %1 by %c241_i32 dim 1 : vector<32x256xf32>, i32 -> vector<32x256xf32>
    %57 = vector.broadcast %20 : vector<1x256xf32> to vector<32x256xf32>
    %58 = arith.mulf %56, %57 : vector<32x256xf32>
    %59 = arith.truncf %58 : vector<32x256xf32> to vector<32x256xbf16>
    %c192 = arith.constant 192 : index
    %c0_34 = arith.constant 0 : index
    %60 = vector.load %arg7[%c192, %c0_34] : memref<304x256xbf16, #tpu.memory_space<vmem>>, vector<32x256xbf16>
    tpu.vector_store %arg7[%c192, %c0_34], %59 {strides = array<i32>} : memref<304x256xbf16, #tpu.memory_space<vmem>>, vector<32x256xbf16>,
    %c240_i32 = arith.constant 240 : i32
    %61 = tpu.dynamic_rotate %1 by %c240_i32 dim 1 : vector<32x256xf32>, i32 -> vector<32x256xf32>
    %62 = vector.broadcast %22 : vector<1x256xf32> to vector<32x256xf32>
    %63 = arith.mulf %61, %62 : vector<32x256xf32>
    %64 = arith.truncf %63 : vector<32x256xf32> to vector<32x256xbf16>
    %c224 = arith.constant 224 : index
    %c0_35 = arith.constant 0 : index
    %65 = vector.load %arg7[%c224, %c0_35] : memref<304x256xbf16, #tpu.memory_space<vmem>>, vector<32x256xbf16>
    tpu.vector_store %arg7[%c224, %c0_35], %64 {strides = array<i32>} : memref<304x256xbf16, #tpu.memory_space<vmem>>, vector<32x256xbf16>,
    %c239_i32 = arith.constant 239 : i32
    %66 = tpu.dynamic_rotate %1 by %c239_i32 dim 1 : vector<32x256xf32>, i32 -> vector<32x256xf32>
    %67 = vector.broadcast %24 : vector<1x256xf32> to vector<32x256xf32>
    %68 = arith.mulf %66, %67 : vector<32x256xf32>
    %69 = arith.truncf %68 : vector<32x256xf32> to vector<32x256xbf16>
    %c256 = arith.constant 256 : index
    %c0_36 = arith.constant 0 : index
    %70 = vector.load %arg7[%c256, %c0_36] : memref<304x256xbf16, #tpu.memory_space<vmem>>, vector<32x256xbf16>
    tpu.vector_store %arg7[%c256, %c0_36], %69 {strides = array<i32>} : memref<304x256xbf16, #tpu.memory_space<vmem>>, vector<32x256xbf16>,
    %c17_i32_37 = arith.constant 17 : i32
    %71 = tpu.dynamic_rotate %8 by %c17_i32_37 dim 1 : vector<1x256xf32>, i32 -> vector<1x256xf32>
    %72 = arith.mulf %71, %10 : vector<1x256xf32>
    %73 = arith.truncf %72 : vector<1x256xf32> to vector<1x256xbf16>
    %c288 = arith.constant 288 : index
    %c0_38 = arith.constant 0 : index
    %74 = vector.load %arg7[%c288, %c0_38] : memref<304x256xbf16, #tpu.memory_space<vmem>>, vector<1x256xbf16>
    tpu.vector_store %arg7[%c288, %c0_38], %73 {strides = array<i32>} : memref<304x256xbf16, #tpu.memory_space<vmem>>, vector<1x256xbf16>,
    %c16_i32_39 = arith.constant 16 : i32
    %75 = tpu.dynamic_rotate %8 by %c16_i32_39 dim 1 : vector<1x256xf32>, i32 -> vector<1x256xf32>
    %76 = arith.mulf %75, %12 : vector<1x256xf32>
    %77 = arith.truncf %76 : vector<1x256xf32> to vector<1x256xbf16>
    %c289 = arith.constant 289 : index
    %c0_40 = arith.constant 0 : index
    %78 = vector.load %arg7[%c289, %c0_40] : memref<304x256xbf16, #tpu.memory_space<vmem>>, vector<1x256xbf16>
    tpu.vector_store %arg7[%c289, %c0_40], %77 {strides = array<i32>} : memref<304x256xbf16, #tpu.memory_space<vmem>>, vector<1x256xbf16>,
    %c15_i32_41 = arith.constant 15 : i32
    %79 = tpu.dynamic_rotate %8 by %c15_i32_41 dim 1 : vector<1x256xf32>, i32 -> vector<1x256xf32>
    %80 = arith.mulf %79, %14 : vector<1x256xf32>
    %81 = arith.truncf %80 : vector<1x256xf32> to vector<1x256xbf16>
    %c290 = arith.constant 290 : index
    %c0_42 = arith.constant 0 : index
    %82 = vector.load %arg7[%c290, %c0_42] : memref<304x256xbf16, #tpu.memory_space<vmem>>, vector<1x256xbf16>
    tpu.vector_store %arg7[%c290, %c0_42], %81 {strides = array<i32>} : memref<304x256xbf16, #tpu.memory_space<vmem>>, vector<1x256xbf16>,
    %c1_i32_43 = arith.constant 1 : i32
    %83 = tpu.dynamic_rotate %8 by %c1_i32_43 dim 1 : vector<1x256xf32>, i32 -> vector<1x256xf32>
    %84 = arith.mulf %83, %16 : vector<1x256xf32>
    %85 = arith.truncf %84 : vector<1x256xf32> to vector<1x256xbf16>
    %c291 = arith.constant 291 : index
    %c0_44 = arith.constant 0 : index
    %86 = vector.load %arg7[%c291, %c0_44] : memref<304x256xbf16, #tpu.memory_space<vmem>>, vector<1x256xbf16>
    tpu.vector_store %arg7[%c291, %c0_44], %85 {strides = array<i32>} : memref<304x256xbf16, #tpu.memory_space<vmem>>, vector<1x256xbf16>,
    %87 = arith.truncf %8 : vector<1x256xf32> to vector<1x256xbf16>
    %c292 = arith.constant 292 : index
    %c0_45 = arith.constant 0 : index
    %88 = vector.load %arg7[%c292, %c0_45] : memref<304x256xbf16, #tpu.memory_space<vmem>>, vector<1x256xbf16>
    tpu.vector_store %arg7[%c292, %c0_45], %87 {strides = array<i32>} : memref<304x256xbf16, #tpu.memory_space<vmem>>, vector<1x256xbf16>,
    %c255_i32_46 = arith.constant 255 : i32
    %89 = tpu.dynamic_rotate %8 by %c255_i32_46 dim 1 : vector<1x256xf32>, i32 -> vector<1x256xf32>
    %90 = arith.mulf %89, %18 : vector<1x256xf32>
    %91 = arith.truncf %90 : vector<1x256xf32> to vector<1x256xbf16>
    %c293 = arith.constant 293 : index
    %c0_47 = arith.constant 0 : index
    %92 = vector.load %arg7[%c293, %c0_47] : memref<304x256xbf16, #tpu.memory_space<vmem>>, vector<1x256xbf16>
    tpu.vector_store %arg7[%c293, %c0_47], %91 {strides = array<i32>} : memref<304x256xbf16, #tpu.memory_space<vmem>>, vector<1x256xbf16>,
    %c241_i32_48 = arith.constant 241 : i32
    %93 = tpu.dynamic_rotate %8 by %c241_i32_48 dim 1 : vector<1x256xf32>, i32 -> vector<1x256xf32>
    %94 = arith.mulf %93, %20 : vector<1x256xf32>
    %95 = arith.truncf %94 : vector<1x256xf32> to vector<1x256xbf16>
    %c294 = arith.constant 294 : index
    %c0_49 = arith.constant 0 : index
    %96 = vector.load %arg7[%c294, %c0_49] : memref<304x256xbf16, #tpu.memory_space<vmem>>, vector<1x256xbf16>
    tpu.vector_store %arg7[%c294, %c0_49], %95 {strides = array<i32>} : memref<304x256xbf16, #tpu.memory_space<vmem>>, vector<1x256xbf16>,
    %c240_i32_50 = arith.constant 240 : i32
    %97 = tpu.dynamic_rotate %8 by %c240_i32_50 dim 1 : vector<1x256xf32>, i32 -> vector<1x256xf32>
    %98 = arith.mulf %97, %22 : vector<1x256xf32>
    %99 = arith.truncf %98 : vector<1x256xf32> to vector<1x256xbf16>
    %c295 = arith.constant 295 : index
    %c0_51 = arith.constant 0 : index
    %100 = vector.load %arg7[%c295, %c0_51] : memref<304x256xbf16, #tpu.memory_space<vmem>>, vector<1x256xbf16>
    tpu.vector_store %arg7[%c295, %c0_51], %99 {strides = array<i32>} : memref<304x256xbf16, #tpu.memory_space<vmem>>, vector<1x256xbf16>,
    %c239_i32_52 = arith.constant 239 : i32
    %101 = tpu.dynamic_rotate %8 by %c239_i32_52 dim 1 : vector<1x256xf32>, i32 -> vector<1x256xf32>
    %102 = arith.mulf %101, %24 : vector<1x256xf32>
    %103 = arith.truncf %102 : vector<1x256xf32> to vector<1x256xbf16>
    %c296 = arith.constant 296 : index
    %c0_53 = arith.constant 0 : index
    %104 = vector.load %arg7[%c296, %c0_53] : memref<304x256xbf16, #tpu.memory_space<vmem>>, vector<1x256xbf16>
    tpu.vector_store %arg7[%c296, %c0_53], %103 {strides = array<i32>} : memref<304x256xbf16, #tpu.memory_space<vmem>>, vector<1x256xbf16>,
    %c0_54 = arith.constant 0 : index
    %c0_55 = arith.constant 0 : index
    %c0_56 = arith.constant 0 : index
    %105 = vector.load %arg4[%c0_54, %c0_55, %c0_56] : memref<3x32x304xbf16, #tpu.memory_space<vmem>>, vector<1x32x304xbf16>
    %106 = vector.shape_cast %105 : vector<1x32x304xbf16> to vector<32x304xbf16>
    %c0_57 = arith.constant 0 : index
    %c0_58 = arith.constant 0 : index
    %107 = vector.load %arg7[%c0_57, %c0_58] : memref<304x256xbf16, #tpu.memory_space<vmem>>, vector<304x256xbf16>
    %cst_59 = arith.constant dense<0.000000e+00> : vector<32x256xf32>
    %108 = tpu.matmul %106, %107, %cst_59 {dimension_numbers = #tpu.dot_dimension_numbers<[1], [0], [0], [1], [0, 0, 1, 1], [], []>} : vector<32x304xbf16>, vector<304x256xbf16>, vector<32x256xf32> -> vector<32x256xf32>
    %cst_60 = arith.constant 0.000000e+00 : f32
    %109 = vector.broadcast %cst_60 : f32 to vector<32x256xf32>
    %110 = arith.maximumf %108, %109 : vector<32x256xf32>
    %111 = arith.addf %1, %110 : vector<32x256xf32>
    %c17_i32_61 = arith.constant 17 : i32
    %112 = tpu.dynamic_rotate %111 by %c17_i32_61 dim 1 : vector<32x256xf32>, i32 -> vector<32x256xf32>
    %113 = vector.broadcast %10 : vector<1x256xf32> to vector<32x256xf32>
    %114 = arith.mulf %112, %113 : vector<32x256xf32>
    %115 = arith.truncf %114 : vector<32x256xf32> to vector<32x256xbf16>
    %c0_62 = arith.constant 0 : index
    %c0_63 = arith.constant 0 : index
    %116 = vector.load %arg7[%c0_62, %c0_63] : memref<304x256xbf16, #tpu.memory_space<vmem>>, vector<32x256xbf16>
    tpu.vector_store %arg7[%c0_62, %c0_63], %115 {strides = array<i32>} : memref<304x256xbf16, #tpu.memory_space<vmem>>, vector<32x256xbf16>,
    %c16_i32_64 = arith.constant 16 : i32
    %117 = tpu.dynamic_rotate %111 by %c16_i32_64 dim 1 : vector<32x256xf32>, i32 -> vector<32x256xf32>
    %118 = vector.broadcast %12 : vector<1x256xf32> to vector<32x256xf32>
    %119 = arith.mulf %117, %118 : vector<32x256xf32>
    %120 = arith.truncf %119 : vector<32x256xf32> to vector<32x256xbf16>
    %c32_65 = arith.constant 32 : index
    %c0_66 = arith.constant 0 : index
    %121 = vector.load %arg7[%c32_65, %c0_66] : memref<304x256xbf16, #tpu.memory_space<vmem>>, vector<32x256xbf16>
    tpu.vector_store %arg7[%c32_65, %c0_66], %120 {strides = array<i32>} : memref<304x256xbf16, #tpu.memory_space<vmem>>, vector<32x256xbf16>,
    %c15_i32_67 = arith.constant 15 : i32
    %122 = tpu.dynamic_rotate %111 by %c15_i32_67 dim 1 : vector<32x256xf32>, i32 -> vector<32x256xf32>
    %123 = vector.broadcast %14 : vector<1x256xf32> to vector<32x256xf32>
    %124 = arith.mulf %122, %123 : vector<32x256xf32>
    %125 = arith.truncf %124 : vector<32x256xf32> to vector<32x256xbf16>
    %c64_68 = arith.constant 64 : index
    %c0_69 = arith.constant 0 : index
    %126 = vector.load %arg7[%c64_68, %c0_69] : memref<304x256xbf16, #tpu.memory_space<vmem>>, vector<32x256xbf16>
    tpu.vector_store %arg7[%c64_68, %c0_69], %125 {strides = array<i32>} : memref<304x256xbf16, #tpu.memory_space<vmem>>, vector<32x256xbf16>,
    %c1_i32_70 = arith.constant 1 : i32
    %127 = tpu.dynamic_rotate %111 by %c1_i32_70 dim 1 : vector<32x256xf32>, i32 -> vector<32x256xf32>
    %128 = vector.broadcast %16 : vector<1x256xf32> to vector<32x256xf32>
    %129 = arith.mulf %127, %128 : vector<32x256xf32>
    %130 = arith.truncf %129 : vector<32x256xf32> to vector<32x256xbf16>
    %c96_71 = arith.constant 96 : index
    %c0_72 = arith.constant 0 : index
    %131 = vector.load %arg7[%c96_71, %c0_72] : memref<304x256xbf16, #tpu.memory_space<vmem>>, vector<32x256xbf16>
    tpu.vector_store %arg7[%c96_71, %c0_72], %130 {strides = array<i32>} : memref<304x256xbf16, #tpu.memory_space<vmem>>, vector<32x256xbf16>,
    %132 = arith.truncf %111 : vector<32x256xf32> to vector<32x256xbf16>
    %c128_73 = arith.constant 128 : index
    %c0_74 = arith.constant 0 : index
    %133 = vector.load %arg7[%c128_73, %c0_74] : memref<304x256xbf16, #tpu.memory_space<vmem>>, vector<32x256xbf16>
    tpu.vector_store %arg7[%c128_73, %c0_74], %132 {strides = array<i32>} : memref<304x256xbf16, #tpu.memory_space<vmem>>, vector<32x256xbf16>,
    %c255_i32_75 = arith.constant 255 : i32
    %134 = tpu.dynamic_rotate %111 by %c255_i32_75 dim 1 : vector<32x256xf32>, i32 -> vector<32x256xf32>
    %135 = vector.broadcast %18 : vector<1x256xf32> to vector<32x256xf32>
    %136 = arith.mulf %134, %135 : vector<32x256xf32>
    %137 = arith.truncf %136 : vector<32x256xf32> to vector<32x256xbf16>
    %c160_76 = arith.constant 160 : index
    %c0_77 = arith.constant 0 : index
    %138 = vector.load %arg7[%c160_76, %c0_77] : memref<304x256xbf16, #tpu.memory_space<vmem>>, vector<32x256xbf16>
    tpu.vector_store %arg7[%c160_76, %c0_77], %137 {strides = array<i32>} : memref<304x256xbf16, #tpu.memory_space<vmem>>, vector<32x256xbf16>,
    %c241_i32_78 = arith.constant 241 : i32
    %139 = tpu.dynamic_rotate %111 by %c241_i32_78 dim 1 : vector<32x256xf32>, i32 -> vector<32x256xf32>
    %140 = vector.broadcast %20 : vector<1x256xf32> to vector<32x256xf32>
    %141 = arith.mulf %139, %140 : vector<32x256xf32>
    %142 = arith.truncf %141 : vector<32x256xf32> to vector<32x256xbf16>
    %c192_79 = arith.constant 192 : index
    %c0_80 = arith.constant 0 : index
    %143 = vector.load %arg7[%c192_79, %c0_80] : memref<304x256xbf16, #tpu.memory_space<vmem>>, vector<32x256xbf16>
    tpu.vector_store %arg7[%c192_79, %c0_80], %142 {strides = array<i32>} : memref<304x256xbf16, #tpu.memory_space<vmem>>, vector<32x256xbf16>,
    %c240_i32_81 = arith.constant 240 : i32
    %144 = tpu.dynamic_rotate %111 by %c240_i32_81 dim 1 : vector<32x256xf32>, i32 -> vector<32x256xf32>
    %145 = vector.broadcast %22 : vector<1x256xf32> to vector<32x256xf32>
    %146 = arith.mulf %144, %145 : vector<32x256xf32>
    %147 = arith.truncf %146 : vector<32x256xf32> to vector<32x256xbf16>
    %c224_82 = arith.constant 224 : index
    %c0_83 = arith.constant 0 : index
    %148 = vector.load %arg7[%c224_82, %c0_83] : memref<304x256xbf16, #tpu.memory_space<vmem>>, vector<32x256xbf16>
    tpu.vector_store %arg7[%c224_82, %c0_83], %147 {strides = array<i32>} : memref<304x256xbf16, #tpu.memory_space<vmem>>, vector<32x256xbf16>,
    %c239_i32_84 = arith.constant 239 : i32
    %149 = tpu.dynamic_rotate %111 by %c239_i32_84 dim 1 : vector<32x256xf32>, i32 -> vector<32x256xf32>
    %150 = vector.broadcast %24 : vector<1x256xf32> to vector<32x256xf32>
    %151 = arith.mulf %149, %150 : vector<32x256xf32>
    %152 = arith.truncf %151 : vector<32x256xf32> to vector<32x256xbf16>
    %c256_85 = arith.constant 256 : index
    %c0_86 = arith.constant 0 : index
    %153 = vector.load %arg7[%c256_85, %c0_86] : memref<304x256xbf16, #tpu.memory_space<vmem>>, vector<32x256xbf16>
    tpu.vector_store %arg7[%c256_85, %c0_86], %152 {strides = array<i32>} : memref<304x256xbf16, #tpu.memory_space<vmem>>, vector<32x256xbf16>,
    %c0_87 = arith.constant 0 : index
    %c0_88 = arith.constant 0 : index
    %c0_89 = arith.constant 0 : index
    %154 = vector.load %arg5[%c0_87, %c0_88, %c0_89] : memref<3x1x304xbf16, #tpu.memory_space<vmem>>, vector<1x1x304xbf16>
    %155 = vector.shape_cast %154 : vector<1x1x304xbf16> to vector<1x304xbf16>
    %c0_90 = arith.constant 0 : index
    %c0_91 = arith.constant 0 : index
    %156 = vector.load %arg7[%c0_90, %c0_91] : memref<304x256xbf16, #tpu.memory_space<vmem>>, vector<304x256xbf16>
    %cst_92 = arith.constant dense<0.000000e+00> : vector<1x256xf32>
    %157 = tpu.matmul %155, %156, %cst_92 {dimension_numbers = #tpu.dot_dimension_numbers<[1], [0], [0], [1], [0, 0, 1, 1], [], []>} : vector<1x304xbf16>, vector<304x256xbf16>, vector<1x256xf32> -> vector<1x256xf32>
    %158 = arith.addf %8, %157 : vector<1x256xf32>
    %c17_i32_93 = arith.constant 17 : i32
    %159 = tpu.dynamic_rotate %111 by %c17_i32_93 dim 1 : vector<32x256xf32>, i32 -> vector<32x256xf32>
    %160 = vector.broadcast %10 : vector<1x256xf32> to vector<32x256xf32>
    %161 = arith.mulf %159, %160 : vector<32x256xf32>
    %162 = arith.truncf %161 : vector<32x256xf32> to vector<32x256xbf16>
    %c0_94 = arith.constant 0 : index
    %c0_95 = arith.constant 0 : index
    %163 = vector.load %arg7[%c0_94, %c0_95] : memref<304x256xbf16, #tpu.memory_space<vmem>>, vector<32x256xbf16>
    tpu.vector_store %arg7[%c0_94, %c0_95], %162 {strides = array<i32>} : memref<304x256xbf16, #tpu.memory_space<vmem>>, vector<32x256xbf16>,
    %c16_i32_96 = arith.constant 16 : i32
    %164 = tpu.dynamic_rotate %111 by %c16_i32_96 dim 1 : vector<32x256xf32>, i32 -> vector<32x256xf32>
    %165 = vector.broadcast %12 : vector<1x256xf32> to vector<32x256xf32>
    %166 = arith.mulf %164, %165 : vector<32x256xf32>
    %167 = arith.truncf %166 : vector<32x256xf32> to vector<32x256xbf16>
    %c32_97 = arith.constant 32 : index
    %c0_98 = arith.constant 0 : index
    %168 = vector.load %arg7[%c32_97, %c0_98] : memref<304x256xbf16, #tpu.memory_space<vmem>>, vector<32x256xbf16>
    tpu.vector_store %arg7[%c32_97, %c0_98], %167 {strides = array<i32>} : memref<304x256xbf16, #tpu.memory_space<vmem>>, vector<32x256xbf16>,
    %c15_i32_99 = arith.constant 15 : i32
    %169 = tpu.dynamic_rotate %111 by %c15_i32_99 dim 1 : vector<32x256xf32>, i32 -> vector<32x256xf32>
    %170 = vector.broadcast %14 : vector<1x256xf32> to vector<32x256xf32>
    %171 = arith.mulf %169, %170 : vector<32x256xf32>
    %172 = arith.truncf %171 : vector<32x256xf32> to vector<32x256xbf16>
    %c64_100 = arith.constant 64 : index
    %c0_101 = arith.constant 0 : index
    %173 = vector.load %arg7[%c64_100, %c0_101] : memref<304x256xbf16, #tpu.memory_space<vmem>>, vector<32x256xbf16>
    tpu.vector_store %arg7[%c64_100, %c0_101], %172 {strides = array<i32>} : memref<304x256xbf16, #tpu.memory_space<vmem>>, vector<32x256xbf16>,
    %c1_i32_102 = arith.constant 1 : i32
    %174 = tpu.dynamic_rotate %111 by %c1_i32_102 dim 1 : vector<32x256xf32>, i32 -> vector<32x256xf32>
    %175 = vector.broadcast %16 : vector<1x256xf32> to vector<32x256xf32>
    %176 = arith.mulf %174, %175 : vector<32x256xf32>
    %177 = arith.truncf %176 : vector<32x256xf32> to vector<32x256xbf16>
    %c96_103 = arith.constant 96 : index
    %c0_104 = arith.constant 0 : index
    %178 = vector.load %arg7[%c96_103, %c0_104] : memref<304x256xbf16, #tpu.memory_space<vmem>>, vector<32x256xbf16>
    tpu.vector_store %arg7[%c96_103, %c0_104], %177 {strides = array<i32>} : memref<304x256xbf16, #tpu.memory_space<vmem>>, vector<32x256xbf16>,
    %179 = arith.truncf %111 : vector<32x256xf32> to vector<32x256xbf16>
    %c128_105 = arith.constant 128 : index
    %c0_106 = arith.constant 0 : index
    %180 = vector.load %arg7[%c128_105, %c0_106] : memref<304x256xbf16, #tpu.memory_space<vmem>>, vector<32x256xbf16>
    tpu.vector_store %arg7[%c128_105, %c0_106], %179 {strides = array<i32>} : memref<304x256xbf16, #tpu.memory_space<vmem>>, vector<32x256xbf16>,
    %c255_i32_107 = arith.constant 255 : i32
    %181 = tpu.dynamic_rotate %111 by %c255_i32_107 dim 1 : vector<32x256xf32>, i32 -> vector<32x256xf32>
    %182 = vector.broadcast %18 : vector<1x256xf32> to vector<32x256xf32>
    %183 = arith.mulf %181, %182 : vector<32x256xf32>
    %184 = arith.truncf %183 : vector<32x256xf32> to vector<32x256xbf16>
    %c160_108 = arith.constant 160 : index
    %c0_109 = arith.constant 0 : index
    %185 = vector.load %arg7[%c160_108, %c0_109] : memref<304x256xbf16, #tpu.memory_space<vmem>>, vector<32x256xbf16>
    tpu.vector_store %arg7[%c160_108, %c0_109], %184 {strides = array<i32>} : memref<304x256xbf16, #tpu.memory_space<vmem>>, vector<32x256xbf16>,
    %c241_i32_110 = arith.constant 241 : i32
    %186 = tpu.dynamic_rotate %111 by %c241_i32_110 dim 1 : vector<32x256xf32>, i32 -> vector<32x256xf32>
    %187 = vector.broadcast %20 : vector<1x256xf32> to vector<32x256xf32>
    %188 = arith.mulf %186, %187 : vector<32x256xf32>
    %189 = arith.truncf %188 : vector<32x256xf32> to vector<32x256xbf16>
    %c192_111 = arith.constant 192 : index
    %c0_112 = arith.constant 0 : index
    %190 = vector.load %arg7[%c192_111, %c0_112] : memref<304x256xbf16, #tpu.memory_space<vmem>>, vector<32x256xbf16>
    tpu.vector_store %arg7[%c192_111, %c0_112], %189 {strides = array<i32>} : memref<304x256xbf16, #tpu.memory_space<vmem>>, vector<32x256xbf16>,
    %c240_i32_113 = arith.constant 240 : i32
    %191 = tpu.dynamic_rotate %111 by %c240_i32_113 dim 1 : vector<32x256xf32>, i32 -> vector<32x256xf32>
    %192 = vector.broadcast %22 : vector<1x256xf32> to vector<32x256xf32>
    %193 = arith.mulf %191, %192 : vector<32x256xf32>
    %194 = arith.truncf %193 : vector<32x256xf32> to vector<32x256xbf16>
    %c224_114 = arith.constant 224 : index
    %c0_115 = arith.constant 0 : index
    %195 = vector.load %arg7[%c224_114, %c0_115] : memref<304x256xbf16, #tpu.memory_space<vmem>>, vector<32x256xbf16>
    tpu.vector_store %arg7[%c224_114, %c0_115], %194 {strides = array<i32>} : memref<304x256xbf16, #tpu.memory_space<vmem>>, vector<32x256xbf16>,
    %c239_i32_116 = arith.constant 239 : i32
    %196 = tpu.dynamic_rotate %111 by %c239_i32_116 dim 1 : vector<32x256xf32>, i32 -> vector<32x256xf32>
    %197 = vector.broadcast %24 : vector<1x256xf32> to vector<32x256xf32>
    %198 = arith.mulf %196, %197 : vector<32x256xf32>
    %199 = arith.truncf %198 : vector<32x256xf32> to vector<32x256xbf16>
    %c256_117 = arith.constant 256 : index
    %c0_118 = arith.constant 0 : index
    %200 = vector.load %arg7[%c256_117, %c0_118] : memref<304x256xbf16, #tpu.memory_space<vmem>>, vector<32x256xbf16>
    tpu.vector_store %arg7[%c256_117, %c0_118], %199 {strides = array<i32>} : memref<304x256xbf16, #tpu.memory_space<vmem>>, vector<32x256xbf16>,
    %c17_i32_119 = arith.constant 17 : i32
    %201 = tpu.dynamic_rotate %158 by %c17_i32_119 dim 1 : vector<1x256xf32>, i32 -> vector<1x256xf32>
    %202 = arith.mulf %201, %10 : vector<1x256xf32>
    %203 = arith.truncf %202 : vector<1x256xf32> to vector<1x256xbf16>
    %c288_120 = arith.constant 288 : index
    %c0_121 = arith.constant 0 : index
    %204 = vector.load %arg7[%c288_120, %c0_121] : memref<304x256xbf16, #tpu.memory_space<vmem>>, vector<1x256xbf16>
    tpu.vector_store %arg7[%c288_120, %c0_121], %203 {strides = array<i32>} : memref<304x256xbf16, #tpu.memory_space<vmem>>, vector<1x256xbf16>,
    %c16_i32_122 = arith.constant 16 : i32
    %205 = tpu.dynamic_rotate %158 by %c16_i32_122 dim 1 : vector<1x256xf32>, i32 -> vector<1x256xf32>
    %206 = arith.mulf %205, %12 : vector<1x256xf32>
    %207 = arith.truncf %206 : vector<1x256xf32> to vector<1x256xbf16>
    %c289_123 = arith.constant 289 : index
    %c0_124 = arith.constant 0 : index
    %208 = vector.load %arg7[%c289_123, %c0_124] : memref<304x256xbf16, #tpu.memory_space<vmem>>, vector<1x256xbf16>
    tpu.vector_store %arg7[%c289_123, %c0_124], %207 {strides = array<i32>} : memref<304x256xbf16, #tpu.memory_space<vmem>>, vector<1x256xbf16>,
    %c15_i32_125 = arith.constant 15 : i32
    %209 = tpu.dynamic_rotate %158 by %c15_i32_125 dim 1 : vector<1x256xf32>, i32 -> vector<1x256xf32>
    %210 = arith.mulf %209, %14 : vector<1x256xf32>
    %211 = arith.truncf %210 : vector<1x256xf32> to vector<1x256xbf16>
    %c290_126 = arith.constant 290 : index
    %c0_127 = arith.constant 0 : index
    %212 = vector.load %arg7[%c290_126, %c0_127] : memref<304x256xbf16, #tpu.memory_space<vmem>>, vector<1x256xbf16>
    tpu.vector_store %arg7[%c290_126, %c0_127], %211 {strides = array<i32>} : memref<304x256xbf16, #tpu.memory_space<vmem>>, vector<1x256xbf16>,
    %c1_i32_128 = arith.constant 1 : i32
    %213 = tpu.dynamic_rotate %158 by %c1_i32_128 dim 1 : vector<1x256xf32>, i32 -> vector<1x256xf32>
    %214 = arith.mulf %213, %16 : vector<1x256xf32>
    %215 = arith.truncf %214 : vector<1x256xf32> to vector<1x256xbf16>
    %c291_129 = arith.constant 291 : index
    %c0_130 = arith.constant 0 : index
    %216 = vector.load %arg7[%c291_129, %c0_130] : memref<304x256xbf16, #tpu.memory_space<vmem>>, vector<1x256xbf16>
    tpu.vector_store %arg7[%c291_129, %c0_130], %215 {strides = array<i32>} : memref<304x256xbf16, #tpu.memory_space<vmem>>, vector<1x256xbf16>,
    %217 = arith.truncf %158 : vector<1x256xf32> to vector<1x256xbf16>
    %c292_131 = arith.constant 292 : index
    %c0_132 = arith.constant 0 : index
    %218 = vector.load %arg7[%c292_131, %c0_132] : memref<304x256xbf16, #tpu.memory_space<vmem>>, vector<1x256xbf16>
    tpu.vector_store %arg7[%c292_131, %c0_132], %217 {strides = array<i32>} : memref<304x256xbf16, #tpu.memory_space<vmem>>, vector<1x256xbf16>,
    %c255_i32_133 = arith.constant 255 : i32
    %219 = tpu.dynamic_rotate %158 by %c255_i32_133 dim 1 : vector<1x256xf32>, i32 -> vector<1x256xf32>
    %220 = arith.mulf %219, %18 : vector<1x256xf32>
    %221 = arith.truncf %220 : vector<1x256xf32> to vector<1x256xbf16>
    %c293_134 = arith.constant 293 : index
    %c0_135 = arith.constant 0 : index
    %222 = vector.load %arg7[%c293_134, %c0_135] : memref<304x256xbf16, #tpu.memory_space<vmem>>, vector<1x256xbf16>
    tpu.vector_store %arg7[%c293_134, %c0_135], %221 {strides = array<i32>} : memref<304x256xbf16, #tpu.memory_space<vmem>>, vector<1x256xbf16>,
    %c241_i32_136 = arith.constant 241 : i32
    %223 = tpu.dynamic_rotate %158 by %c241_i32_136 dim 1 : vector<1x256xf32>, i32 -> vector<1x256xf32>
    %224 = arith.mulf %223, %20 : vector<1x256xf32>
    %225 = arith.truncf %224 : vector<1x256xf32> to vector<1x256xbf16>
    %c294_137 = arith.constant 294 : index
    %c0_138 = arith.constant 0 : index
    %226 = vector.load %arg7[%c294_137, %c0_138] : memref<304x256xbf16, #tpu.memory_space<vmem>>, vector<1x256xbf16>
    tpu.vector_store %arg7[%c294_137, %c0_138], %225 {strides = array<i32>} : memref<304x256xbf16, #tpu.memory_space<vmem>>, vector<1x256xbf16>,
    %c240_i32_139 = arith.constant 240 : i32
    %227 = tpu.dynamic_rotate %158 by %c240_i32_139 dim 1 : vector<1x256xf32>, i32 -> vector<1x256xf32>
    %228 = arith.mulf %227, %22 : vector<1x256xf32>
    %229 = arith.truncf %228 : vector<1x256xf32> to vector<1x256xbf16>
    %c295_140 = arith.constant 295 : index
    %c0_141 = arith.constant 0 : index
    %230 = vector.load %arg7[%c295_140, %c0_141] : memref<304x256xbf16, #tpu.memory_space<vmem>>, vector<1x256xbf16>
    tpu.vector_store %arg7[%c295_140, %c0_141], %229 {strides = array<i32>} : memref<304x256xbf16, #tpu.memory_space<vmem>>, vector<1x256xbf16>,
    %c239_i32_142 = arith.constant 239 : i32
    %231 = tpu.dynamic_rotate %158 by %c239_i32_142 dim 1 : vector<1x256xf32>, i32 -> vector<1x256xf32>
    %232 = arith.mulf %231, %24 : vector<1x256xf32>
    %233 = arith.truncf %232 : vector<1x256xf32> to vector<1x256xbf16>
    %c296_143 = arith.constant 296 : index
    %c0_144 = arith.constant 0 : index
    %234 = vector.load %arg7[%c296_143, %c0_144] : memref<304x256xbf16, #tpu.memory_space<vmem>>, vector<1x256xbf16>
    tpu.vector_store %arg7[%c296_143, %c0_144], %233 {strides = array<i32>} : memref<304x256xbf16, #tpu.memory_space<vmem>>, vector<1x256xbf16>,
    %c1_145 = arith.constant 1 : index
    %c0_146 = arith.constant 0 : index
    %c0_147 = arith.constant 0 : index
    %235 = vector.load %arg4[%c1_145, %c0_146, %c0_147] : memref<3x32x304xbf16, #tpu.memory_space<vmem>>, vector<1x32x304xbf16>
    %236 = vector.shape_cast %235 : vector<1x32x304xbf16> to vector<32x304xbf16>
    %c0_148 = arith.constant 0 : index
    %c0_149 = arith.constant 0 : index
    %237 = vector.load %arg7[%c0_148, %c0_149] : memref<304x256xbf16, #tpu.memory_space<vmem>>, vector<304x256xbf16>
    %cst_150 = arith.constant dense<0.000000e+00> : vector<32x256xf32>
    %238 = tpu.matmul %236, %237, %cst_150 {dimension_numbers = #tpu.dot_dimension_numbers<[1], [0], [0], [1], [0, 0, 1, 1], [], []>} : vector<32x304xbf16>, vector<304x256xbf16>, vector<32x256xf32> -> vector<32x256xf32>
    %cst_151 = arith.constant 0.000000e+00 : f32
    %239 = vector.broadcast %cst_151 : f32 to vector<32x256xf32>
    %240 = arith.maximumf %238, %239 : vector<32x256xf32>
    %241 = arith.addf %111, %240 : vector<32x256xf32>
    %c17_i32_152 = arith.constant 17 : i32
    %242 = tpu.dynamic_rotate %241 by %c17_i32_152 dim 1 : vector<32x256xf32>, i32 -> vector<32x256xf32>
    %243 = vector.broadcast %10 : vector<1x256xf32> to vector<32x256xf32>
    %244 = arith.mulf %242, %243 : vector<32x256xf32>
    %245 = arith.truncf %244 : vector<32x256xf32> to vector<32x256xbf16>
    %c0_153 = arith.constant 0 : index
    %c0_154 = arith.constant 0 : index
    %246 = vector.load %arg7[%c0_153, %c0_154] : memref<304x256xbf16, #tpu.memory_space<vmem>>, vector<32x256xbf16>
    tpu.vector_store %arg7[%c0_153, %c0_154], %245 {strides = array<i32>} : memref<304x256xbf16, #tpu.memory_space<vmem>>, vector<32x256xbf16>,
    %c16_i32_155 = arith.constant 16 : i32
    %247 = tpu.dynamic_rotate %241 by %c16_i32_155 dim 1 : vector<32x256xf32>, i32 -> vector<32x256xf32>
    %248 = vector.broadcast %12 : vector<1x256xf32> to vector<32x256xf32>
    %249 = arith.mulf %247, %248 : vector<32x256xf32>
    %250 = arith.truncf %249 : vector<32x256xf32> to vector<32x256xbf16>
    %c32_156 = arith.constant 32 : index
    %c0_157 = arith.constant 0 : index
    %251 = vector.load %arg7[%c32_156, %c0_157] : memref<304x256xbf16, #tpu.memory_space<vmem>>, vector<32x256xbf16>
    tpu.vector_store %arg7[%c32_156, %c0_157], %250 {strides = array<i32>} : memref<304x256xbf16, #tpu.memory_space<vmem>>, vector<32x256xbf16>,
    %c15_i32_158 = arith.constant 15 : i32
    %252 = tpu.dynamic_rotate %241 by %c15_i32_158 dim 1 : vector<32x256xf32>, i32 -> vector<32x256xf32>
    %253 = vector.broadcast %14 : vector<1x256xf32> to vector<32x256xf32>
    %254 = arith.mulf %252, %253 : vector<32x256xf32>
    %255 = arith.truncf %254 : vector<32x256xf32> to vector<32x256xbf16>
    %c64_159 = arith.constant 64 : index
    %c0_160 = arith.constant 0 : index
    %256 = vector.load %arg7[%c64_159, %c0_160] : memref<304x256xbf16, #tpu.memory_space<vmem>>, vector<32x256xbf16>
    tpu.vector_store %arg7[%c64_159, %c0_160], %255 {strides = array<i32>} : memref<304x256xbf16, #tpu.memory_space<vmem>>, vector<32x256xbf16>,
    %c1_i32_161 = arith.constant 1 : i32
    %257 = tpu.dynamic_rotate %241 by %c1_i32_161 dim 1 : vector<32x256xf32>, i32 -> vector<32x256xf32>
    %258 = vector.broadcast %16 : vector<1x256xf32> to vector<32x256xf32>
    %259 = arith.mulf %257, %258 : vector<32x256xf32>
    %260 = arith.truncf %259 : vector<32x256xf32> to vector<32x256xbf16>
    %c96_162 = arith.constant 96 : index
    %c0_163 = arith.constant 0 : index
    %261 = vector.load %arg7[%c96_162, %c0_163] : memref<304x256xbf16, #tpu.memory_space<vmem>>, vector<32x256xbf16>
    tpu.vector_store %arg7[%c96_162, %c0_163], %260 {strides = array<i32>} : memref<304x256xbf16, #tpu.memory_space<vmem>>, vector<32x256xbf16>,
    %262 = arith.truncf %241 : vector<32x256xf32> to vector<32x256xbf16>
    %c128_164 = arith.constant 128 : index
    %c0_165 = arith.constant 0 : index
    %263 = vector.load %arg7[%c128_164, %c0_165] : memref<304x256xbf16, #tpu.memory_space<vmem>>, vector<32x256xbf16>
    tpu.vector_store %arg7[%c128_164, %c0_165], %262 {strides = array<i32>} : memref<304x256xbf16, #tpu.memory_space<vmem>>, vector<32x256xbf16>,
    %c255_i32_166 = arith.constant 255 : i32
    %264 = tpu.dynamic_rotate %241 by %c255_i32_166 dim 1 : vector<32x256xf32>, i32 -> vector<32x256xf32>
    %265 = vector.broadcast %18 : vector<1x256xf32> to vector<32x256xf32>
    %266 = arith.mulf %264, %265 : vector<32x256xf32>
    %267 = arith.truncf %266 : vector<32x256xf32> to vector<32x256xbf16>
    %c160_167 = arith.constant 160 : index
    %c0_168 = arith.constant 0 : index
    %268 = vector.load %arg7[%c160_167, %c0_168] : memref<304x256xbf16, #tpu.memory_space<vmem>>, vector<32x256xbf16>
    tpu.vector_store %arg7[%c160_167, %c0_168], %267 {strides = array<i32>} : memref<304x256xbf16, #tpu.memory_space<vmem>>, vector<32x256xbf16>,
    %c241_i32_169 = arith.constant 241 : i32
    %269 = tpu.dynamic_rotate %241 by %c241_i32_169 dim 1 : vector<32x256xf32>, i32 -> vector<32x256xf32>
    %270 = vector.broadcast %20 : vector<1x256xf32> to vector<32x256xf32>
    %271 = arith.mulf %269, %270 : vector<32x256xf32>
    %272 = arith.truncf %271 : vector<32x256xf32> to vector<32x256xbf16>
    %c192_170 = arith.constant 192 : index
    %c0_171 = arith.constant 0 : index
    %273 = vector.load %arg7[%c192_170, %c0_171] : memref<304x256xbf16, #tpu.memory_space<vmem>>, vector<32x256xbf16>
    tpu.vector_store %arg7[%c192_170, %c0_171], %272 {strides = array<i32>} : memref<304x256xbf16, #tpu.memory_space<vmem>>, vector<32x256xbf16>,
    %c240_i32_172 = arith.constant 240 : i32
    %274 = tpu.dynamic_rotate %241 by %c240_i32_172 dim 1 : vector<32x256xf32>, i32 -> vector<32x256xf32>
    %275 = vector.broadcast %22 : vector<1x256xf32> to vector<32x256xf32>
    %276 = arith.mulf %274, %275 : vector<32x256xf32>
    %277 = arith.truncf %276 : vector<32x256xf32> to vector<32x256xbf16>
    %c224_173 = arith.constant 224 : index
    %c0_174 = arith.constant 0 : index
    %278 = vector.load %arg7[%c224_173, %c0_174] : memref<304x256xbf16, #tpu.memory_space<vmem>>, vector<32x256xbf16>
    tpu.vector_store %arg7[%c224_173, %c0_174], %277 {strides = array<i32>} : memref<304x256xbf16, #tpu.memory_space<vmem>>, vector<32x256xbf16>,
    %c239_i32_175 = arith.constant 239 : i32
    %279 = tpu.dynamic_rotate %241 by %c239_i32_175 dim 1 : vector<32x256xf32>, i32 -> vector<32x256xf32>
    %280 = vector.broadcast %24 : vector<1x256xf32> to vector<32x256xf32>
    %281 = arith.mulf %279, %280 : vector<32x256xf32>
    %282 = arith.truncf %281 : vector<32x256xf32> to vector<32x256xbf16>
    %c256_176 = arith.constant 256 : index
    %c0_177 = arith.constant 0 : index
    %283 = vector.load %arg7[%c256_176, %c0_177] : memref<304x256xbf16, #tpu.memory_space<vmem>>, vector<32x256xbf16>
    tpu.vector_store %arg7[%c256_176, %c0_177], %282 {strides = array<i32>} : memref<304x256xbf16, #tpu.memory_space<vmem>>, vector<32x256xbf16>,
    %c1_178 = arith.constant 1 : index
    %c0_179 = arith.constant 0 : index
    %c0_180 = arith.constant 0 : index
    %284 = vector.load %arg5[%c1_178, %c0_179, %c0_180] : memref<3x1x304xbf16, #tpu.memory_space<vmem>>, vector<1x1x304xbf16>
    %285 = vector.shape_cast %284 : vector<1x1x304xbf16> to vector<1x304xbf16>
    %c0_181 = arith.constant 0 : index
    %c0_182 = arith.constant 0 : index
    %286 = vector.load %arg7[%c0_181, %c0_182] : memref<304x256xbf16, #tpu.memory_space<vmem>>, vector<304x256xbf16>
    %cst_183 = arith.constant dense<0.000000e+00> : vector<1x256xf32>
    %287 = tpu.matmul %285, %286, %cst_183 {dimension_numbers = #tpu.dot_dimension_numbers<[1], [0], [0], [1], [0, 0, 1, 1], [], []>} : vector<1x304xbf16>, vector<304x256xbf16>, vector<1x256xf32> -> vector<1x256xf32>
    %288 = arith.addf %158, %287 : vector<1x256xf32>
    %c17_i32_184 = arith.constant 17 : i32
    %289 = tpu.dynamic_rotate %241 by %c17_i32_184 dim 1 : vector<32x256xf32>, i32 -> vector<32x256xf32>
    %290 = vector.broadcast %10 : vector<1x256xf32> to vector<32x256xf32>
    %291 = arith.mulf %289, %290 : vector<32x256xf32>
    %292 = arith.truncf %291 : vector<32x256xf32> to vector<32x256xbf16>
    %c0_185 = arith.constant 0 : index
    %c0_186 = arith.constant 0 : index
    %293 = vector.load %arg7[%c0_185, %c0_186] : memref<304x256xbf16, #tpu.memory_space<vmem>>, vector<32x256xbf16>
    tpu.vector_store %arg7[%c0_185, %c0_186], %292 {strides = array<i32>} : memref<304x256xbf16, #tpu.memory_space<vmem>>, vector<32x256xbf16>,
    %c16_i32_187 = arith.constant 16 : i32
    %294 = tpu.dynamic_rotate %241 by %c16_i32_187 dim 1 : vector<32x256xf32>, i32 -> vector<32x256xf32>
    %295 = vector.broadcast %12 : vector<1x256xf32> to vector<32x256xf32>
    %296 = arith.mulf %294, %295 : vector<32x256xf32>
    %297 = arith.truncf %296 : vector<32x256xf32> to vector<32x256xbf16>
    %c32_188 = arith.constant 32 : index
    %c0_189 = arith.constant 0 : index
    %298 = vector.load %arg7[%c32_188, %c0_189] : memref<304x256xbf16, #tpu.memory_space<vmem>>, vector<32x256xbf16>
    tpu.vector_store %arg7[%c32_188, %c0_189], %297 {strides = array<i32>} : memref<304x256xbf16, #tpu.memory_space<vmem>>, vector<32x256xbf16>,
    %c15_i32_190 = arith.constant 15 : i32
    %299 = tpu.dynamic_rotate %241 by %c15_i32_190 dim 1 : vector<32x256xf32>, i32 -> vector<32x256xf32>
    %300 = vector.broadcast %14 : vector<1x256xf32> to vector<32x256xf32>
    %301 = arith.mulf %299, %300 : vector<32x256xf32>
    %302 = arith.truncf %301 : vector<32x256xf32> to vector<32x256xbf16>
    %c64_191 = arith.constant 64 : index
    %c0_192 = arith.constant 0 : index
    %303 = vector.load %arg7[%c64_191, %c0_192] : memref<304x256xbf16, #tpu.memory_space<vmem>>, vector<32x256xbf16>
    tpu.vector_store %arg7[%c64_191, %c0_192], %302 {strides = array<i32>} : memref<304x256xbf16, #tpu.memory_space<vmem>>, vector<32x256xbf16>,
    %c1_i32_193 = arith.constant 1 : i32
    %304 = tpu.dynamic_rotate %241 by %c1_i32_193 dim 1 : vector<32x256xf32>, i32 -> vector<32x256xf32>
    %305 = vector.broadcast %16 : vector<1x256xf32> to vector<32x256xf32>
    %306 = arith.mulf %304, %305 : vector<32x256xf32>
    %307 = arith.truncf %306 : vector<32x256xf32> to vector<32x256xbf16>
    %c96_194 = arith.constant 96 : index
    %c0_195 = arith.constant 0 : index
    %308 = vector.load %arg7[%c96_194, %c0_195] : memref<304x256xbf16, #tpu.memory_space<vmem>>, vector<32x256xbf16>
    tpu.vector_store %arg7[%c96_194, %c0_195], %307 {strides = array<i32>} : memref<304x256xbf16, #tpu.memory_space<vmem>>, vector<32x256xbf16>,
    %309 = arith.truncf %241 : vector<32x256xf32> to vector<32x256xbf16>
    %c128_196 = arith.constant 128 : index
    %c0_197 = arith.constant 0 : index
    %310 = vector.load %arg7[%c128_196, %c0_197] : memref<304x256xbf16, #tpu.memory_space<vmem>>, vector<32x256xbf16>
    tpu.vector_store %arg7[%c128_196, %c0_197], %309 {strides = array<i32>} : memref<304x256xbf16, #tpu.memory_space<vmem>>, vector<32x256xbf16>,
    %c255_i32_198 = arith.constant 255 : i32
    %311 = tpu.dynamic_rotate %241 by %c255_i32_198 dim 1 : vector<32x256xf32>, i32 -> vector<32x256xf32>
    %312 = vector.broadcast %18 : vector<1x256xf32> to vector<32x256xf32>
    %313 = arith.mulf %311, %312 : vector<32x256xf32>
    %314 = arith.truncf %313 : vector<32x256xf32> to vector<32x256xbf16>
    %c160_199 = arith.constant 160 : index
    %c0_200 = arith.constant 0 : index
    %315 = vector.load %arg7[%c160_199, %c0_200] : memref<304x256xbf16, #tpu.memory_space<vmem>>, vector<32x256xbf16>
    tpu.vector_store %arg7[%c160_199, %c0_200], %314 {strides = array<i32>} : memref<304x256xbf16, #tpu.memory_space<vmem>>, vector<32x256xbf16>,
    %c241_i32_201 = arith.constant 241 : i32
    %316 = tpu.dynamic_rotate %241 by %c241_i32_201 dim 1 : vector<32x256xf32>, i32 -> vector<32x256xf32>
    %317 = vector.broadcast %20 : vector<1x256xf32> to vector<32x256xf32>
    %318 = arith.mulf %316, %317 : vector<32x256xf32>
    %319 = arith.truncf %318 : vector<32x256xf32> to vector<32x256xbf16>
    %c192_202 = arith.constant 192 : index
    %c0_203 = arith.constant 0 : index
    %320 = vector.load %arg7[%c192_202, %c0_203] : memref<304x256xbf16, #tpu.memory_space<vmem>>, vector<32x256xbf16>
    tpu.vector_store %arg7[%c192_202, %c0_203], %319 {strides = array<i32>} : memref<304x256xbf16, #tpu.memory_space<vmem>>, vector<32x256xbf16>,
    %c240_i32_204 = arith.constant 240 : i32
    %321 = tpu.dynamic_rotate %241 by %c240_i32_204 dim 1 : vector<32x256xf32>, i32 -> vector<32x256xf32>
    %322 = vector.broadcast %22 : vector<1x256xf32> to vector<32x256xf32>
    %323 = arith.mulf %321, %322 : vector<32x256xf32>
    %324 = arith.truncf %323 : vector<32x256xf32> to vector<32x256xbf16>
    %c224_205 = arith.constant 224 : index
    %c0_206 = arith.constant 0 : index
    %325 = vector.load %arg7[%c224_205, %c0_206] : memref<304x256xbf16, #tpu.memory_space<vmem>>, vector<32x256xbf16>
    tpu.vector_store %arg7[%c224_205, %c0_206], %324 {strides = array<i32>} : memref<304x256xbf16, #tpu.memory_space<vmem>>, vector<32x256xbf16>,
    %c239_i32_207 = arith.constant 239 : i32
    %326 = tpu.dynamic_rotate %241 by %c239_i32_207 dim 1 : vector<32x256xf32>, i32 -> vector<32x256xf32>
    %327 = vector.broadcast %24 : vector<1x256xf32> to vector<32x256xf32>
    %328 = arith.mulf %326, %327 : vector<32x256xf32>
    %329 = arith.truncf %328 : vector<32x256xf32> to vector<32x256xbf16>
    %c256_208 = arith.constant 256 : index
    %c0_209 = arith.constant 0 : index
    %330 = vector.load %arg7[%c256_208, %c0_209] : memref<304x256xbf16, #tpu.memory_space<vmem>>, vector<32x256xbf16>
    tpu.vector_store %arg7[%c256_208, %c0_209], %329 {strides = array<i32>} : memref<304x256xbf16, #tpu.memory_space<vmem>>, vector<32x256xbf16>,
    %c17_i32_210 = arith.constant 17 : i32
    %331 = tpu.dynamic_rotate %288 by %c17_i32_210 dim 1 : vector<1x256xf32>, i32 -> vector<1x256xf32>
    %332 = arith.mulf %331, %10 : vector<1x256xf32>
    %333 = arith.truncf %332 : vector<1x256xf32> to vector<1x256xbf16>
    %c288_211 = arith.constant 288 : index
    %c0_212 = arith.constant 0 : index
    %334 = vector.load %arg7[%c288_211, %c0_212] : memref<304x256xbf16, #tpu.memory_space<vmem>>, vector<1x256xbf16>
    tpu.vector_store %arg7[%c288_211, %c0_212], %333 {strides = array<i32>} : memref<304x256xbf16, #tpu.memory_space<vmem>>, vector<1x256xbf16>,
    %c16_i32_213 = arith.constant 16 : i32
    %335 = tpu.dynamic_rotate %288 by %c16_i32_213 dim 1 : vector<1x256xf32>, i32 -> vector<1x256xf32>
    %336 = arith.mulf %335, %12 : vector<1x256xf32>
    %337 = arith.truncf %336 : vector<1x256xf32> to vector<1x256xbf16>
    %c289_214 = arith.constant 289 : index
    %c0_215 = arith.constant 0 : index
    %338 = vector.load %arg7[%c289_214, %c0_215] : memref<304x256xbf16, #tpu.memory_space<vmem>>, vector<1x256xbf16>
    tpu.vector_store %arg7[%c289_214, %c0_215], %337 {strides = array<i32>} : memref<304x256xbf16, #tpu.memory_space<vmem>>, vector<1x256xbf16>,
    %c15_i32_216 = arith.constant 15 : i32
    %339 = tpu.dynamic_rotate %288 by %c15_i32_216 dim 1 : vector<1x256xf32>, i32 -> vector<1x256xf32>
    %340 = arith.mulf %339, %14 : vector<1x256xf32>
    %341 = arith.truncf %340 : vector<1x256xf32> to vector<1x256xbf16>
    %c290_217 = arith.constant 290 : index
    %c0_218 = arith.constant 0 : index
    %342 = vector.load %arg7[%c290_217, %c0_218] : memref<304x256xbf16, #tpu.memory_space<vmem>>, vector<1x256xbf16>
    tpu.vector_store %arg7[%c290_217, %c0_218], %341 {strides = array<i32>} : memref<304x256xbf16, #tpu.memory_space<vmem>>, vector<1x256xbf16>,
    %c1_i32_219 = arith.constant 1 : i32
    %343 = tpu.dynamic_rotate %288 by %c1_i32_219 dim 1 : vector<1x256xf32>, i32 -> vector<1x256xf32>
    %344 = arith.mulf %343, %16 : vector<1x256xf32>
    %345 = arith.truncf %344 : vector<1x256xf32> to vector<1x256xbf16>
    %c291_220 = arith.constant 291 : index
    %c0_221 = arith.constant 0 : index
    %346 = vector.load %arg7[%c291_220, %c0_221] : memref<304x256xbf16, #tpu.memory_space<vmem>>, vector<1x256xbf16>
    tpu.vector_store %arg7[%c291_220, %c0_221], %345 {strides = array<i32>} : memref<304x256xbf16, #tpu.memory_space<vmem>>, vector<1x256xbf16>,
    %347 = arith.truncf %288 : vector<1x256xf32> to vector<1x256xbf16>
    %c292_222 = arith.constant 292 : index
    %c0_223 = arith.constant 0 : index
    %348 = vector.load %arg7[%c292_222, %c0_223] : memref<304x256xbf16, #tpu.memory_space<vmem>>, vector<1x256xbf16>
    tpu.vector_store %arg7[%c292_222, %c0_223], %347 {strides = array<i32>} : memref<304x256xbf16, #tpu.memory_space<vmem>>, vector<1x256xbf16>,
    %c255_i32_224 = arith.constant 255 : i32
    %349 = tpu.dynamic_rotate %288 by %c255_i32_224 dim 1 : vector<1x256xf32>, i32 -> vector<1x256xf32>
    %350 = arith.mulf %349, %18 : vector<1x256xf32>
    %351 = arith.truncf %350 : vector<1x256xf32> to vector<1x256xbf16>
    %c293_225 = arith.constant 293 : index
    %c0_226 = arith.constant 0 : index
    %352 = vector.load %arg7[%c293_225, %c0_226] : memref<304x256xbf16, #tpu.memory_space<vmem>>, vector<1x256xbf16>
    tpu.vector_store %arg7[%c293_225, %c0_226], %351 {strides = array<i32>} : memref<304x256xbf16, #tpu.memory_space<vmem>>, vector<1x256xbf16>,
    %c241_i32_227 = arith.constant 241 : i32
    %353 = tpu.dynamic_rotate %288 by %c241_i32_227 dim 1 : vector<1x256xf32>, i32 -> vector<1x256xf32>
    %354 = arith.mulf %353, %20 : vector<1x256xf32>
    %355 = arith.truncf %354 : vector<1x256xf32> to vector<1x256xbf16>
    %c294_228 = arith.constant 294 : index
    %c0_229 = arith.constant 0 : index
    %356 = vector.load %arg7[%c294_228, %c0_229] : memref<304x256xbf16, #tpu.memory_space<vmem>>, vector<1x256xbf16>
    tpu.vector_store %arg7[%c294_228, %c0_229], %355 {strides = array<i32>} : memref<304x256xbf16, #tpu.memory_space<vmem>>, vector<1x256xbf16>,
    %c240_i32_230 = arith.constant 240 : i32
    %357 = tpu.dynamic_rotate %288 by %c240_i32_230 dim 1 : vector<1x256xf32>, i32 -> vector<1x256xf32>
    %358 = arith.mulf %357, %22 : vector<1x256xf32>
    %359 = arith.truncf %358 : vector<1x256xf32> to vector<1x256xbf16>
    %c295_231 = arith.constant 295 : index
    %c0_232 = arith.constant 0 : index
    %360 = vector.load %arg7[%c295_231, %c0_232] : memref<304x256xbf16, #tpu.memory_space<vmem>>, vector<1x256xbf16>
    tpu.vector_store %arg7[%c295_231, %c0_232], %359 {strides = array<i32>} : memref<304x256xbf16, #tpu.memory_space<vmem>>, vector<1x256xbf16>,
    %c239_i32_233 = arith.constant 239 : i32
    %361 = tpu.dynamic_rotate %288 by %c239_i32_233 dim 1 : vector<1x256xf32>, i32 -> vector<1x256xf32>
    %362 = arith.mulf %361, %24 : vector<1x256xf32>
    %363 = arith.truncf %362 : vector<1x256xf32> to vector<1x256xbf16>
    %c296_234 = arith.constant 296 : index
    %c0_235 = arith.constant 0 : index
    %364 = vector.load %arg7[%c296_234, %c0_235] : memref<304x256xbf16, #tpu.memory_space<vmem>>, vector<1x256xbf16>
    tpu.vector_store %arg7[%c296_234, %c0_235], %363 {strides = array<i32>} : memref<304x256xbf16, #tpu.memory_space<vmem>>, vector<1x256xbf16>,
    %c2_236 = arith.constant 2 : index
    %c0_237 = arith.constant 0 : index
    %c0_238 = arith.constant 0 : index
    %365 = vector.load %arg4[%c2_236, %c0_237, %c0_238] : memref<3x32x304xbf16, #tpu.memory_space<vmem>>, vector<1x32x304xbf16>
    %366 = vector.shape_cast %365 : vector<1x32x304xbf16> to vector<32x304xbf16>
    %c0_239 = arith.constant 0 : index
    %c0_240 = arith.constant 0 : index
    %367 = vector.load %arg7[%c0_239, %c0_240] : memref<304x256xbf16, #tpu.memory_space<vmem>>, vector<304x256xbf16>
    %cst_241 = arith.constant dense<0.000000e+00> : vector<32x256xf32>
    %368 = tpu.matmul %366, %367, %cst_241 {dimension_numbers = #tpu.dot_dimension_numbers<[1], [0], [0], [1], [0, 0, 1, 1], [], []>} : vector<32x304xbf16>, vector<304x256xbf16>, vector<32x256xf32> -> vector<32x256xf32>
    %cst_242 = arith.constant 0.000000e+00 : f32
    %369 = vector.broadcast %cst_242 : f32 to vector<32x256xf32>
    %370 = arith.maximumf %368, %369 : vector<32x256xf32>
    %371 = arith.addf %241, %370 : vector<32x256xf32>
    %c17_i32_243 = arith.constant 17 : i32
    %372 = tpu.dynamic_rotate %371 by %c17_i32_243 dim 1 : vector<32x256xf32>, i32 -> vector<32x256xf32>
    %373 = vector.broadcast %10 : vector<1x256xf32> to vector<32x256xf32>
    %374 = arith.mulf %372, %373 : vector<32x256xf32>
    %375 = arith.truncf %374 : vector<32x256xf32> to vector<32x256xbf16>
    %c0_244 = arith.constant 0 : index
    %c0_245 = arith.constant 0 : index
    %376 = vector.load %arg7[%c0_244, %c0_245] : memref<304x256xbf16, #tpu.memory_space<vmem>>, vector<32x256xbf16>
    tpu.vector_store %arg7[%c0_244, %c0_245], %375 {strides = array<i32>} : memref<304x256xbf16, #tpu.memory_space<vmem>>, vector<32x256xbf16>,
    %c16_i32_246 = arith.constant 16 : i32
    %377 = tpu.dynamic_rotate %371 by %c16_i32_246 dim 1 : vector<32x256xf32>, i32 -> vector<32x256xf32>
    %378 = vector.broadcast %12 : vector<1x256xf32> to vector<32x256xf32>
    %379 = arith.mulf %377, %378 : vector<32x256xf32>
    %380 = arith.truncf %379 : vector<32x256xf32> to vector<32x256xbf16>
    %c32_247 = arith.constant 32 : index
    %c0_248 = arith.constant 0 : index
    %381 = vector.load %arg7[%c32_247, %c0_248] : memref<304x256xbf16, #tpu.memory_space<vmem>>, vector<32x256xbf16>
    tpu.vector_store %arg7[%c32_247, %c0_248], %380 {strides = array<i32>} : memref<304x256xbf16, #tpu.memory_space<vmem>>, vector<32x256xbf16>,
    %c15_i32_249 = arith.constant 15 : i32
    %382 = tpu.dynamic_rotate %371 by %c15_i32_249 dim 1 : vector<32x256xf32>, i32 -> vector<32x256xf32>
    %383 = vector.broadcast %14 : vector<1x256xf32> to vector<32x256xf32>
    %384 = arith.mulf %382, %383 : vector<32x256xf32>
    %385 = arith.truncf %384 : vector<32x256xf32> to vector<32x256xbf16>
    %c64_250 = arith.constant 64 : index
    %c0_251 = arith.constant 0 : index
    %386 = vector.load %arg7[%c64_250, %c0_251] : memref<304x256xbf16, #tpu.memory_space<vmem>>, vector<32x256xbf16>
    tpu.vector_store %arg7[%c64_250, %c0_251], %385 {strides = array<i32>} : memref<304x256xbf16, #tpu.memory_space<vmem>>, vector<32x256xbf16>,
    %c1_i32_252 = arith.constant 1 : i32
    %387 = tpu.dynamic_rotate %371 by %c1_i32_252 dim 1 : vector<32x256xf32>, i32 -> vector<32x256xf32>
    %388 = vector.broadcast %16 : vector<1x256xf32> to vector<32x256xf32>
    %389 = arith.mulf %387, %388 : vector<32x256xf32>
    %390 = arith.truncf %389 : vector<32x256xf32> to vector<32x256xbf16>
    %c96_253 = arith.constant 96 : index
    %c0_254 = arith.constant 0 : index
    %391 = vector.load %arg7[%c96_253, %c0_254] : memref<304x256xbf16, #tpu.memory_space<vmem>>, vector<32x256xbf16>
    tpu.vector_store %arg7[%c96_253, %c0_254], %390 {strides = array<i32>} : memref<304x256xbf16, #tpu.memory_space<vmem>>, vector<32x256xbf16>,
    %392 = arith.truncf %371 : vector<32x256xf32> to vector<32x256xbf16>
    %c128_255 = arith.constant 128 : index
    %c0_256 = arith.constant 0 : index
    %393 = vector.load %arg7[%c128_255, %c0_256] : memref<304x256xbf16, #tpu.memory_space<vmem>>, vector<32x256xbf16>
    tpu.vector_store %arg7[%c128_255, %c0_256], %392 {strides = array<i32>} : memref<304x256xbf16, #tpu.memory_space<vmem>>, vector<32x256xbf16>,
    %c255_i32_257 = arith.constant 255 : i32
    %394 = tpu.dynamic_rotate %371 by %c255_i32_257 dim 1 : vector<32x256xf32>, i32 -> vector<32x256xf32>
    %395 = vector.broadcast %18 : vector<1x256xf32> to vector<32x256xf32>
    %396 = arith.mulf %394, %395 : vector<32x256xf32>
    %397 = arith.truncf %396 : vector<32x256xf32> to vector<32x256xbf16>
    %c160_258 = arith.constant 160 : index
    %c0_259 = arith.constant 0 : index
    %398 = vector.load %arg7[%c160_258, %c0_259] : memref<304x256xbf16, #tpu.memory_space<vmem>>, vector<32x256xbf16>
    tpu.vector_store %arg7[%c160_258, %c0_259], %397 {strides = array<i32>} : memref<304x256xbf16, #tpu.memory_space<vmem>>, vector<32x256xbf16>,
    %c241_i32_260 = arith.constant 241 : i32
    %399 = tpu.dynamic_rotate %371 by %c241_i32_260 dim 1 : vector<32x256xf32>, i32 -> vector<32x256xf32>
    %400 = vector.broadcast %20 : vector<1x256xf32> to vector<32x256xf32>
    %401 = arith.mulf %399, %400 : vector<32x256xf32>
    %402 = arith.truncf %401 : vector<32x256xf32> to vector<32x256xbf16>
    %c192_261 = arith.constant 192 : index
    %c0_262 = arith.constant 0 : index
    %403 = vector.load %arg7[%c192_261, %c0_262] : memref<304x256xbf16, #tpu.memory_space<vmem>>, vector<32x256xbf16>
    tpu.vector_store %arg7[%c192_261, %c0_262], %402 {strides = array<i32>} : memref<304x256xbf16, #tpu.memory_space<vmem>>, vector<32x256xbf16>,
    %c240_i32_263 = arith.constant 240 : i32
    %404 = tpu.dynamic_rotate %371 by %c240_i32_263 dim 1 : vector<32x256xf32>, i32 -> vector<32x256xf32>
    %405 = vector.broadcast %22 : vector<1x256xf32> to vector<32x256xf32>
    %406 = arith.mulf %404, %405 : vector<32x256xf32>
    %407 = arith.truncf %406 : vector<32x256xf32> to vector<32x256xbf16>
    %c224_264 = arith.constant 224 : index
    %c0_265 = arith.constant 0 : index
    %408 = vector.load %arg7[%c224_264, %c0_265] : memref<304x256xbf16, #tpu.memory_space<vmem>>, vector<32x256xbf16>
    tpu.vector_store %arg7[%c224_264, %c0_265], %407 {strides = array<i32>} : memref<304x256xbf16, #tpu.memory_space<vmem>>, vector<32x256xbf16>,
    %c239_i32_266 = arith.constant 239 : i32
    %409 = tpu.dynamic_rotate %371 by %c239_i32_266 dim 1 : vector<32x256xf32>, i32 -> vector<32x256xf32>
    %410 = vector.broadcast %24 : vector<1x256xf32> to vector<32x256xf32>
    %411 = arith.mulf %409, %410 : vector<32x256xf32>
    %412 = arith.truncf %411 : vector<32x256xf32> to vector<32x256xbf16>
    %c256_267 = arith.constant 256 : index
    %c0_268 = arith.constant 0 : index
    %413 = vector.load %arg7[%c256_267, %c0_268] : memref<304x256xbf16, #tpu.memory_space<vmem>>, vector<32x256xbf16>
    tpu.vector_store %arg7[%c256_267, %c0_268], %412 {strides = array<i32>} : memref<304x256xbf16, #tpu.memory_space<vmem>>, vector<32x256xbf16>,
    %c2_269 = arith.constant 2 : index
    %c0_270 = arith.constant 0 : index
    %c0_271 = arith.constant 0 : index
    %414 = vector.load %arg5[%c2_269, %c0_270, %c0_271] : memref<3x1x304xbf16, #tpu.memory_space<vmem>>, vector<1x1x304xbf16>
    %415 = vector.shape_cast %414 : vector<1x1x304xbf16> to vector<1x304xbf16>
    %c0_272 = arith.constant 0 : index
    %c0_273 = arith.constant 0 : index
    %416 = vector.load %arg7[%c0_272, %c0_273] : memref<304x256xbf16, #tpu.memory_space<vmem>>, vector<304x256xbf16>
    %cst_274 = arith.constant dense<0.000000e+00> : vector<1x256xf32>
    %417 = tpu.matmul %415, %416, %cst_274 {dimension_numbers = #tpu.dot_dimension_numbers<[1], [0], [0], [1], [0, 0, 1, 1], [], []>} : vector<1x304xbf16>, vector<304x256xbf16>, vector<1x256xf32> -> vector<1x256xf32>
    %418 = arith.addf %288, %417 : vector<1x256xf32>
    %c0_275 = arith.constant 0 : index
    %c0_276 = arith.constant 0 : index
    %c0_277 = arith.constant 0 : index
    %419 = vector.load %arg6[%c0_275, %c0_276, %c0_277] : memref<1x1x256xf32, #tpu.memory_space<vmem>>, vector<1x1x256xf32>
    %420 = vector.shape_cast %419 : vector<1x1x256xf32> to vector<1x256xf32>
    %421 = vector.shape_cast %418 : vector<1x256xf32> to vector<1x1x256xf32>
    tpu.vector_store %arg6[%c0_275, %c0_276, %c0_277], %421 {strides = array<i32>} : memref<1x1x256xf32, #tpu.memory_space<vmem>>, vector<1x1x256xf32>,
    return
  }
  func.func @transform_0(%arg0: i32) -> (i32, i32, i32) {
    %c0_i32 = arith.constant 0 : i32
    %c0_i32_0 = arith.constant 0 : i32
    %c0_i32_1 = arith.constant 0 : i32
    return %arg0, %c0_i32, %c0_i32_0 : i32, i32, i32
  }
  func.func @transform_1(%arg0: i32) -> (i32, i32, i32) {
    %c0_i32 = arith.constant 0 : i32
    %c0_i32_0 = arith.constant 0 : i32
    %c0_i32_1 = arith.constant 0 : i32
    return %arg0, %c0_i32, %c0_i32_0 : i32, i32, i32
  }
  func.func @transform_2(%arg0: i32) -> (i32, i32, i32) {
    %c0_i32 = arith.constant 0 : i32
    %c0_i32_0 = arith.constant 0 : i32
    %c0_i32_1 = arith.constant 0 : i32
    %c0_i32_2 = arith.constant 0 : i32
    return %c0_i32, %c0_i32_0, %c0_i32_1 : i32, i32, i32
  }
  func.func @transform_3(%arg0: i32) -> (i32, i32, i32) {
    %c0_i32 = arith.constant 0 : i32
    %c0_i32_0 = arith.constant 0 : i32
    %c0_i32_1 = arith.constant 0 : i32
    %c0_i32_2 = arith.constant 0 : i32
    return %c0_i32, %c0_i32_0, %c0_i32_1 : i32, i32, i32
  }
  func.func @transform_4(%arg0: i32) -> (i32, i32, i32) {
    %c0_i32 = arith.constant 0 : i32
    %c0_i32_0 = arith.constant 0 : i32
    %c0_i32_1 = arith.constant 0 : i32
    %c0_i32_2 = arith.constant 0 : i32
    return %c0_i32, %c0_i32_0, %c0_i32_1 : i32, i32, i32
  }
  func.func @transform_5(%arg0: i32) -> (i32, i32, i32) {
    %c0_i32 = arith.constant 0 : i32
    %c0_i32_0 = arith.constant 0 : i32
    %c0_i32_1 = arith.constant 0 : i32
    return %arg0, %c0_i32, %c0_i32_0 : i32, i32, i32
  }
}

</mosaic_0001>

<bundles_post_ra>
// kernel: tpu_custom_call.1
= control target key start
LH: loop header
LB: loop body
LE: loop exit
PB: predicated region body
PF: predicated region fallthrough
CT: control target
= control target key end

     0   :  { %s6893_s0 = inlined_call_operand.hbm [shape: f32[2,32,256], index: 0, kind: input, shape index: {}]   ;;  %s6894_s1 = inlined_call_operand.hbm [shape: f32[2,1,256], index: 1, kind: input, shape index: {}]   ;;  %s6895_s2 = inlined_call_operand.vmem [shape: f32[9,1,256], index: 2, kind: input, shape index: {}]   ;;  %s6896_s3 = inlined_call_operand.hbm [shape: bf16[3,32,304], index: 3, kind: input, shape index: {}]   ;;  %s6897_s4 = inlined_call_operand.vmem [shape: bf16[3,1,304], index: 4, kind: input, shape index: {}]   ;;  %s6898_s5 = inlined_call_operand.hbm [shape: f32[2,1,256], index: 5, kind: output, shape index: {}]  }
   0x1   :  { %6998 = sst [smem:[#allocation47_spill]] %s6893_s0 }
   0x2   :  { %6999 = sst [smem:[#allocation48_spill]] %s6896_s3 }
   0x3   :  { %10 = vsyncpa [#allocation4], 0 }
   0x4   :  { %12 = vsyncpa [#allocation4 + $0x1], 0 }
   0x5   :  { %13 = vsyncpa [#allocation7], 0 }
   0x6   :  { %15 = vsyncpa [#allocation7 + $0x1], 0 }
   0x7   :  { %16 = vsyncpa [#allocation5], 0 }
   0x8   :  { %18 = vsyncpa [#allocation5 + $0x1], 0  ;;  %s4136_s18 = smov 0   ;;  %s4138_s19 = smov 0  }
   0x9   :  { %s4140_s20 = smov 0   ;;  %s4142_s21 = smov 0  }
   0xa LB: > { %s4157_s22 = sadd.s32 4294967295, %s4086_s21   ;;  %s3714_s23 = sadd.s32 4294967294, %s4086_s21   ;;  %s4086_s21 = sphi %s4142_s21, %s7303_s21   ;;  %s4082_s20 = sphi %s4140_s20, %s7302_s20   ;;  %s4078_s19 = sphi %s4138_s19, %s7301_s19   ;;  %s4074_s18 = sphi %s4136_s18, %s7300_s18  }
   0xb   : > { %p44_p0 = scmp.ne.s32.totalorder %s4078_s19, %s4074_s18  ;;  %p6899_p1 = scmp.eq.s32.totalorder %s4157_s22, 0 }
   0xc   : > { %p163_p3 = scmp.eq.s32.totalorder %s3714_s23, 1  ;;  %p3715_p5 = scmp.ge.s32.totalorder %s4086_s21, 1 }
   0xd   : > { %p4166_p4 = por %p6899_p1, %p44_p0  ;;  %p170_p7 = scmp.lt.s32.totalorder %s4086_s21, 3 }
   0xe   : > { %p4171_p6 = por %p163_p3, %p44_p0  ;;  %s4088_s27 = smov [#allocation8]  }
   0xf   : > { %s7000_s24 = scalar_select %p4166_p4, 1, 0 }
  0x10   : > { %s7001_s25 = scalar_select %p4171_p6, 1, 0 }
  0x11   : > { %p4176_p8 = pnand %p3715_p5, %p170_p7  ;;  %s185_s28 = sshll.u32 %s4088_s27, 4  ;;  %s4180_s28 = int_to_ptr.vmem [resolvable:$true] %s185_s28 }
  0x12   : > { %s4192_s30 = sadd.s32 1, %s4086_s21   ;;  %s31_s6 = sadd.s32 1, %s4082_s20 }
  0x13   : > { %s7002_s26 = scalar_select %p4176_p8, 1, 0 }
  0x14   : > { %p3822_p9 = pneg %p4176_p8  ;;  %s28_s7 = ssub.s32 %s4086_s21, %s4192_s30 }
  0x15   : > { %s7004_s3 = sld [smem:[#allocation48_spill]] }
  0x16   : > { %p4187_p11 = pnand %p3822_p9, %p6899_p1 }
  0x18   : > { %p3926_p13 = pneg %p4187_p11 }
  0x1b   : > { %s3924_s10 = scalar_lea.hbm %s7004_s3, 2304 }
  0x1c   : > { %p3925_p12 = scmp.ne.s32.totalorder %s7004_s3, %s3924_s10  ;;  %p3931_p5 = scmp.lt.u32.totalorder %s3924_s10, %s7004_s3 }
  0x1e   : > { %p3927_p0 = pnand %p3926_p13, %p3925_p12 }
  0x20   : > { %p3928_p3 = pneg %p3927_p0 }
  0x22   : > { %p3933_p7 = pnand %p3931_p5, %p3928_p3 }
  0x24   : > { %3936 = shalt.err (!%p3933_p7)
}
  0x25   : > { %s3937_s15 = scalar_lea.vmem %s4180_s28, 2304  ;;  %p3945_p2 = scmp.lt.s32.totalorder %s4180_s28, %s4180_s28 }
  0x26   : > { %p3938_p9 = scmp.ne.s32.totalorder %s4180_s28, %s3937_s15  ;;  %p3946_p6 = scmp.lt.s32.totalorder %s3937_s15, %s3937_s15 }
  0x28   : > { %p3940_p10 = pnand %p3938_p9, %p3926_p13  ;;  %p3947_p4 = por %p3946_p6, %p3945_p2 }
  0x2a   : > { %p3941_p1 = pneg %p3940_p10 }
  0x2c   : > { %p3948_p8 = pnand %p3947_p4, %p3941_p1 }
  0x2e   : > { %3951 = shalt.err (!%p3948_p8)
}
  0x2f   : > { %s4089_s16 = smov 192   ;;  %s4090_s17 = smov 12  }
  0x30   : > { %3825 = dma.hbm_to_vmem [thread:$0]  (!%p4187_p11), %s7004_s3, 2304, %s4180_s28, [#allocation7], %s4089_s16, %s4089_s16, %s4090_s17  }
  0x31   : > { %p29_p2 = scmp.eq.s32.totalorder %s28_s7, 0  ;;  %p38_p1 = scmp.ne.s32.totalorder %s4082_s20, %s4078_s19 }
  0x32   : > { %p39_p4 = scmp.eq.s32.totalorder %s4086_s21, 0  ;;  %p3838_p6 = scmp.lt.s32.totalorder %s4086_s21, 2 }
  0x33   : > { %s4223_s8 = scalar_select %p29_p2, %s4082_s20, %s31_s6  }
  0x34   : > { %p40_p8 = por %p39_p4, %p38_p1  ;;  %p7006_p10 = scmp.eq.s32.totalorder %s4157_s22, 1 }
  0x35   : > { %7005 = sst [smem:[#allocation14_spill]] %s4223_s8  ;;  %s4232_s10 = sand.u32 1, %s4082_s20  }
  0x36   : > { %p4227_p12 = por %p7006_p10, %p38_p1  ;;  %s3773_s29 = sshll.u32 %s4086_s21, 10 }
  0x37   : > { %s3718_s11 = sshll.u32 %s4232_s10, 6  ;;  %s7008_s0 = sld [smem:[#allocation47_spill]] }
  0x38   : > { %s7007_s9 = scalar_select %p4227_p12, 1, 0 }
  0x39   : > { %s206_s6 = scalar_lea.vmem [#allocation3], %s3718_s11  ;;  %p4241_p11 = pnand %p3838_p6, %p40_p8 }
  0x3a   : > { %s213_s13 = sshll.u32 %s206_s6, 4  ;;  %s203_s15 = scalar_lea.sflag [#allocation4], %s4232_s10  ;;  %s4245_s13 = int_to_ptr.vmem [resolvable:$true] %s213_s13 }
  0x3b   : > { %p3954_p0 = pneg %p4241_p11 }
  0x3d   : > { %s4239_s7 = scalar_lea.hbm %s7008_s0, %s3773_s29  ;;  %s3957_s27 = scalar_lea.hbm %s7008_s0, 2048 }
  0x3e   : > { %s3952_s16 = scalar_lea.hbm %s4239_s7, 1024  ;;  %p3958_p7 = scmp.lt.u32.totalorder %s4239_s7, %s7008_s0 }
  0x3f   : > { %p3953_p13 = scmp.ne.s32.totalorder %s4239_s7, %s3952_s16  ;;  %p3959_p9 = scmp.lt.u32.totalorder %s3957_s27, %s3952_s16 }
  0x40   : > { %p3961_p1 = scmp.lt.u32.totalorder %s3952_s16, %s4239_s7 }
  0x41   : > { %p3955_p3 = pnand %p3954_p0, %p3953_p13  ;;  %p3960_p2 = por %p3959_p9, %p3958_p7 }
  0x43   : > { %p3956_p5 = pneg %p3955_p3  ;;  %p3962_p4 = por %p3961_p1, %p3960_p2 }
  0x45   : > { %p3963_p6 = pnand %p3962_p4, %p3956_p5 }
  0x47   : > { %3966 = shalt.err (!%p3963_p6)
}
  0x48   : > { %s3967_s12 = scalar_lea.vmem %s4245_s13, 1024  ;;  %s4091_s28 = smov [#allocation3]  }
  0x49   : > { %p3968_p8 = scmp.ne.s32.totalorder %s4245_s13, %s3967_s12  ;;  %s3972_s6 = sshll.u32 %s4091_s28, 4  ;;  %s3973_s6 = int_to_ptr.vmem [resolvable:$false] %s3972_s6 }
  0x4a   : > { %s3974_s17 = scalar_lea.vmem %s3973_s6, 2048  ;;  %p3975_p3 = scmp.lt.s32.totalorder %s4245_s13, %s3973_s6 }
  0x4b   : > { %p3970_p10 = pnand %p3968_p8, %p3954_p0  ;;  %p3976_p7 = scmp.lt.s32.totalorder %s3974_s17, %s3967_s12 }
  0x4d   : > { %p3971_p13 = pneg %p3970_p10  ;;  %p3977_p9 = por %p3976_p7, %p3975_p3 }
  0x4f   : > { %p3978_p2 = pnand %p3977_p9, %p3971_p13 }
  0x51   : > { %3981 = shalt.err (!%p3978_p2)
}
  0x52   : > { %s4092_s16 = smov 256   ;;  %s4093_s23 = smov 16  }
  0x53   : > { %3829 = dma.hbm_to_vmem [thread:$0]  (!%p4241_p11), %s4239_s7, 1024, %s4245_s13, %s203_s15, %s4092_s16, %s4092_s16, %s4093_s23  }
  0x54   : > { %s223_s27 = sand.u32 1, %s4086_s21   ;;  %s3721_s29 = sshll.u32 %s4232_s10, 1 }
  0x55   : > { %s3774_s11 = sshll.u32 %s4086_s21, 5  ;;  %s227_s12 = scalar_lea.vmem [#allocation6], %s3721_s29 }
  0x56   : > { %s235_s28 = sshll.u32 %s227_s12, 4  ;;  %s4281_s0 = scalar_lea.hbm %s6894_s1, %s3774_s11  ;;  %s236_s28 = int_to_ptr.vmem [resolvable:$true] %s235_s28 }
  0x57   : > { %s224_s3 = scalar_lea.sflag [#allocation7], %s223_s27  ;;  %s3982_s8 = scalar_lea.hbm %s4281_s0, 32 }
  0x58   : > { %p3983_p5 = scmp.ne.s32.totalorder %s4281_s0, %s3982_s8  ;;  %s3987_s13 = scalar_lea.hbm %s6894_s1, 64 }
  0x59   : > { %p3988_p6 = scmp.lt.u32.totalorder %s4281_s0, %s6894_s1  ;;  %p3989_p8 = scmp.lt.u32.totalorder %s3987_s13, %s3982_s8 }
  0x5a   : > { %p3985_p1 = pnand %p3983_p5, %p3954_p0  ;;  %p3991_p13 = scmp.lt.u32.totalorder %s3982_s8, %s4281_s0 }
  0x5b   : > { %p3990_p10 = por %p3989_p8, %p3988_p6 }
  0x5c   : > { %p3986_p4 = pneg %p3985_p1 }
  0x5d   : > { %p3992_p3 = por %p3991_p13, %p3990_p10 }
  0x5f   : > { %p3993_p7 = pnand %p3992_p3, %p3986_p4 }
  0x61   : > { %3996 = shalt.err (!%p3993_p7)
}
  0x62   : > { %s3997_s23 = scalar_lea.vmem %s236_s28, 32  ;;  %s4094_s27 = smov [#allocation6]  }
  0x63   : > { %p3998_p9 = scmp.ne.s32.totalorder %s236_s28, %s3997_s23  ;;  %s4002_s29 = sshll.u32 %s4094_s27, 4  ;;  %s4003_s29 = int_to_ptr.vmem [resolvable:$false] %s4002_s29 }
  0x64   : > { %s4004_s11 = scalar_lea.vmem %s4003_s29, 64  ;;  %p4005_p1 = scmp.lt.s32.totalorder %s236_s28, %s4003_s29 }
  0x65   : > { %p4000_p2 = pnand %p3998_p9, %p3954_p0  ;;  %p4006_p12 = scmp.lt.s32.totalorder %s4004_s11, %s3997_s23 }
  0x67   : > { %p4001_p5 = pneg %p4000_p2  ;;  %p4007_p6 = por %p4006_p12, %p4005_p1 }
  0x69   : > { %p4008_p8 = pnand %p4007_p6, %p4001_p5 }
  0x6b   : > { %4011 = shalt.err (!%p4008_p8)
}
  0x6c   : > { %3832 = dma.hbm_to_vmem [thread:$0]  (!%p4241_p11), %s4281_s0, 32, %s236_s28, %s224_s3  }
  0x6d   : > { %p7010_p4 = scmp.ne.s32.totalorder %s7002_s26, 0 }
  0x6f   : > { %244 = sbr.rel (%p7010_p4) target bundleno = 2840 (0xb18), region = 40 }
  0x76   : > { %s4305_s8 = sand.u32 1, %s4078_s19   ;;  %p7011_p12 = scmp.ne.s32.totalorder %s7000_s24, 0 }
  0x77   : > { %s3725_s12 = sshll.u32 %s4305_s8, 6  ;;  %s247_s6 = scalar_lea.sflag [#allocation4], %s4305_s8 }
  0x78   : > { %s4309_s17 = scalar_lea.vmem [#allocation3], %s3725_s12 }
  0x79   : > { %4057 = dma.done.wait (%p7011_p12), %s247_s6, 1024  }
  0x7a   : > { %4059 = vsyncadd (%p7011_p12), %s247_s6, 4294966272  ;;  %s255_s0 = sand.u32 1, %s4157_s22   ;;  %s3726_s3 = sshll.u32 %s4305_s8, 1 }
  0x7b   : > { %s256_s26 = scalar_lea.sflag [#allocation7], %s255_s0  ;;  %s4319_s14 = scalar_lea.vmem [#allocation6], %s3726_s3 }
  0x7c   : > { %4061 = dma.done.wait (%p7011_p12), %s256_s26, 32  }
  0x7d   : > { %4063 = vsyncadd (%p7011_p12), %s256_s26, 4294967264  ;;  %p7012_p11 = scmp.eq.s32.totalorder %s4157_s22, 0 }
  0x7f   : > { %4065 = dma.done.wait (%p7012_p11), [#allocation7], 2304   ;;  %p7013_p0 = pmov %p7012_p11 }
  0x80   : > { %v4330_v0 = vld [vmem:[%s4309_s17 + $0x8] sm:$0xff]  ;;  %v4333_v1 = vld [vmem:[%s4309_s17] sm:$0xff]  ;;  %s4095_s24 = smov 17   ;;  %v4340_v2 = vld [vmem:[%s4309_s17 + $0x18] sm:$0xff]  ;;  %s4096_s28 = smov 16   ;;  %v6909_v12 = vlaneseq  ;;  %vm880_vm1 = vcmask 1042434  }
  0x81   : > { %4067 = vsyncadd (%p7013_p0), [#allocation7], 4294964992  ;;  %345 = vrot.lane.b32.xlu1 %v4330_v0, %s4095_s24  ;;  %337 = vrot.lane.b32.xlu0 %v4333_v1, %s4095_s24  ;;  %v4343_v3 = vld [vmem:[%s4309_s17 + $0x10] sm:$0xff]  ;;  %v4353_v5 = vld [vmem:[%s4309_s17 + $0x20] sm:$0xff]  ;;  %s4097_s10 = smov 15   ;;  %s4098_s7 = smov 1  }
  0x82   : > { %v4350_v4 = vld [vmem:[%s4309_s17 + $0x30] sm:$0xff]  ;;  %v4356_v6 = vld [vmem:[%s4309_s17 + $0x38] sm:$0xff]  ;;  %v4359_v7 = vld [vmem:[%s4309_s17 + $0x28] sm:$0xff]  ;;  %s4099_s13 = smov 127   ;;  %s4100_s15 = smov 113   ;;  %v4459_v13 = vshrl.u32 %v6909_v12, 7 }
  0x83   : > { %v305_v8 = vld [vmem:[%s4319_s14] sm:$0x3]  ;;  %s4101_s16 = smov 112   ;;  %v4486_v19 = vand.u32 127, %v6909_v12  ;;  %v311_v20 = vld [vmem:[%s6895_s2] sm:$0x3] }
  0x84   : > { %v306_v9 = vmul.f32 1.442695, %v305_v8  ;;  %v4466_v14 = vsub.s32 1, %v4459_v13  ;;  %v4469_v15 = vsub.s32 0, %v4459_v13  ;;  %v3890_v36 = vld [vmem:[#allocation8 + $0x4] ss:$12 sps:$4 sm:$0xff]  }
  0x85   : > { %347 = vrot.lane.b32.xlu1 %v4340_v2, %s4095_s24  ;;  %339 = vrot.lane.b32.xlu0 %v4343_v3, %s4095_s24  ;;  %vm6906_vm0 = vcmp.lt.s32.totalorder %v4486_v19, 17  ;;  %vm881_vm2 = vsmask.f32 2304  ;;  %v883_v44 = vld [vmem:[#allocation2 + $0x120] sm:$0x4]  ;;  %s4102_s29 = smov 111  }
  0x86   : > { %3912 = vpow2.f32 %v306_v9  ;;  %7014 = vst [vmem:[#allocation15_spill] sm:$0xff] %v4466_v14  ;;  %7015 = vst [vmem:[#allocation16_spill] sm:$0xff] %v4469_v15  ;;  %v4497_v23 = vrot.slane %v311_v20, %v4466_v14  ;;  %v4500_v24 = vrot.slane %v311_v20, %v4469_v15  ;;  %1109 = vmatprep.mubr.bf16.mxu0 %v3890_v36  ;;  %v7017_v45 = vmov 0  ;;  %v886_v46 = vld [vmem:[#allocation2 + $0x128] sm:$0x4]  ;;  %p7296_p13 = scmp.ne.s32.totalorder %s7007_s9, 0 }
  0x87   : > { %vm4531_vm3 = vmand %vm880_vm1, %vm881_vm2  ;;  %v3729_v59 = vld [vmem:[%s6895_s2 + $0x2] sm:$0x3]  ;;  %vm407_vm4 = vcmp.lt.s32.totalorder %v4486_v19, 16  ;;  %vm326_vm5 = vcmask 1044484   ;;  %vm327_vm6 = vsmask.f32 7954 }
  0x88   : > { %v7018_v45 = vsel %vm4531_vm3, 4294967295, %v7017_v45  ;;  %v4560_v8 = vrot.slane %v3729_v59, %v4466_v14  ;;  %v4563_v9 = vrot.slane %v3729_v59, %v4469_v15  ;;  %v329_v36 = vld [vmem:[#allocation2 + $0x120] sm:$0x10]  ;;  %vm328_vm7 = vmand %vm326_vm5, %vm327_vm6  ;;  %vm6904_vm8 = vcmp.lt.s32.totalorder %v4486_v19, 15  ;;  %s4105_s12 = smov [#allocation9]  }
  0x89   : > { %343 = vrot.lane.b32.xlu1 %v4350_v4, %s4095_s24  ;;  %341 = vrot.lane.b32.xlu0 %v4353_v5, %s4095_s24  ;;  %7019 = vst [vmem:[#allocation18_spill] sm:$0xff] %v7018_v45  ;;  %vm6905_vm9 = vcmp.lt.s32.totalorder %v4486_v19, 1  ;;  %vm571_vm10 = vcmp.lt.s32.totalorder %v4486_v19, 127  ;;  %vm6903_vm11 = vcmp.lt.s32.totalorder %v4486_v19, 113  ;;  %vm675_vm12 = vcmp.lt.s32.totalorder %v4486_v19, 112  ;;  %s4016_s6 = sshll.u32 %s4105_s12, 4  ;;  %s4017_s6 = int_to_ptr.vmem [resolvable:$false] %s4016_s6 }
  0x8a   : > { %7020 = vst [vmem:[#allocation19_spill] sm:$0xff] %v4560_v8  ;;  %7021 = vst [vmem:[#allocation20_spill] sm:$0xff] %v4563_v9  ;;  %vm835_vm13 = vcmask 1041409   ;;  %vm836_vm14 = vsmask.f32 1280  ;;  %vm933_vm2 = vcmask 1043459  }
  0x8b   : > { %vm4805_vm15 = vmand %vm835_vm13, %vm836_vm14  ;;  %vm934_vm6 = vsmask.f32 3328  ;;  %vm785_vm14 = vsmask.f32 256  ;;  %s4018_s0 = scalar_lea.vmem %s4017_s6, 64 }
  0x8d   : > { %351 = vrot.lane.b32.xlu1 %v4356_v6, %s4095_s24  ;;  %349 = vrot.lane.b32.xlu0 %v4359_v7, %s4095_s24 }
  0x90   : > { %v3913_v10 = vpop.eup %3912 }
  0x91   : > { %393 = vrot.lane.b32.xlu1 %v4343_v3, %s4096_s28  ;;  %391 = vrot.lane.b32.xlu0 %v4333_v1, %s4096_s28  ;;  %v308_v11 = vadd.f32 1.0, %v3913_v10 }
  0x93   : > { %3914 = vrcp.f32 %v308_v11 }
  0x95   : > { %401 = vrot.lane.b32.xlu1 %v4340_v2, %s4096_s28  ;;  %399 = vrot.lane.b32.xlu0 %v4330_v0, %s4096_s28 }
  0x99   : > { %397 = vrot.lane.b32.xlu1 %v4350_v4, %s4096_s28  ;;  %395 = vrot.lane.b32.xlu0 %v4353_v5, %s4096_s28 }
  0x9d   : > { %405 = vrot.lane.b32.xlu1 %v4356_v6, %s4096_s28  ;;  %403 = vrot.lane.b32.xlu0 %v4359_v7, %s4096_s28  ;;  %v4471_v16 = vpop.eup %3914 }
  0x9e   : > { %7016 = vst [vmem:[#allocation17_spill] sm:$0xff] %v4471_v16  ;;  %v4479_v17 = vrot.slane %v4471_v16, %v4466_v14  ;;  %v4483_v18 = vrot.slane %v4471_v16, %v4469_v15 }
  0xa0   : > { %v872_v35 = vpack.c.bf16 %v4483_v18, %v4483_v18  ;;  %v873_v37 = vpack.c.bf16 %v4479_v17, %v4479_v17 }
  0xa1   : > { %445 = vrot.lane.b32.xlu1 %v4343_v3, %s4097_s10  ;;  %443 = vrot.lane.b32.xlu0 %v4333_v1, %s4097_s10 }
  0xa2   : > { %v876_v42 = vrot.slane %v872_v35, 6  ;;  %v877_v43 = vrot.slane %v873_v37, 6  ;;  %v332_v37 = vld [vmem:[#allocation2 + $0x128] sm:$0x10] }
  0xa4   : > { %v884_v47 = vsel %vm4531_vm3, %v876_v42, %v883_v44  ;;  %v887_v48 = vsel %vm4531_vm3, %v877_v43, %v886_v46 }
  0xa5   : > { %453 = vrot.lane.b32.xlu1 %v4340_v2, %s4097_s10  ;;  %451 = vrot.lane.b32.xlu0 %v4330_v0, %s4097_s10  ;;  %885 = vst [vmem:[#allocation2 + $0x120] sm:$0x4] %v884_v47  ;;  %888 = vst [vmem:[#allocation2 + $0x128] sm:$0x4] %v887_v48  ;;  %v3730_v47 = vld [vmem:[%s6895_s2 + $0x4] sm:$0x3] }
  0xa6   : > { %v330_v48 = vsel %vm328_vm7, 1065369472, %v329_v36 }
  0xa7   : > { %331 = vst [vmem:[#allocation2 + $0x120] sm:$0x10] %v330_v48 }
  0xa9   : > { %449 = vrot.lane.b32.xlu1 %v4350_v4, %s4097_s10  ;;  %447 = vrot.lane.b32.xlu0 %v4353_v5, %s4097_s10 }
  0xad   : > { %457 = vrot.lane.b32.xlu1 %v4356_v6, %s4097_s10  ;;  %455 = vrot.lane.b32.xlu0 %v4359_v7, %s4097_s10 }
  0xb1   : > { %497 = vrot.lane.b32.xlu1 %v4343_v3, %s4098_s7  ;;  %495 = vrot.lane.b32.xlu0 %v4333_v1, %s4098_s7 }
  0xb5   : > { %505 = vrot.lane.b32.xlu1 %v4340_v2, %s4098_s7  ;;  %503 = vrot.lane.b32.xlu0 %v4330_v0, %s4098_s7 }
  0xb9   : > { %501 = vrot.lane.b32.xlu1 %v4350_v4, %s4098_s7  ;;  %499 = vrot.lane.b32.xlu0 %v4353_v5, %s4098_s7 }
  0xbd   : > { %509 = vrot.lane.b32.xlu1 %v4356_v6, %s4098_s7  ;;  %507 = vrot.lane.b32.xlu0 %v4359_v7, %s4098_s7 }
  0xc1   : > { %557 = vrot.lane.b32.xlu1 %v4343_v3, %s4099_s13  ;;  %555 = vrot.lane.b32.xlu0 %v4333_v1, %s4099_s13 }
  0xc5   : > { %565 = vrot.lane.b32.xlu1 %v4340_v2, %s4099_s13  ;;  %563 = vrot.lane.b32.xlu0 %v4330_v0, %s4099_s13 }
  0xc9   : > { %561 = vrot.lane.b32.xlu1 %v4350_v4, %s4099_s13  ;;  %559 = vrot.lane.b32.xlu0 %v4353_v5, %s4099_s13 }
  0xcd   : > { %569 = vrot.lane.b32.xlu1 %v4356_v6, %s4099_s13  ;;  %567 = vrot.lane.b32.xlu0 %v4359_v7, %s4099_s13 }
  0xd1   : > { %609 = vrot.lane.b32.xlu1 %v4343_v3, %s4100_s15  ;;  %607 = vrot.lane.b32.xlu0 %v4333_v1, %s4100_s15 }
  0xd5   : > { %617 = vrot.lane.b32.xlu1 %v4340_v2, %s4100_s15  ;;  %615 = vrot.lane.b32.xlu0 %v4330_v0, %s4100_s15 }
  0xd9   : > { %613 = vrot.lane.b32.xlu1 %v4350_v4, %s4100_s15  ;;  %611 = vrot.lane.b32.xlu0 %v4353_v5, %s4100_s15 }
  0xdd   : > { %621 = vrot.lane.b32.xlu1 %v4356_v6, %s4100_s15  ;;  %619 = vrot.lane.b32.xlu0 %v4359_v7, %s4100_s15 }
  0xe1   : > { %661 = vrot.lane.b32.xlu1 %v4343_v3, %s4101_s16  ;;  %659 = vrot.lane.b32.xlu0 %v4333_v1, %s4101_s16 }
  0xe5   : > { %669 = vrot.lane.b32.xlu1 %v4340_v2, %s4101_s16  ;;  %667 = vrot.lane.b32.xlu0 %v4330_v0, %s4101_s16 }
  0xe9   : > { %665 = vrot.lane.b32.xlu1 %v4350_v4, %s4101_s16  ;;  %663 = vrot.lane.b32.xlu0 %v4353_v5, %s4101_s16 }
  0xed   : > { %673 = vrot.lane.b32.xlu1 %v4356_v6, %s4101_s16  ;;  %671 = vrot.lane.b32.xlu0 %v4359_v7, %s4101_s16 }
  0xf1   : > { %821 = vrot.lane.b32.xlu1 %v4479_v17, %s4097_s10  ;;  %819 = vrot.lane.b32.xlu0 %v4483_v18, %s4097_s10 }
  0xf3   : > { %v346_v21 = vpop.permute.xlu1 %345  ;;  %v338_v22 = vpop.permute.xlu0 %337 }
  0xf4   : > { %v356_v25 = vsel %vm6906_vm0, %v338_v22, %v346_v21  ;;  %v360_v26 = vsel %vm6906_vm0, %v346_v21, %v338_v22 }
  0xf5   : > { %919 = vrot.lane.b32.xlu1 %v4479_v17, %s4100_s15  ;;  %917 = vrot.lane.b32.xlu0 %v4483_v18, %s4100_s15  ;;  %v375_v29 = vmul.f32 %v4500_v24, %v360_v26  ;;  %v376_v30 = vmul.f32 %v4497_v23, %v356_v25 }
  0xf7   : > { %v348_v27 = vpop.permute.xlu1 %347  ;;  %v340_v28 = vpop.permute.xlu0 %339 }
  0xf8   : > { %v357_v31 = vsel %vm6906_vm0, %v340_v28, %v348_v27  ;;  %v361_v32 = vsel %vm6906_vm0, %v348_v27, %v340_v28 }
  0xf9   : > { %v377_v33 = vmul.f32 %v4500_v24, %v361_v32  ;;  %v378_v34 = vmul.f32 %v4497_v23, %v357_v31  ;;  %776 = vrot.lane.b32.xlu1 %v4479_v17, %s4095_s24  ;;  %774 = vrot.lane.b32.xlu0 %v4483_v18, %s4095_s24 }
  0xfb   : > { %v383_v38 = vpack.c.bf16 %v377_v33, %v375_v29  ;;  %v384_v39 = vpack.c.bf16 %v378_v34, %v376_v30  ;;  %v344_v40 = vpop.permute.xlu1 %343  ;;  %v342_v41 = vpop.permute.xlu0 %341 }
  0xfd   : > { %713 = vrot.lane.b32.xlu1 %v4343_v3, %s4102_s29  ;;  %711 = vrot.lane.b32.xlu0 %v4333_v1, %s4102_s29 }
  0xfe   : > { %1077 = vmatprep.subr.bf16.mxu0 %v384_v39 }
  0xff   : > { %v352_v49 = vpop.permute.xlu1 %351  ;;  %v350_v50 = vpop.permute.xlu0 %349  ;;  %1078 = vmatpush1.bf16.msra.mxu0 %v383_v38 }
 0x100   : > { %v359_v51 = vsel %vm6906_vm0, %v344_v40, %v352_v49  ;;  %v363_v52 = vsel %vm6906_vm0, %v352_v49, %v344_v40  ;;  %v358_v53 = vsel %vm6906_vm0, %v342_v41, %v350_v50  ;;  %v362_v54 = vsel %vm6906_vm0, %v350_v50, %v342_v41 }
 0x101   : > { %v381_v55 = vmul.f32 %v4500_v24, %v363_v52  ;;  %v382_v56 = vmul.f32 %v4497_v23, %v359_v51  ;;  %v379_v57 = vmul.f32 %v4500_v24, %v362_v54  ;;  %v380_v58 = vmul.f32 %v4497_v23, %v358_v53  ;;  %721 = vrot.lane.b32.xlu1 %v4340_v2, %s4102_s29 }
 0x102   : > { %719 = vrot.lane.b32.xlu0 %v4330_v0, %s4102_s29  ;;  %v333_v49 = vsel %vm328_vm7, 1065369472, %v332_v37  ;;  %v4611_v54 = vrot.slane %v3730_v47, %v4466_v14  ;;  %vm784_vm7 = vcmask 1040384  }
 0x103   : > { %v385_v60 = vpack.c.bf16 %v381_v55, %v379_v57  ;;  %v386_v61 = vpack.c.bf16 %v382_v56, %v380_v58  ;;  %v394_v62 = vpop.permute.xlu1 %393  ;;  %v392_v63 = vpop.permute.xlu0 %391  ;;  %334 = vst [vmem:[#allocation2 + $0x128] sm:$0x10] %v333_v49  ;;  %v4614_v55 = vrot.slane %v3730_v47, %v4469_v15  ;;  %v6910_v56 = vmov 0  }
 0x104   : > { %335 = vst [vmem:[#allocation2 + $0x120] sm:$0xe0] %v6910_v56  ;;  %336 = vst [vmem:[#allocation2 + $0x128] sm:$0xe0] %v6910_v56 }
 0x105   : > { %846 = vrot.lane.b32.xlu1 %v4479_v17, %s4098_s7  ;;  %1079 = vmatprep.subr.bf16.mxu0 %v386_v61 }
 0x106   : > { %844 = vrot.lane.b32.xlu0 %v4483_v18, %s4098_s7  ;;  %1080 = vmatpush1.bf16.msra.mxu0 %v385_v60 }
 0x107   : > { %v402_v10 = vpop.permute.xlu1 %401  ;;  %v400_v11 = vpop.permute.xlu0 %399 }
 0x108   : > { %v409_v20 = vsel %vm407_vm4, %v394_v62, %v402_v10  ;;  %v413_v21 = vsel %vm407_vm4, %v402_v10, %v394_v62  ;;  %v408_v22 = vsel %vm407_vm4, %v392_v63, %v400_v11  ;;  %v412_v25 = vsel %vm407_vm4, %v400_v11, %v392_v63 }
 0x109   : > { %v429_v26 = vmul.f32 %v4563_v9, %v413_v21  ;;  %v430_v27 = vmul.f32 %v4560_v8, %v409_v20  ;;  %v427_v28 = vmul.f32 %v4563_v9, %v412_v25  ;;  %v428_v29 = vmul.f32 %v4560_v8, %v408_v22  ;;  %891 = vrot.lane.b32.xlu1 %v4479_v17, %s4099_s13 }
 0x10a   : > { %889 = vrot.lane.b32.xlu0 %v4483_v18, %s4099_s13 }
 0x10b   : > { %v435_v30 = vpack.c.bf16 %v429_v26, %v427_v28  ;;  %v436_v31 = vpack.c.bf16 %v430_v27, %v428_v29  ;;  %v398_v32 = vpop.permute.xlu1 %397  ;;  %v396_v33 = vpop.permute.xlu0 %395 }
 0x10d   : > { %944 = vrot.lane.b32.xlu1 %v4479_v17, %s4101_s16  ;;  %1081 = vmatprep.subr.bf16.mxu0 %v436_v31 }
 0x10e   : > { %942 = vrot.lane.b32.xlu0 %v4483_v18, %s4101_s16  ;;  %1082 = vmatpush1.bf16.msra.mxu0 %v435_v30 }
 0x10f   : > { %v406_v34 = vpop.permute.xlu1 %405  ;;  %v404_v35 = vpop.permute.xlu0 %403 }
 0x110   : > { %v411_v38 = vsel %vm407_vm4, %v398_v32, %v406_v34  ;;  %v415_v39 = vsel %vm407_vm4, %v406_v34, %v398_v32  ;;  %v410_v40 = vsel %vm407_vm4, %v396_v33, %v404_v35  ;;  %v414_v41 = vsel %vm407_vm4, %v404_v35, %v396_v33  ;;  %v3731_v35 = vld [vmem:[%s6895_s2 + $0x6] sm:$0x3] }
 0x111   : > { %v433_v42 = vmul.f32 %v4563_v9, %v415_v39  ;;  %v434_v43 = vmul.f32 %v4560_v8, %v411_v38  ;;  %v431_v44 = vmul.f32 %v4563_v9, %v414_v41  ;;  %v432_v46 = vmul.f32 %v4560_v8, %v410_v40  ;;  %717 = vrot.lane.b32.xlu1 %v4350_v4, %s4102_s29 }
 0x112   : > { %715 = vrot.lane.b32.xlu0 %v4353_v5, %s4102_s29  ;;  %v4659_v40 = vrot.slane %v3731_v35, %v4466_v14  ;;  %v4662_v41 = vrot.slane %v3731_v35, %v4469_v15  ;;  %v550_v35 = vpack.c.bf16 %v4356_v6, %v4359_v7 }
 0x113   : > { %v437_v50 = vpack.c.bf16 %v433_v42, %v431_v44  ;;  %v438_v51 = vpack.c.bf16 %v434_v43, %v432_v46  ;;  %v446_v52 = vpop.permute.xlu1 %445  ;;  %v444_v53 = vpop.permute.xlu0 %443 }
 0x115   : > { %725 = vrot.lane.b32.xlu1 %v4356_v6, %s4102_s29  ;;  %1083 = vmatprep.subr.bf16.mxu0 %v438_v51  ;;  %v549_v6 = vpack.c.bf16 %v4350_v4, %v4353_v5 }
 0x116   : > { %723 = vrot.lane.b32.xlu0 %v4359_v7, %s4102_s29  ;;  %1084 = vmatpush1.bf16.msra.mxu0 %v437_v50 }
 0x117   : > { %v454_v57 = vpop.permute.xlu1 %453  ;;  %v452_v58 = vpop.permute.xlu0 %451 }
 0x118   : > { %v461_v59 = vsel %vm6904_vm8, %v446_v52, %v454_v57  ;;  %v465_v60 = vsel %vm6904_vm8, %v454_v57, %v446_v52  ;;  %v460_v61 = vsel %vm6904_vm8, %v444_v53, %v452_v58  ;;  %v464_v62 = vsel %vm6904_vm8, %v452_v58, %v444_v53 }
 0x119   : > { %v481_v63 = vmul.f32 %v4614_v55, %v465_v60  ;;  %v482_v10 = vmul.f32 %v4611_v54, %v461_v59  ;;  %v479_v11 = vmul.f32 %v4614_v55, %v464_v62  ;;  %v480_v20 = vmul.f32 %v4611_v54, %v460_v61  ;;  %795 = vrot.lane.b32.xlu1 %v4479_v17, %s4096_s28 }
 0x11a   : > { %793 = vrot.lane.b32.xlu0 %v4483_v18, %s4096_s28 }
 0x11b   : > { %v487_v21 = vpack.c.bf16 %v481_v63, %v479_v11  ;;  %v488_v22 = vpack.c.bf16 %v482_v10, %v480_v20  ;;  %v450_v25 = vpop.permute.xlu1 %449  ;;  %v448_v26 = vpop.permute.xlu0 %447 }
 0x11d   : > { %972 = vrot.lane.b32.xlu1 %v4479_v17, %s4102_s29  ;;  %1085 = vmatprep.subr.bf16.mxu0 %v488_v22 }
 0x11e   : > { %970 = vrot.lane.b32.xlu0 %v4483_v18, %s4102_s29  ;;  %1086 = vmatpush1.bf16.msra.mxu0 %v487_v21 }
 0x11f   : > { %v458_v27 = vpop.permute.xlu1 %457  ;;  %v456_v28 = vpop.permute.xlu0 %455 }
 0x120   : > { %v463_v29 = vsel %vm6904_vm8, %v450_v25, %v458_v27  ;;  %v467_v30 = vsel %vm6904_vm8, %v458_v27, %v450_v25  ;;  %v462_v31 = vsel %vm6904_vm8, %v448_v26, %v456_v28  ;;  %v466_v32 = vsel %vm6904_vm8, %v456_v28, %v448_v26  ;;  %v3732_v26 = vld [vmem:[%s6895_s2 + $0xa] sm:$0x3] }
 0x121   : > { %v485_v17 = vmul.f32 %v4614_v55, %v467_v30  ;;  %v486_v33 = vmul.f32 %v4611_v54, %v463_v29  ;;  %v483_v18 = vmul.f32 %v4614_v55, %v466_v32  ;;  %v484_v34 = vmul.f32 %v4611_v54, %v462_v31 }
 0x122   : > { %v548_v31 = vpack.c.bf16 %v4340_v2, %v4330_v0  ;;  %v4695_v32 = vrot.slane %v3732_v26, %v4466_v14 }
 0x123   : > { %v489_v36 = vpack.c.bf16 %v485_v17, %v483_v18  ;;  %v490_v37 = vpack.c.bf16 %v486_v33, %v484_v34  ;;  %v498_v38 = vpop.permute.xlu1 %497  ;;  %v496_v39 = vpop.permute.xlu0 %495  ;;  %v547_v17 = vpack.c.bf16 %v4343_v3, %v4333_v1  ;;  %v4700_v33 = vrot.slane %v3732_v26, %v4469_v15 }
 0x125   : > { %1087 = vmatprep.subr.bf16.mxu0 %v490_v37 }
 0x126   : > { %1088 = vmatpush1.bf16.msra.mxu0 %v489_v36 }
 0x127   : > { %v506_v42 = vpop.permute.xlu1 %505  ;;  %v504_v43 = vpop.permute.xlu0 %503 }
 0x128   : > { %v513_v44 = vsel %vm6905_vm9, %v498_v38, %v506_v42  ;;  %v517_v46 = vsel %vm6905_vm9, %v506_v42, %v498_v38  ;;  %v512_v47 = vsel %vm6905_vm9, %v496_v39, %v504_v43  ;;  %v516_v48 = vsel %vm6905_vm9, %v504_v43, %v496_v39 }
 0x129   : > { %v533_v49 = vmul.f32 %v4662_v41, %v517_v46  ;;  %v534_v50 = vmul.f32 %v4659_v40, %v513_v44  ;;  %v531_v51 = vmul.f32 %v4662_v41, %v516_v48  ;;  %v532_v52 = vmul.f32 %v4659_v40, %v512_v47 }
 0x12b   : > { %v539_v53 = vpack.c.bf16 %v533_v49, %v531_v51  ;;  %v540_v57 = vpack.c.bf16 %v534_v50, %v532_v52  ;;  %v502_v58 = vpop.permute.xlu1 %501  ;;  %v500_v59 = vpop.permute.xlu0 %499 }
 0x12d   : > { %1089 = vmatprep.subr.bf16.mxu0 %v540_v57  ;;  %v3733_v57 = vld [vmem:[%s6895_s2 + $0xc] sm:$0x3] }
 0x12e   : > { %1090 = vmatpush1.bf16.msra.mxu0 %v539_v53 }
 0x12f   : > { %v510_v60 = vpop.permute.xlu1 %509  ;;  %v508_v61 = vpop.permute.xlu0 %507 }
 0x130   : > { %v515_v62 = vsel %vm6905_vm9, %v502_v58, %v510_v60  ;;  %v519_v63 = vsel %vm6905_vm9, %v510_v60, %v502_v58  ;;  %v514_v10 = vsel %vm6905_vm9, %v500_v59, %v508_v61  ;;  %v518_v11 = vsel %vm6905_vm9, %v508_v61, %v500_v59 }
 0x131   : > { %v537_v20 = vmul.f32 %v4662_v41, %v519_v63  ;;  %v538_v21 = vmul.f32 %v4659_v40, %v515_v62  ;;  %v535_v22 = vmul.f32 %v4662_v41, %v518_v11  ;;  %v536_v25 = vmul.f32 %v4659_v40, %v514_v10 }
 0x132   : > { %v4735_v62 = vrot.slane %v3733_v57, %v4466_v14  ;;  %v4738_v63 = vrot.slane %v3733_v57, %v4469_v15 }
 0x133   : > { %v541_v27 = vpack.c.bf16 %v537_v20, %v535_v22  ;;  %v542_v28 = vpack.c.bf16 %v538_v21, %v536_v25  ;;  %v558_v29 = vpop.permute.xlu1 %557  ;;  %v556_v30 = vpop.permute.xlu0 %555 }
 0x135   : > { %1091 = vmatprep.subr.bf16.mxu0 %v542_v28 }
 0x136   : > { %1092 = vmatpush1.bf16.msra.mxu0 %v541_v27 }
 0x137   : > { %v566_v18 = vpop.permute.xlu1 %565  ;;  %v564_v34 = vpop.permute.xlu0 %563  ;;  %1093 = vmatprep.subr.bf16.mxu0 %v548_v31 }
 0x138   : > { %v573_v0 = vsel %vm571_vm10, %v558_v29, %v566_v18  ;;  %v577_v2 = vsel %vm571_vm10, %v566_v18, %v558_v29  ;;  %v572_v36 = vsel %vm571_vm10, %v556_v30, %v564_v34  ;;  %v576_v1 = vsel %vm571_vm10, %v564_v34, %v556_v30 }
 0x139   : > { %v594_v3 = vmul.f32 %v4695_v32, %v577_v2  ;;  %v592_v37 = vmul.f32 %v4695_v32, %v576_v1  ;;  %v593_v7 = vmul.f32 %v4700_v33, %v573_v0  ;;  %v591_v38 = vmul.f32 %v4700_v33, %v572_v36 }
 0x13a   : > { %1094 = vmatpush1.bf16.msra.mxu0 %v547_v17 }
 0x13b   : > { %v562_v39 = vpop.permute.xlu1 %561  ;;  %v560_v42 = vpop.permute.xlu0 %559  ;;  %1095 = vmatprep.subr.bf16.mxu0 %v550_v35  ;;  %v600_v43 = vpack.c.bf16 %v594_v3, %v592_v37  ;;  %v599_v44 = vpack.c.bf16 %v593_v7, %v591_v38  ;;  %v3734_v38 = vld [vmem:[%s6895_s2 + $0xe] sm:$0x3] }
 0x13e   : > { %1096 = vmatpush1.bf16.msra.mxu0 %v549_v6 }
 0x13f   : > { %v570_v46 = vpop.permute.xlu1 %569  ;;  %v568_v47 = vpop.permute.xlu0 %567  ;;  %1097 = vmatprep.subr.bf16.mxu0 %v600_v43 }
 0x140   : > { %v575_v48 = vsel %vm571_vm10, %v562_v39, %v570_v46  ;;  %v579_v49 = vsel %vm571_vm10, %v570_v46, %v562_v39  ;;  %v574_v4 = vsel %vm571_vm10, %v560_v42, %v568_v47  ;;  %v578_v5 = vsel %vm571_vm10, %v568_v47, %v560_v42 }
 0x141   : > { %v597_v50 = vmul.f32 %v4700_v33, %v575_v48  ;;  %v598_v51 = vmul.f32 %v4695_v32, %v579_v49  ;;  %v595_v52 = vmul.f32 %v4700_v33, %v574_v4  ;;  %v596_v53 = vmul.f32 %v4695_v32, %v578_v5 }
 0x142   : > { %1098 = vmatpush1.bf16.msra.mxu0 %v599_v44  ;;  %v4769_v46 = vrot.slane %v3734_v38, %v4466_v14  ;;  %v4772_v47 = vrot.slane %v3734_v38, %v4469_v15 }
 0x143   : > { %v601_v58 = vpack.c.bf16 %v597_v50, %v595_v52  ;;  %v602_v59 = vpack.c.bf16 %v598_v51, %v596_v53  ;;  %v610_v60 = vpop.permute.xlu1 %609  ;;  %v608_v61 = vpop.permute.xlu0 %607 }
 0x144   : > { %7022 = vst [vmem:[#allocation21_spill] sm:$0xff] %v4769_v46  ;;  %7023 = vst [vmem:[#allocation22_spill] sm:$0xff] %v4772_v47 }
 0x145   : > { %1099 = vmatprep.subr.bf16.mxu0 %v602_v59 }
 0x146   : > { %1100 = vmatpush1.bf16.msra.mxu0 %v601_v58 }
 0x147   : > { %v618_v10 = vpop.permute.xlu1 %617  ;;  %v616_v11 = vpop.permute.xlu0 %615 }
 0x148   : > { %v625_v20 = vsel %vm6903_vm11, %v610_v60, %v618_v10  ;;  %v629_v21 = vsel %vm6903_vm11, %v618_v10, %v610_v60  ;;  %v624_v22 = vsel %vm6903_vm11, %v608_v61, %v616_v11  ;;  %v628_v25 = vsel %vm6903_vm11, %v616_v11, %v608_v61 }
 0x149   : > { %v645_v26 = vmul.f32 %v4738_v63, %v625_v20  ;;  %v646_v27 = vmul.f32 %v4735_v62, %v629_v21  ;;  %v643_v28 = vmul.f32 %v4738_v63, %v624_v22  ;;  %v644_v29 = vmul.f32 %v4735_v62, %v628_v25 }
 0x14b   : > { %v651_v30 = vpack.c.bf16 %v645_v26, %v643_v28  ;;  %v652_v31 = vpack.c.bf16 %v646_v27, %v644_v29  ;;  %v614_v17 = vpop.permute.xlu1 %613  ;;  %v612_v18 = vpop.permute.xlu0 %611 }
 0x14d   : > { %1101 = vmatprep.subr.bf16.mxu0 %v652_v31 }
 0x14e   : > { %1102 = vmatpush1.bf16.msra.mxu0 %v651_v30 }
 0x14f   : > { %v622_v34 = vpop.permute.xlu1 %621  ;;  %v620_v35 = vpop.permute.xlu0 %619 }
 0x150   : > { %v627_v0 = vsel %vm6903_vm11, %v614_v17, %v622_v34  ;;  %v631_v2 = vsel %vm6903_vm11, %v622_v34, %v614_v17  ;;  %v626_v36 = vsel %vm6903_vm11, %v612_v18, %v620_v35  ;;  %v630_v1 = vsel %vm6903_vm11, %v620_v35, %v612_v18 }
 0x151   : > { %v649_v3 = vmul.f32 %v4738_v63, %v627_v0  ;;  %v650_v37 = vmul.f32 %v4735_v62, %v631_v2  ;;  %v647_v6 = vmul.f32 %v4738_v63, %v626_v36  ;;  %v648_v7 = vmul.f32 %v4735_v62, %v630_v1  ;;  %v3888_v1 = vld [vmem:[#allocation8] ss:$12 sps:$4 sm:$0xff]  }
 0x153   : > { %v653_v39 = vpack.c.bf16 %v649_v3, %v647_v6  ;;  %v654_v42 = vpack.c.bf16 %v650_v37, %v648_v7  ;;  %v662_v43 = vpop.permute.xlu1 %661  ;;  %v660_v44 = vpop.permute.xlu0 %659  ;;  %v3891_v3 = vld [vmem:[#allocation8 + $0x1c] ss:$12 sps:$4 sm:$0xff]   ;;  %v838_v37 = vld [vmem:[#allocation2 + $0x120] sm:$0x2] }
 0x155   : > { %1103 = vmatprep.subr.bf16.mxu0 %v654_v42  ;;  %v7024_v42 = vmov 0 }
 0x156   : > { %1104 = vmatpush1.bf16.msra.mxu0 %v653_v39  ;;  %v7025_v42 = vsel %vm4805_vm15, 4294967295, %v7024_v42 }
 0x157   : > { %v670_v48 = vpop.permute.xlu1 %669  ;;  %v668_v49 = vpop.permute.xlu0 %667  ;;  %7026 = vst [vmem:[#allocation23_spill] sm:$0xff] %v7025_v42 }
 0x158   : > { %v677_v4 = vsel %vm675_vm12, %v662_v43, %v670_v48  ;;  %v681_v5 = vsel %vm675_vm12, %v670_v48, %v662_v43  ;;  %v676_v50 = vsel %vm675_vm12, %v660_v44, %v668_v49  ;;  %v680_v51 = vsel %vm675_vm12, %v668_v49, %v660_v44  ;;  %v841_v43 = vld [vmem:[#allocation2 + $0x128] sm:$0x2] }
 0x159   : > { %v697_v52 = vmul.f32 %v4772_v47, %v677_v4  ;;  %v698_v53 = vmul.f32 %v4769_v46, %v681_v5  ;;  %v695_v57 = vmul.f32 %v4772_v47, %v676_v50  ;;  %v696_v58 = vmul.f32 %v4769_v46, %v680_v51 }
 0x15b   : > { %v703_v59 = vpack.c.bf16 %v697_v52, %v695_v57  ;;  %v704_v60 = vpack.c.bf16 %v698_v53, %v696_v58  ;;  %v666_v61 = vpop.permute.xlu1 %665  ;;  %v664_v10 = vpop.permute.xlu0 %663 }
 0x15d   : > { %1105 = vmatprep.subr.bf16.mxu0 %v704_v60  ;;  %v7027_v60 = vmov 0 }
 0x15e   : > { %1106 = vmatpush1.bf16.msra.mxu0 %v703_v59 }
 0x15f   : > { %v674_v11 = vpop.permute.xlu1 %673  ;;  %v672_v20 = vpop.permute.xlu0 %671 }
 0x160   : > { %v679_v21 = vsel %vm675_vm12, %v666_v61, %v674_v11  ;;  %v683_v22 = vsel %vm675_vm12, %v674_v11, %v666_v61  ;;  %v678_v25 = vsel %vm675_vm12, %v664_v10, %v672_v20  ;;  %v682_v26 = vsel %vm675_vm12, %v672_v20, %v664_v10  ;;  %v936_v61 = vld [vmem:[#allocation2 + $0x120] sm:$0x8]  ;;  %v939_v10 = vld [vmem:[#allocation2 + $0x128] sm:$0x8] }
 0x161   : > { %v701_v27 = vmul.f32 %v4772_v47, %v679_v21  ;;  %v702_v28 = vmul.f32 %v4769_v46, %v683_v22  ;;  %v699_v29 = vmul.f32 %v4772_v47, %v678_v25  ;;  %v700_v30 = vmul.f32 %v4769_v46, %v682_v26  ;;  %v3735_v21 = vld [vmem:[%s6895_s2 + $0x10] sm:$0x3] }
 0x163   : > { %v705_v31 = vpack.c.bf16 %v701_v27, %v699_v29  ;;  %v706_v17 = vpack.c.bf16 %v702_v28, %v700_v30  ;;  %v822_v18 = vpop.permute.xlu1 %821  ;;  %v820_v34 = vpop.permute.xlu0 %819  ;;  %v3893_v28 = vld [vmem:[#allocation8 + $0x18] ss:$12 sps:$4 sm:$0xff]   ;;  %v7030_v29 = vmov 0  ;;  %v787_v30 = vld [vmem:[#allocation2 + $0x120] sm:$0x1] }
 0x164   : > { %v823_v35 = vsel %vm6904_vm8, %v820_v34, %v822_v18  ;;  %v824_v0 = vsel %vm6904_vm8, %v822_v18, %v820_v34  ;;  %vm6908_vm8 = vcmp.lt.s32.totalorder %v4486_v19, 111 }
 0x165   : > { %v825_v2 = vmul.f32 %v824_v0, %v4614_v55  ;;  %v826_v36 = vmul.f32 %v823_v35, %v4611_v54  ;;  %1107 = vmatprep.subr.bf16.mxu0 %v706_v17 }
 0x166   : > { %1108 = vmatpush1.bf16.msra.mxu0 %v705_v31  ;;  %v790_v31 = vld [vmem:[#allocation2 + $0x128] sm:$0x1] }
 0x167   : > { %v827_v6 = vpack.c.bf16 %v825_v2, %v825_v2  ;;  %v828_v7 = vpack.c.bf16 %v826_v36, %v826_v36  ;;  %v920_v38 = vpop.permute.xlu1 %919  ;;  %v918_v39 = vpop.permute.xlu0 %917  ;;  %v4846_v36 = vrot.slane %v3735_v21, %v4466_v14 }
 0x168   : > { %v921_v44 = vsel %vm6903_vm11, %v918_v39, %v920_v38  ;;  %v922_v48 = vsel %vm6903_vm11, %v920_v38, %v918_v39  ;;  %vm4821_vm11 = vmand %vm933_vm2, %vm934_vm6 }
 0x169   : > { %v831_v49 = vrot.slane %v827_v6, 7  ;;  %v832_v4 = vrot.slane %v828_v7, 7  ;;  %v923_v5 = vmul.f32 %v921_v44, %v4738_v63  ;;  %v924_v50 = vmul.f32 %v922_v48, %v4735_v62  ;;  %1110 = vmatmul.mubr.bf16.vlgmr.msra.gmra.mrb[0].mxu0 %v3888_v1  ;;  %vm4836_vm6 = vmand %vm784_vm7, %vm785_vm14  ;;  %7033 = vst [vmem:[#allocation26_spill] sm:$0xff] %v4846_v36 }
 0x16a   : > { %1119 = vmatprep.mubr.bf16.mxu0 %v3891_v3  ;;  %v7028_v60 = vsel %vm4821_vm11, 4294967295, %v7027_v60  ;;  %v7031_v29 = vsel %vm4836_vm6, 4294967295, %v7030_v29  ;;  %v4849_v1 = vrot.slane %v3735_v21, %v4469_v15  ;;  %vm864_vm14 = vsmask.f32 7942 }
 0x16b   : > { %v839_v51 = vsel %vm4805_vm15, %v831_v49, %v838_v37  ;;  %v842_v52 = vsel %vm4805_vm15, %v832_v4, %v841_v43  ;;  %v925_v53 = vpack.c.bf16 %v923_v5, %v923_v5  ;;  %v926_v57 = vpack.c.bf16 %v924_v50, %v924_v50  ;;  %v777_v58 = vpop.permute.xlu1 %776  ;;  %v775_v59 = vpop.permute.xlu0 %774  ;;  %7029 = vst [vmem:[#allocation24_spill] sm:$0xff] %v7028_v60 }
 0x16c   : > { %840 = vst [vmem:[#allocation2 + $0x120] sm:$0x2] %v839_v51  ;;  %843 = vst [vmem:[#allocation2 + $0x128] sm:$0x2] %v842_v52  ;;  %v778_v11 = vsel %vm6906_vm0, %v775_v59, %v777_v58  ;;  %v779_v20 = vsel %vm6906_vm0, %v777_v58, %v775_v59  ;;  %vm909_vm0 = vsmask.f32 7946 }
 0x16d   : > { %v929_v22 = vrot.slane %v925_v53, 5  ;;  %v930_v25 = vrot.slane %v926_v57, 5  ;;  %v780_v26 = vmul.f32 %v779_v20, %v4500_v24  ;;  %v781_v27 = vmul.f32 %v778_v11, %v4497_v23  ;;  %7032 = vst [vmem:[#allocation25_spill] sm:$0xff] %v7031_v29  ;;  %7034 = vst [vmem:[#allocation27_spill] sm:$0xff] %v4849_v1 }
 0x16f   : > { %v937_v17 = vsel %vm4821_vm11, %v929_v22, %v936_v61  ;;  %v940_v18 = vsel %vm4821_vm11, %v930_v25, %v939_v10  ;;  %v782_v34 = vpack.c.bf16 %v780_v26, %v780_v26  ;;  %v783_v35 = vpack.c.bf16 %v781_v27, %v781_v27  ;;  %v714_v0 = vpop.permute.xlu1 %713  ;;  %v712_v2 = vpop.permute.xlu0 %711 }
 0x170   : > { %938 = vst [vmem:[#allocation2 + $0x120] sm:$0x8] %v937_v17  ;;  %941 = vst [vmem:[#allocation2 + $0x128] sm:$0x8] %v940_v18 }
 0x171   : > { %v788_v3 = vsel %vm4836_vm6, %v782_v34, %v787_v30  ;;  %v791_v37 = vsel %vm4836_vm6, %v783_v35, %v790_v31  ;;  %1120 = vmatmul.mubr.bf16.gmra.mrb[4].mxu0 %v3893_v28  ;;  %v7035_v31 = vmov 0 }
 0x172   : > { %789 = vst [vmem:[#allocation2 + $0x120] sm:$0x1] %v788_v3  ;;  %792 = vst [vmem:[#allocation2 + $0x128] sm:$0x1] %v791_v37  ;;  %1162 = vmatprep.mubr.bf16.mxu0 %v6910_v56 }
 0x173   : > { %v722_v6 = vpop.permute.xlu1 %721  ;;  %v866_v3 = vld [vmem:[#allocation2 + $0x120] sm:$0x2]  ;;  %v869_v37 = vld [vmem:[#allocation2 + $0x128] sm:$0x2] }
 0x174   : > { %v729_v7 = vsel %vm6908_vm8, %v714_v0, %v722_v6  ;;  %v733_v38 = vsel %vm6908_vm8, %v722_v6, %v714_v0  ;;  %v720_v39 = vpop.permute.xlu0 %719 }
 0x175   : > { %v749_v43 = vmul.f32 %v4849_v1, %v729_v7  ;;  %v750_v44 = vmul.f32 %v4846_v36, %v733_v38  ;;  %v728_v48 = vsel %vm6908_vm8, %v712_v2, %v720_v39  ;;  %v732_v49 = vsel %vm6908_vm8, %v720_v39, %v712_v2 }
 0x176   : > { %v747_v4 = vmul.f32 %v4849_v1, %v728_v48  ;;  %v748_v5 = vmul.f32 %v4846_v36, %v732_v49  ;;  %v7038_v48 = vmov 0  ;;  %v911_v49 = vld [vmem:[#allocation2 + $0x120] sm:$0x4] }
 0x177   : > { %v847_v50 = vpop.permute.xlu1 %846 }
 0x178   : > { %v755_v51 = vpack.c.bf16 %v749_v43, %v747_v4  ;;  %v756_v52 = vpack.c.bf16 %v750_v44, %v748_v5  ;;  %v845_v53 = vpop.permute.xlu0 %844  ;;  %v914_v4 = vld [vmem:[#allocation2 + $0x128] sm:$0x4] }
 0x179   : > { %v848_v57 = vsel %vm6905_vm9, %v845_v53, %v847_v50  ;;  %v849_v58 = vsel %vm6905_vm9, %v847_v50, %v845_v53  ;;  %vm4881_vm9 = vmand %vm835_vm13, %vm864_vm14  ;;  %vm962_vm14 = vsmask.f32 7950 }
 0x17a   : > { %v850_v59 = vmul.f32 %v849_v58, %v4662_v41  ;;  %v851_v61 = vmul.f32 %v848_v57, %v4659_v40  ;;  %1130 = vmatprep.subr.bf16.mxu0 %v756_v52  ;;  %v7036_v31 = vsel %vm4881_vm9, 4294967295, %v7035_v31  ;;  %vm4895_vm13 = vmand %vm880_vm1, %vm909_vm0  ;;  %vm811_vm1 = vsmask.f32 7938 }
 0x17b   : > { %v892_v10 = vpop.permute.xlu1 %891  ;;  %1131 = vmatpush1.bf16.msra.mxu0 %v755_v51  ;;  %7037 = vst [vmem:[#allocation28_spill] sm:$0xff] %v7036_v31  ;;  %v7039_v48 = vsel %vm4895_vm13, 4294967295, %v7038_v48  ;;  %vm4906_vm0 = vmand %vm933_vm2, %vm962_vm14  ;;  %vm986_vm14 = vsmask.f32 4352 }
 0x17c   : > { %v852_v11 = vpack.c.bf16 %v850_v59, %v850_v59  ;;  %v853_v20 = vpack.c.bf16 %v851_v61, %v851_v61  ;;  %v890_v21 = vpop.permute.xlu0 %889  ;;  %7040 = vst [vmem:[#allocation29_spill] sm:$0xff] %v7039_v48  ;;  %vm4933_vm2 = vmand %vm784_vm7, %vm811_vm1  ;;  %vm7062_vm1 = vcmp.lt.s32.totalorder %v4486_v19, 17 }
 0x17d   : > { %v893_v22 = vsel %vm571_vm10, %v890_v21, %v892_v10  ;;  %v894_v25 = vsel %vm571_vm10, %v892_v10, %v890_v21  ;;  %vm4949_vm7 = vmand %vm326_vm5, %vm986_vm14  ;;  %vm6907_vm5 = vcmask 392192  }
 0x17e   : > { %v855_v26 = vshll.u32 %v852_v11, 16  ;;  %v859_v27 = vshll.u32 %v853_v20, 16  ;;  %v895_v28 = vmul.f32 %v893_v22, %v4700_v33  ;;  %v896_v30 = vmul.f32 %v894_v25, %v4695_v32  ;;  %vm7063_vm14 = vmmov %vm7062_vm1 }
 0x17f   : > { %v945_v17 = vpop.permute.xlu1 %944  ;;  %v7041_v22 = vmov 0 }
 0x180   : > { %v857_v18 = vrot.slane %v855_v26, 7  ;;  %v861_v34 = vrot.slane %v859_v27, 7  ;;  %v897_v35 = vpack.c.bf16 %v895_v28, %v895_v28  ;;  %v898_v0 = vpack.c.bf16 %v896_v30, %v896_v30  ;;  %v943_v2 = vpop.permute.xlu0 %942 }
 0x181   : > { %v946_v6 = vsel %vm675_vm12, %v943_v2, %v945_v17  ;;  %v947_v7 = vsel %vm675_vm12, %v945_v17, %v943_v2  ;;  %v7042_v22 = vsel %vm4906_vm0, 4294967295, %v7041_v22 }
 0x182   : > { %v867_v38 = vsel %vm4881_vm9, %v857_v18, %v866_v3  ;;  %v870_v39 = vsel %vm4881_vm9, %v861_v34, %v869_v37  ;;  %v900_v43 = vshll.u32 %v897_v35, 16  ;;  %v904_v44 = vshll.u32 %v898_v0, 16  ;;  %7043 = vst [vmem:[#allocation30_spill] sm:$0xff] %v7042_v22  ;;  %v964_v34 = vld [vmem:[#allocation2 + $0x120] sm:$0x8] }
 0x183   : > { %868 = vst [vmem:[#allocation2 + $0x120] sm:$0x2] %v867_v38  ;;  %871 = vst [vmem:[#allocation2 + $0x128] sm:$0x2] %v870_v39  ;;  %v948_v5 = vmul.f32 %v946_v6, %v4772_v47  ;;  %v949_v50 = vmul.f32 %v947_v7, %v4769_v46  ;;  %v718_v51 = vpop.permute.xlu1 %717  ;;  %v967_v35 = vld [vmem:[#allocation2 + $0x128] sm:$0x8] }
 0x184   : > { %v902_v52 = vrot.slane %v900_v43, 6  ;;  %v906_v53 = vrot.slane %v904_v44, 6  ;;  %v716_v57 = vpop.permute.xlu0 %715 }
 0x185   : > { %v950_v58 = vpack.c.bf16 %v948_v5, %v948_v5  ;;  %v951_v59 = vpack.c.bf16 %v949_v50, %v949_v50 }
 0x186   : > { %v912_v61 = vsel %vm4895_vm13, %v902_v52, %v911_v49  ;;  %v915_v10 = vsel %vm4895_vm13, %v906_v53, %v914_v4 }
 0x187   : > { %913 = vst [vmem:[#allocation2 + $0x120] sm:$0x4] %v912_v61  ;;  %916 = vst [vmem:[#allocation2 + $0x128] sm:$0x4] %v915_v10  ;;  %v953_v11 = vshll.u32 %v950_v58, 16  ;;  %v957_v20 = vshll.u32 %v951_v59, 16  ;;  %v726_v21 = vpop.permute.xlu1 %725 }
 0x188   : > { %v731_v25 = vsel %vm6908_vm8, %v718_v51, %v726_v21  ;;  %v735_v26 = vsel %vm6908_vm8, %v726_v21, %v718_v51  ;;  %v724_v27 = vpop.permute.xlu0 %723  ;;  %v7044_v58 = vmov 0 }
 0x189   : > { %v955_v28 = vrot.slane %v953_v11, 5  ;;  %v959_v30 = vrot.slane %v957_v20, 5  ;;  %v753_v17 = vmul.f32 %v4849_v1, %v731_v25  ;;  %v754_v18 = vmul.f32 %v4846_v36, %v735_v26  ;;  %v813_v25 = vld [vmem:[#allocation2 + $0x120] sm:$0x1]  ;;  %v816_v26 = vld [vmem:[#allocation2 + $0x128] sm:$0x1] }
 0x18a   : > { %v730_v0 = vsel %vm6908_vm8, %v716_v57, %v724_v27  ;;  %v734_v2 = vsel %vm6908_vm8, %v724_v27, %v716_v57  ;;  %v7045_v58 = vsel %vm4933_vm2, 4294967295, %v7044_v58 }
 0x18b   : > { %v965_v3 = vsel %vm4906_vm0, %v955_v28, %v964_v34  ;;  %v968_v37 = vsel %vm4906_vm0, %v959_v30, %v967_v35  ;;  %v751_v6 = vmul.f32 %v4849_v1, %v730_v0  ;;  %v752_v7 = vmul.f32 %v4846_v36, %v734_v2  ;;  %v796_v38 = vpop.permute.xlu1 %795  ;;  %7046 = vst [vmem:[#allocation31_spill] sm:$0xff] %v7045_v58  ;;  %v988_v34 = vld [vmem:[#allocation2 + $0x120] sm:$0x10]  ;;  %v991_v35 = vld [vmem:[#allocation2 + $0x128] sm:$0x10] }
 0x18c   : > { %966 = vst [vmem:[#allocation2 + $0x120] sm:$0x8] %v965_v3  ;;  %969 = vst [vmem:[#allocation2 + $0x128] sm:$0x8] %v968_v37  ;;  %v794_v39 = vpop.permute.xlu0 %793 }
 0x18d   : > { %v757_v43 = vpack.c.bf16 %v753_v17, %v751_v6  ;;  %v758_v44 = vpack.c.bf16 %v754_v18, %v752_v7  ;;  %v797_v49 = vsel %vm407_vm4, %v794_v39, %v796_v38  ;;  %v798_v4 = vsel %vm407_vm4, %v796_v38, %v794_v39  ;;  %v3894_v38 = vld [vmem:[#allocation8 + $0x8] ss:$12 sps:$4 sm:$0xff]   ;;  %v3895_v39 = vld [vmem:[#allocation8 + $0x20] ss:$12 sps:$4 sm:$0xff]  }
 0x18e   : > { %v799_v5 = vmul.f32 %v798_v4, %v4563_v9  ;;  %v800_v50 = vmul.f32 %v797_v49, %v4560_v8  ;;  %v7047_v18 = vmov 0 }
 0x18f   : > { %v973_v51 = vpop.permute.xlu1 %972  ;;  %1132 = vmatprep.subr.bf16.mxu0 %v758_v44  ;;  %v7048_v18 = vsel %vm4949_vm7, 4294967295, %v7047_v18 }
 0x190   : > { %v801_v52 = vpack.c.bf16 %v799_v5, %v799_v5  ;;  %v802_v53 = vpack.c.bf16 %v800_v50, %v800_v50  ;;  %v971_v57 = vpop.permute.xlu0 %970  ;;  %1133 = vmatpush1.bf16.msra.mxu0 %v757_v43  ;;  %7049 = vst [vmem:[#allocation32_spill] sm:$0xff] %v7048_v18  ;;  %v3916_v5 = vld [vmem:[%s4309_s17] sm:$0xff] }
 0x191   : > { %v974_v59 = vsel %vm6908_vm8, %v971_v57, %v973_v51  ;;  %v975_v61 = vsel %vm6908_vm8, %v973_v51, %v971_v57  ;;  %vm7065_vm8 = vmmov %vm7062_vm1 }
 0x192   : > { %v804_v10 = vshll.u32 %v801_v52, 16  ;;  %v807_v11 = vshll.u32 %v802_v53, 16  ;;  %v976_v20 = vmul.f32 %v974_v59, %v4849_v1  ;;  %v977_v21 = vmul.f32 %v975_v61, %v4846_v36  ;;  %v3917_v53 = vld [vmem:[%s4309_s17 + $0x10] sm:$0xff] }
 0x194   : > { %v814_v27 = vsel %vm4933_vm2, %v804_v10, %v813_v25  ;;  %v817_v28 = vsel %vm4933_vm2, %v807_v11, %v816_v26  ;;  %v978_v30 = vpack.c.bf16 %v976_v20, %v976_v20  ;;  %v979_v17 = vpack.c.bf16 %v977_v21, %v977_v21  ;;  %v3918_v25 = vld [vmem:[%s4309_s17 + $0x8] sm:$0xff] }
 0x195   : > { %815 = vst [vmem:[#allocation2 + $0x120] sm:$0x1] %v814_v27  ;;  %818 = vst [vmem:[#allocation2 + $0x128] sm:$0x1] %v817_v28  ;;  %v3919_v27 = vld [vmem:[%s4309_s17 + $0x18] sm:$0xff] }
 0x196   : > { %v982_v0 = vrot.slane %v978_v30, 4  ;;  %v983_v2 = vrot.slane %v979_v17, 4 }
 0x198   : > { %v989_v3 = vsel %vm4949_vm7, %v982_v0, %v988_v34  ;;  %v992_v37 = vsel %vm4949_vm7, %v983_v2, %v991_v35  ;;  %v3920_v34 = vld [vmem:[%s4309_s17 + $0x20] sm:$0xff]  ;;  %v3921_v0 = vld [vmem:[%s4309_s17 + $0x30] sm:$0xff] }
 0x199   : > { %990 = vst [vmem:[#allocation2 + $0x120] sm:$0x10] %v989_v3  ;;  %993 = vst [vmem:[#allocation2 + $0x128] sm:$0x10] %v992_v37 }
 0x1a0   : > { %v4957_v6 = vld [vmem:[#allocation2 + $0x120] sm:$0xff]  ;;  %v4959_v7 = vld [vmem:[#allocation2 + $0x128] sm:$0xff] }
 0x1a1   : > { %7050 = vst [vmem:[#allocation33_spill] sm:$0xff] %v4957_v6  ;;  %7051 = vst [vmem:[#allocation34_spill] sm:$0xff] %v4959_v7  ;;  %1134 = vmatprep.subr.bf16.mxu0 %v4959_v7 }
 0x1a2   : > { %1135 = vmatpush1.bf16.msra.mxu0 %v4957_v6 }
 0x1a5   : > { %3742 = vmatmul.mubr.msk.bf16.vlgmr.msra.gmra.mrb[0].mxu0 %vm6907_vm5, %v3894_v38  ;;  %v3922_v38 = vld [vmem:[%s4309_s17 + $0x28] sm:$0xff] }
 0x1a6   : > { %1172 = vmatprep.mubr.bf16.mxu0 %v6910_v56 }
 0x1ad   : > { %3743 = vmatmul.mubr.msk.bf16.gmra.mrb[4].mxu0 %vm6907_vm5, %v3895_v39  ;;  %vm7064_vm5 = vmmov %vm7062_vm1 }
 0x278   : > { %v1164_v43 = vpop.f32.mrb[0].mxu0 }
 0x279   : > { %v1183_v44 = vmax.f32 %v1164_v43, 0.0  ;;  %v1166_v49 = vpop.f32.mrb[1].mxu0  ;;  %v3923_v43 = vld [vmem:[%s4309_s17 + $0x38] sm:$0xff] }
 0x27a   : > { %v1168_v4 = vpop.f32.mrb[2].mxu0  ;;  %v1184_v20 = vmax.f32 %v1166_v49, 0.0  ;;  %v4104_v49 = vmov 1966171168  }
 0x27b   : > { %v4967_v50 = vadd.f32 %v3916_v5, %v1183_v44  ;;  %v1185_v51 = vmax.f32 %v1168_v4, 0.0  ;;  %v1170_v52 = vpop.f32.mrb[3].mxu0  ;;  %v1576_v4 = vunpack.c.l.s4 %v4104_v49 }
 0x27c   : > { %v1186_v21 = vmax.f32 %v1170_v52, 0.0  ;;  %v4991_v26 = vadd.f32 %v3918_v25, %v1184_v20 }
 0x27d   : > { %7052 = vst [vmem:[#allocation35_spill] sm:$0xff] %v4967_v50  ;;  %v4970_v57 = vadd.f32 %v3917_v53, %v1185_v51  ;;  %1199 = vrot.lane.b32.xlu0 %v4967_v50, %s4095_s24  ;;  %v1577_v5 = vunpack.c.0.s8 %v1576_v4  ;;  %v5103_v51 = vld.sshfl [vmem:[%s6897_s4] sm:$0x13 pattern:$0x75316420] }
 0x27e   : > { %7054 = vst [vmem:[#allocation37_spill] sm:$0xff] %v4991_v26  ;;  %v4996_v28 = vadd.f32 %v3919_v27, %v1186_v21  ;;  %7060 = vst [vmem:[#allocation43_spill] sm:$0xff] %v5103_v51  ;;  %v1574_v52 = vcombine.high %v5103_v51, %v5103_v51 }
 0x27f   : > { %7053 = vst [vmem:[#allocation36_spill] sm:$0xff] %v4970_v57  ;;  %1201 = vrot.lane.b32.xlu1 %v4970_v57, %s4095_s24  ;;  %v5110_v53 = vsub.s32 %v1577_v5, %v4459_v13 }
 0x280   : > { %v1174_v59 = vpop.f32.mrb[4].mxu0  ;;  %7055 = vst [vmem:[#allocation38_spill] sm:$0xff] %v4996_v28 }
 0x281   : > { %1239 = vrot.lane.b32.xlu0 %v4967_v50, %s4096_s28  ;;  %v1176_v61 = vpop.f32.mrb[5].mxu0  ;;  %v1187_v30 = vmax.f32 %v1174_v59, 0.0  ;;  %7061 = vst [vmem:[#allocation44_spill] sm:$0xff] %v5110_v53  ;;  %v1588_v59 = vrot.slane %v1574_v52, %v5110_v53 }
 0x282   : > { %v1178_v10 = vpop.f32.mrb[6].mxu0  ;;  %v1188_v3 = vmax.f32 %v1176_v61, 0.0 }
 0x283   : > { %1241 = vrot.lane.b32.xlu1 %v4970_v57, %s4096_s28  ;;  %v1180_v11 = vpop.f32.mrb[7].mxu0  ;;  %v1189_v17 = vmax.f32 %v1178_v10, 0.0  ;;  %v5017_v35 = vadd.f32 %v3920_v34, %v1187_v30  ;;  %1627 = vmatprep.mubr.bf16.mxu1 %v1588_v59 }
 0x284   : > { %v1190_v37 = vmax.f32 %v1180_v11, 0.0  ;;  %v5043_v39 = vadd.f32 %v3922_v38, %v1188_v3 }
 0x285   : > { %1279 = vrot.lane.b32.xlu0 %v4967_v50, %s4097_s10  ;;  %7056 = vst [vmem:[#allocation39_spill] sm:$0xff] %v5017_v35  ;;  %v5022_v2 = vadd.f32 %v3921_v0, %v1189_v17 }
 0x286   : > { %7058 = vst [vmem:[#allocation41_spill] sm:$0xff] %v5043_v39  ;;  %v5048_v44 = vadd.f32 %v3923_v43, %v1190_v37 }
 0x287   : > { %1281 = vrot.lane.b32.xlu1 %v4970_v57, %s4097_s10  ;;  %7057 = vst [vmem:[#allocation40_spill] sm:$0xff] %v5022_v2 }
 0x288   : > { %7059 = vst [vmem:[#allocation42_spill] sm:$0xff] %v5048_v44 }
 0x289   : > { %1319 = vrot.lane.b32.xlu0 %v4967_v50, %s4098_s7 }
 0x28b   : > { %1321 = vrot.lane.b32.xlu1 %v4970_v57, %s4098_s7 }
 0x28d   : > { %1367 = vrot.lane.b32.xlu0 %v4967_v50, %s4099_s13 }
 0x28f   : > { %1369 = vrot.lane.b32.xlu1 %v4970_v57, %s4099_s13 }
 0x291   : > { %1207 = vrot.lane.b32.xlu0 %v4991_v26, %s4095_s24 }
 0x293   : > { %1209 = vrot.lane.b32.xlu1 %v4996_v28, %s4095_s24 }
 0x295   : > { %1247 = vrot.lane.b32.xlu0 %v4991_v26, %s4096_s28 }
 0x297   : > { %1249 = vrot.lane.b32.xlu1 %v4996_v28, %s4096_s28 }
 0x299   : > { %1287 = vrot.lane.b32.xlu0 %v4991_v26, %s4097_s10 }
 0x29b   : > { %1289 = vrot.lane.b32.xlu1 %v4996_v28, %s4097_s10 }
 0x29d   : > { %1327 = vrot.lane.b32.xlu0 %v4991_v26, %s4098_s7 }
 0x29f   : > { %1329 = vrot.lane.b32.xlu1 %v4996_v28, %s4098_s7 }
 0x2a1   : > { %1375 = vrot.lane.b32.xlu0 %v4991_v26, %s4099_s13 }
 0x2a3   : > { %1377 = vrot.lane.b32.xlu1 %v4996_v28, %s4099_s13 }
 0x2a5   : > { %1203 = vrot.lane.b32.xlu0 %v5017_v35, %s4095_s24 }
 0x2a7   : > { %1205 = vrot.lane.b32.xlu1 %v5022_v2, %s4095_s24 }
 0x2a9   : > { %1243 = vrot.lane.b32.xlu0 %v5017_v35, %s4096_s28 }
 0x2ab   : > { %1245 = vrot.lane.b32.xlu1 %v5022_v2, %s4096_s28 }
 0x2ad   : > { %1283 = vrot.lane.b32.xlu0 %v5017_v35, %s4097_s10 }
 0x2af   : > { %1285 = vrot.lane.b32.xlu1 %v5022_v2, %s4097_s10 }
 0x2b1   : > { %1323 = vrot.lane.b32.xlu0 %v5017_v35, %s4098_s7 }
 0x2b3   : > { %1325 = vrot.lane.b32.xlu1 %v5022_v2, %s4098_s7 }
 0x2b5   : > { %1371 = vrot.lane.b32.xlu0 %v5017_v35, %s4099_s13 }
 0x2b7   : > { %1373 = vrot.lane.b32.xlu1 %v5022_v2, %s4099_s13 }
 0x2b9   : > { %1211 = vrot.lane.b32.xlu0 %v5043_v39, %s4095_s24 }
 0x2bb   : > { %1213 = vrot.lane.b32.xlu1 %v5048_v44, %s4095_s24 }
 0x2bd   : > { %1407 = vrot.lane.b32.xlu0 %v4967_v50, %s4100_s15 }
 0x2bf   : > { %1409 = vrot.lane.b32.xlu1 %v4970_v57, %s4100_s15 }
 0x2c1   : > { %1251 = vrot.lane.b32.xlu0 %v5043_v39, %s4096_s28 }
 0x2c3   : > { %1253 = vrot.lane.b32.xlu1 %v5048_v44, %s4096_s28 }
 0x2c5   : > { %1291 = vrot.lane.b32.xlu0 %v5043_v39, %s4097_s10 }
 0x2c7   : > { %1417 = vrot.lane.b32.xlu1 %v4996_v28, %s4100_s15 }
 0x2c9   : > { %1331 = vrot.lane.b32.xlu0 %v5043_v39, %s4098_s7 }
 0x2cb   : > { %1293 = vrot.lane.b32.xlu1 %v5048_v44, %s4097_s10 }
 0x2cd   : > { %1379 = vrot.lane.b32.xlu0 %v5043_v39, %s4099_s13 }
 0x2cf   : > { %1413 = vrot.lane.b32.xlu1 %v5022_v2, %s4100_s15 }
 0x2d1   : > { %1415 = vrot.lane.b32.xlu0 %v4991_v26, %s4100_s15 }
 0x2d3   : > { %1333 = vrot.lane.b32.xlu1 %v5048_v44, %s4098_s7 }
 0x2d5   : > { %1411 = vrot.lane.b32.xlu0 %v5017_v35, %s4100_s15 }
 0x2d7   : > { %1449 = vrot.lane.b32.xlu1 %v4970_v57, %s4101_s16 }
 0x2d9   : > { %1419 = vrot.lane.b32.xlu0 %v5043_v39, %s4100_s15 }
 0x2db   : > { %1457 = vrot.lane.b32.xlu1 %v4996_v28, %s4101_s16 }
 0x2dd   : > { %1447 = vrot.lane.b32.xlu0 %v4967_v50, %s4101_s16 }
 0x2df   : > { %1453 = vrot.lane.b32.xlu1 %v5022_v2, %s4101_s16 }
 0x2e1   : > { %1455 = vrot.lane.b32.xlu0 %v4991_v26, %s4101_s16 }
 0x2e3   : > { %1381 = vrot.lane.b32.xlu1 %v5048_v44, %s4099_s13 }
 0x2e5   : > { %1451 = vrot.lane.b32.xlu0 %v5017_v35, %s4101_s16 }
 0x2e7   : > { %1489 = vrot.lane.b32.xlu1 %v4970_v57, %s4102_s29 }
 0x2e9   : > { %1459 = vrot.lane.b32.xlu0 %v5043_v39, %s4101_s16 }
 0x2eb   : > { %1421 = vrot.lane.b32.xlu1 %v5048_v44, %s4100_s15 }
 0x2ed   : > { %1487 = vrot.lane.b32.xlu0 %v4967_v50, %s4102_s29 }
 0x2ef   : > { %v1200_v61 = vpop.permute.xlu0 %1199  ;;  %1497 = vrot.lane.b32.xlu1 %v4996_v28, %s4102_s29 }
 0x2f1   : > { %v1202_v10 = vpop.permute.xlu1 %1201  ;;  %1495 = vrot.lane.b32.xlu0 %v4991_v26, %s4102_s29 }
 0x2f3   : > { %v1240_v11 = vpop.permute.xlu0 %1239  ;;  %1461 = vrot.lane.b32.xlu1 %v5048_v44, %s4101_s16 }
 0x2f5   : > { %v1242_v13 = vpop.permute.xlu1 %1241  ;;  %1491 = vrot.lane.b32.xlu0 %v5017_v35, %s4102_s29 }
 0x2f7   : > { %v5123_v20 = vpop.permute.xlu0 %1279  ;;  %1493 = vrot.lane.b32.xlu1 %v5022_v2, %s4102_s29 }
 0x2f9   : > { %v5127_v21 = vpop.permute.xlu1 %1281  ;;  %1499 = vrot.lane.b32.xlu0 %v5043_v39, %s4102_s29 }
 0x2fb   : > { %v5131_v25 = vpop.permute.xlu0 %1319  ;;  %1501 = vrot.lane.b32.xlu1 %v5048_v44, %s4102_s29 }
 0x2fd   : > { %v5135_v27 = vpop.permute.xlu1 %1321 }
 0x2ff   : > { %v5137_v30 = vpop.permute.xlu0 %1367 }
 0x301   : > { %v5139_v17 = vpop.permute.xlu1 %1369 }
 0x303   : > { %v1208_v34 = vpop.permute.xlu0 %1207 }
 0x304   : > { %v1215_v0 = vsel %vm7062_vm1, %v1200_v61, %v1208_v34  ;;  %v1219_v3 = vsel %vm7063_vm14, %v1208_v34, %v1200_v61  ;;  %vm7070_vm14 = vmmov %vm7062_vm1 }
 0x305   : > { %v1210_v37 = vpop.permute.xlu1 %1209  ;;  %v1223_v49 = vmul.f32 %v1219_v3, %v4500_v24  ;;  %v1224_v4 = vmul.f32 %v1215_v0, %v4497_v23 }
 0x306   : > { %v1216_v38 = vsel %vm7064_vm5, %v1202_v10, %v1210_v37  ;;  %v1220_v43 = vsel %vm7065_vm8, %v1210_v37, %v1202_v10  ;;  %vm7068_vm8 = vmmov %vm7062_vm1 }
 0x307   : > { %v1225_v5 = vmul.f32 %v1220_v43, %v4500_v24  ;;  %v1226_v52 = vmul.f32 %v1216_v38, %v4497_v23  ;;  %v1248_v59 = vpop.permute.xlu0 %1247  ;;  %vm7069_vm5 = vmmov %vm7062_vm1 }
 0x308   : > { %v1255_v14 = vsel %vm407_vm4, %v1240_v11, %v1248_v59 }
 0x309   : > { %v5153_v12 = vpack.c.bf16 %v1225_v5, %v1223_v49  ;;  %v5155_v56 = vpack.c.bf16 %v1226_v52, %v1224_v4  ;;  %v1250_v61 = vpop.permute.xlu1 %1249 }
 0x30a   : > { %v1256_v29 = vsel %vm407_vm4, %v1242_v13, %v1250_v61  ;;  %v1260_v16 = vsel %vm407_vm4, %v1250_v61, %v1242_v13  ;;  %v1259_v13 = vsel %vm407_vm4, %v1248_v59, %v1240_v11 }
 0x30b   : > { %7066 = vst [vmem:[#allocation45_spill] sm:$0xff] %v5153_v12  ;;  %7067 = vst [vmem:[#allocation46_spill] sm:$0xff] %v5155_v56  ;;  %v1288_v34 = vpop.permute.xlu0 %1287  ;;  %1595 = vmatprep.subr.bf16.mxu1 %v5155_v56  ;;  %v1265_v61 = vmul.f32 %v1260_v16, %v4563_v9 }
 0x30c   : > { %1596 = vmatpush1.bf16.msra.mxu1 %v5153_v12  ;;  %v1266_v12 = vmul.f32 %v1256_v29, %v4560_v8  ;;  %v1264_v29 = vmul.f32 %v1255_v14, %v4560_v8 }
 0x30d   : > { %v1290_v10 = vpop.permute.xlu1 %1289 }
 0x30f   : > { %v5159_v37 = vpop.permute.xlu0 %1327 }
 0x311   : > { %v5161_v3 = vpop.permute.xlu1 %1329 }
 0x313   : > { %v5163_v0 = vpop.permute.xlu0 %1375 }
 0x315   : > { %v5165_v43 = vpop.permute.xlu1 %1377 }
 0x317   : > { %v1204_v38 = vpop.permute.xlu0 %1203 }
 0x319   : > { %v1206_v49 = vpop.permute.xlu1 %1205 }
 0x31b   : > { %v1244_v5 = vpop.permute.xlu0 %1243 }
 0x31d   : > { %v1246_v4 = vpop.permute.xlu1 %1245 }
 0x31f   : > { %v1284_v52 = vpop.permute.xlu0 %1283 }
 0x321   : > { %v5167_v18 = vpop.permute.xlu1 %1285 }
 0x323   : > { %v5169_v58 = vpop.permute.xlu0 %1323 }
 0x325   : > { %v5171_v22 = vpop.permute.xlu1 %1325 }
 0x327   : > { %v5173_v48 = vpop.permute.xlu0 %1371 }
 0x329   : > { %v5175_v31 = vpop.permute.xlu1 %1373 }
 0x32b   : > { %v1212_v60 = vpop.permute.xlu0 %1211 }
 0x32c   : > { %v1217_v42 = vsel %vm7068_vm8, %v1204_v38, %v1212_v60  ;;  %v1221_v45 = vsel %vm7069_vm5, %v1212_v60, %v1204_v38  ;;  %vm7071_vm8 = vcmp.lt.s32.totalorder %v4486_v19, 15 }
 0x32d   : > { %v1214_v15 = vpop.permute.xlu1 %1213  ;;  %v1227_v7 = vmul.f32 %v1221_v45, %v4500_v24  ;;  %v1228_v51 = vmul.f32 %v1217_v42, %v4497_v23  ;;  %v1263_v42 = vmul.f32 %v1259_v13, %v4563_v9  ;;  %vm7072_vm5 = vmmov %vm7071_vm8 }
 0x32e   : > { %v1218_v56 = vsel %vm7062_vm1, %v1206_v49, %v1214_v15  ;;  %v1222_v6 = vsel %vm7070_vm14, %v1214_v15, %v1206_v49  ;;  %vm7073_vm1 = vmmov %vm7072_vm5 }
 0x32f   : > { %v1229_v60 = vmul.f32 %v1222_v6, %v4500_v24  ;;  %v1230_v38 = vmul.f32 %v1218_v56, %v4497_v23  ;;  %v5196_v53 = vpop.permute.xlu0 %1407  ;;  %v5209_v6 = vpack.c.bf16 %v1266_v12, %v1264_v29  ;;  %v1296_v56 = vsel %vm7071_vm8, %v5127_v21, %v1290_v10  ;;  %vm7074_vm14 = vmmov %vm7073_vm1 }
 0x330   : > { %v1295_v12 = vsel %vm7072_vm5, %v5123_v20, %v1288_v34  ;;  %v1300_v11 = vsel %vm7073_vm1, %v1290_v10, %v5127_v21  ;;  %v1306_v59 = vmul.f32 %v1296_v56, %v4611_v54  ;;  %v1299_v21 = vsel %vm7074_vm14, %v1288_v34, %v5123_v20  ;;  %vm7076_vm5 = vmmov %vm7073_vm1 }
 0x331   : > { %v5202_v1 = vpack.c.bf16 %v1229_v60, %v1227_v7  ;;  %v5204_v15 = vpack.c.bf16 %v1230_v38, %v1228_v51  ;;  %v5206_v45 = vpop.permute.xlu1 %1409  ;;  %v5220_v7 = vpack.c.bf16 %v1265_v61, %v1263_v42  ;;  %v1304_v10 = vmul.f32 %v1295_v12, %v4611_v54 }
 0x332   : > { %v1305_v56 = vmul.f32 %v1300_v11, %v4614_v55  ;;  %vm7075_vm8 = vcmp.lt.s32.totalorder %v4486_v19, 1 }
 0x333   : > { %v1252_v49 = vpop.permute.xlu0 %1251  ;;  %1597 = vmatprep.subr.bf16.mxu1 %v5204_v15  ;;  %v1336_v20 = vsel %vm7075_vm8, %v5135_v27, %v5161_v3  ;;  %vm7077_vm14 = vmmov %vm7075_vm8 }
 0x334   : > { %v1257_v14 = vsel %vm407_vm4, %v1244_v5, %v1252_v49  ;;  %v1261_v16 = vsel %vm407_vm4, %v1252_v49, %v1244_v5  ;;  %1598 = vmatpush1.bf16.msra.mxu1 %v5202_v1 }
 0x335   : > { %v1254_v51 = vpop.permute.xlu1 %1253  ;;  %1599 = vmatprep.subr.bf16.mxu1 %v5209_v6  ;;  %v1267_v38 = vmul.f32 %v1261_v16, %v4563_v9  ;;  %v1268_v13 = vmul.f32 %v1257_v14, %v4560_v8  ;;  %v1303_v16 = vmul.f32 %v1299_v21, %v4614_v55 }
 0x336   : > { %v1258_v5 = vsel %vm407_vm4, %v1246_v4, %v1254_v51  ;;  %v1262_v60 = vsel %vm407_vm4, %v1254_v51, %v1246_v4  ;;  %v5251_v51 = vpack.c.bf16 %v1306_v59, %v1304_v10  ;;  %v1335_v59 = vsel %vm7077_vm14, %v5131_v25, %v5159_v37  ;;  %vm7079_vm14 = vmmov %vm7075_vm8 }
 0x337   : > { %v1269_v29 = vmul.f32 %v1262_v60, %v4563_v9  ;;  %v1270_v61 = vmul.f32 %v1258_v5, %v4560_v8  ;;  %v1292_v42 = vpop.permute.xlu0 %1291  ;;  %v5263_v5 = vpack.c.bf16 %v1305_v56, %v1303_v16  ;;  %v7094_v8 = vld [vmem:[#allocation27_spill] sm:$0xff] }
 0x338   : > { %1600 = vmatpush1.bf16.msra.mxu1 %v5220_v7  ;;  %v1297_v12 = vsel %vm7076_vm5, %v1284_v52, %v1292_v42  ;;  %v1301_v11 = vsel %vm7073_vm1, %v1292_v42, %v1284_v52  ;;  %vm7078_vm5 = vmmov %vm7073_vm1  ;;  %v7096_v9 = vld [vmem:[#allocation43_spill] sm:$0xff] }
 0x339   : > { %v5244_v4 = vpack.c.bf16 %v1269_v29, %v1267_v38  ;;  %v5246_v49 = vpack.c.bf16 %v1270_v61, %v1268_v13  ;;  %v5248_v14 = vpop.permute.xlu1 %1417  ;;  %v1340_v38 = vsel %vm7075_vm8, %v5161_v3, %v5135_v27  ;;  %v1346_v13 = vmul.f32 %v1336_v20, %v4659_v40 }
 0x33a   : > { %v1307_v61 = vmul.f32 %v1301_v11, %v4614_v55  ;;  %v1308_v42 = vmul.f32 %v1297_v12, %v4611_v54  ;;  %v1339_v27 = vsel %vm7079_vm14, %v5159_v37, %v5131_v25  ;;  %v1344_v3 = vmul.f32 %v1335_v59, %v4659_v40 }
 0x33b   : > { %v1332_v34 = vpop.permute.xlu0 %1331  ;;  %1601 = vmatprep.subr.bf16.mxu1 %v5246_v49  ;;  %v1345_v12 = vmul.f32 %v1340_v38, %v4662_v41 }
 0x33c   : > { %1602 = vmatpush1.bf16.msra.mxu1 %v5244_v4  ;;  %v5298_v11 = vpack.c.bf16 %v1346_v13, %v1344_v3  ;;  %v1337_v25 = vsel %vm7075_vm8, %v5169_v58, %v1332_v34 }
 0x33d   : > { %v1294_v60 = vpop.permute.xlu1 %1293  ;;  %1603 = vmatprep.subr.bf16.mxu1 %v5251_v51 }
 0x33e   : > { %v1298_v52 = vsel %vm7078_vm5, %v5167_v18, %v1294_v60  ;;  %v1302_v29 = vsel %vm7073_vm1, %v1294_v60, %v5167_v18  ;;  %vm7080_vm5 = vmmov %vm7075_vm8  ;;  %vm7083_vm8 = vcmp.lt.s32.totalorder %v4486_v19, 113 }
 0x33f   : > { %v1309_v21 = vmul.f32 %v1302_v29, %v4614_v55  ;;  %v1310_v10 = vmul.f32 %v1298_v52, %v4611_v54  ;;  %v1380_v56 = vpop.permute.xlu0 %1379  ;;  %v1343_v52 = vmul.f32 %v1339_v27, %v4662_v41  ;;  %v1341_v37 = vsel %vm7080_vm5, %v1332_v34, %v5169_v58  ;;  %vm7081_vm1 = vmmov %vm7080_vm5 }
 0x340   : > { %1604 = vmatpush1.bf16.msra.mxu1 %v5263_v5  ;;  %vm7082_vm14 = vmmov %vm7081_vm1 }
 0x341   : > { %v5291_v16 = vpack.c.bf16 %v1309_v21, %v1307_v61  ;;  %v5293_v18 = vpack.c.bf16 %v1310_v10, %v1308_v42  ;;  %v5295_v20 = vpop.permute.xlu1 %1413  ;;  %v5310_v38 = vpack.c.bf16 %v1345_v12, %v1343_v52  ;;  %v1347_v61 = vmul.f32 %v1341_v37, %v4662_v41  ;;  %vm7084_vm5 = vmmov %vm7083_vm8 }
 0x342   : > { %v1348_v42 = vmul.f32 %v1337_v25, %v4659_v40  ;;  %v1388_v52 = vsel %vm571_vm10, %v5165_v43, %v5139_v17  ;;  %v1387_v37 = vsel %vm571_vm10, %v5163_v0, %v5137_v30 }
 0x343   : > { %v1416_v60 = vpop.permute.xlu0 %1415  ;;  %1605 = vmatprep.subr.bf16.mxu1 %v5293_v18 }
 0x344   : > { %1606 = vmatpush1.bf16.msra.mxu1 %v5291_v16 }
 0x345   : > { %v1334_v59 = vpop.permute.xlu1 %1333  ;;  %1607 = vmatprep.subr.bf16.mxu1 %v5298_v11 }
 0x346   : > { %v1338_v13 = vsel %vm7081_vm1, %v5171_v22, %v1334_v59  ;;  %v1342_v29 = vsel %vm7082_vm14, %v1334_v59, %v5171_v22  ;;  %v5332_v22 = vpack.c.bf16 %v4996_v28, %v4991_v26  ;;  %v1384_v59 = vsel %vm571_vm10, %v5139_v17, %v5165_v43  ;;  %vm7085_vm1 = vmmov %vm7084_vm5 }
 0x347   : > { %v1349_v58 = vmul.f32 %v1342_v29, %v4662_v41  ;;  %v1350_v34 = vmul.f32 %v1338_v13, %v4659_v40  ;;  %v1412_v21 = vpop.permute.xlu0 %1411  ;;  %v5352_v13 = vpack.c.bf16 %v4970_v57, %v4967_v50  ;;  %v1394_v29 = vmul.f32 %v1388_v52, %v4695_v32  ;;  %vm7086_vm14 = vmmov %vm7085_vm1 }
 0x348   : > { %1608 = vmatpush1.bf16.msra.mxu1 %v5310_v38  ;;  %v1392_v17 = vmul.f32 %v1387_v37, %v4695_v32  ;;  %v1393_v43 = vmul.f32 %v1384_v59, %v4700_v33  ;;  %v5371_v52 = vpack.c.bf16 %v5022_v2, %v5017_v35  ;;  %v1389_v37 = vsel %vm571_vm10, %v1380_v56, %v5173_v48 }
 0x349   : > { %v5323_v10 = vpack.c.bf16 %v1349_v58, %v1347_v61  ;;  %v5325_v27 = vpack.c.bf16 %v1350_v34, %v1348_v42  ;;  %v5327_v3 = vpop.permute.xlu1 %1449  ;;  %v5357_v42 = vpack.c.bf16 %v5048_v44, %v5043_v39  ;;  %v1383_v58 = vsel %vm571_vm10, %v5137_v30, %v5163_v0 }
 0x34a   : > { %v1391_v44 = vmul.f32 %v1383_v58, %v4700_v33  ;;  %v5374_v39 = vpack.c.bf16 %v1394_v29, %v1392_v17  ;;  %v1385_v30 = vsel %vm571_vm10, %v5173_v48, %v1380_v56  ;;  %v1427_v59 = vsel %vm7083_vm8, %v1416_v60, %v5196_v53  ;;  %vm7087_vm8 = vmmov %vm7085_vm1 }
 0x34b   : > { %v1420_v12 = vpop.permute.xlu0 %1419  ;;  %1609 = vmatprep.subr.bf16.mxu1 %v5325_v27  ;;  %v1428_v29 = vsel %vm7084_vm5, %v5248_v14, %v5206_v45  ;;  %v1395_v17 = vmul.f32 %v1385_v30, %v4700_v33  ;;  %v1423_v48 = vsel %vm7085_vm1, %v5196_v53, %v1416_v60  ;;  %v1432_v35 = vmul.f32 %v1427_v59, %v4735_v62  ;;  %vm7088_vm5 = vmmov %vm7085_vm1 }
 0x34c   : > { %1610 = vmatpush1.bf16.msra.mxu1 %v5323_v10  ;;  %v5386_v2 = vpack.c.bf16 %v1393_v43, %v1391_v44  ;;  %v1396_v43 = vmul.f32 %v1389_v37, %v4695_v32  ;;  %v1424_v53 = vsel %vm7086_vm14, %v5206_v45, %v5248_v14  ;;  %v1434_v60 = vmul.f32 %v1428_v29, %v4735_v62  ;;  %vm7089_vm14 = vmmov %vm7085_vm1 }
 0x34d   : > { %v5339_v25 = vpop.permute.xlu1 %1457  ;;  %1611 = vmatprep.subr.bf16.mxu1 %v5332_v22  ;;  %v1429_v45 = vsel %vm7088_vm5, %v1420_v12, %v1412_v21 }
 0x34e   : > { %v5421_v57 = vpack.c.bf16 %v1434_v60, %v1432_v35  ;;  %v1468_v35 = vsel %vm675_vm12, %v5339_v25, %v5327_v3 }
 0x34f   : > { %v1448_v61 = vpop.permute.xlu0 %1447 }
 0x350   : > { %1612 = vmatpush1.bf16.msra.mxu1 %v5352_v13 }
 0x351   : > { %v5366_v34 = vpop.permute.xlu1 %1453  ;;  %1613 = vmatprep.subr.bf16.mxu1 %v5357_v42 }
 0x353   : > { %v1456_v0 = vpop.permute.xlu0 %1455 }
 0x354   : > { %1614 = vmatpush1.bf16.msra.mxu1 %v5371_v52 }
 0x355   : > { %v1382_v58 = vpop.permute.xlu1 %1381  ;;  %1615 = vmatprep.subr.bf16.mxu1 %v5374_v39 }
 0x356   : > { %v1386_v56 = vsel %vm571_vm10, %v5175_v31, %v1382_v58  ;;  %v1390_v44 = vsel %vm571_vm10, %v1382_v58, %v5175_v31  ;;  %v1431_v31 = vmul.f32 %v1423_v48, %v4738_v63 }
 0x357   : > { %v1397_v28 = vmul.f32 %v1386_v56, %v4700_v33  ;;  %v1398_v30 = vmul.f32 %v1390_v44, %v4695_v32  ;;  %v1452_v26 = vpop.permute.xlu0 %1451  ;;  %v1425_v56 = vsel %vm7087_vm8, %v1412_v21, %v1420_v12  ;;  %v1433_v44 = vmul.f32 %v1424_v53, %v4738_v63 }
 0x358   : > { %1616 = vmatpush1.bf16.msra.mxu1 %v5386_v2  ;;  %v1435_v29 = vmul.f32 %v1425_v56, %v4738_v63  ;;  %v1463_v21 = vsel %vm675_vm12, %v1448_v61, %v1456_v0  ;;  %vm7090_vm8 = vcmp.lt.s32.totalorder %v4486_v19, 111 }
 0x359   : > { %v5414_v58 = vpack.c.bf16 %v1397_v28, %v1395_v17  ;;  %v5416_v37 = vpack.c.bf16 %v1398_v30, %v1396_v43  ;;  %v1490_v59 = vpop.permute.xlu1 %1489  ;;  %v1467_v28 = vsel %vm675_vm12, %v1456_v0, %v1448_v61  ;;  %v5429_v14 = vpack.c.bf16 %v1433_v44, %v1431_v31  ;;  %vm7091_vm5 = vmmov %vm7090_vm8 }
 0x35a   : > { %v1436_v43 = vmul.f32 %v1429_v45, %v4735_v62  ;;  %v1472_v30 = vmul.f32 %v1467_v28, %v4769_v46  ;;  %v1464_v61 = vsel %vm675_vm12, %v5327_v3, %v5339_v25  ;;  %v1474_v0 = vmul.f32 %v1468_v35, %v4769_v46 }
 0x35b   : > { %v1460_v50 = vpop.permute.xlu0 %1459  ;;  %1617 = vmatprep.subr.bf16.mxu1 %v5416_v37 }
 0x35c   : > { %1618 = vmatpush1.bf16.msra.mxu1 %v5414_v58  ;;  %v1465_v28 = vsel %vm675_vm12, %v1452_v26, %v1460_v50  ;;  %v1469_v3 = vsel %vm675_vm12, %v1460_v50, %v1452_v26 }
 0x35d   : > { %v1422_v17 = vpop.permute.xlu1 %1421  ;;  %1619 = vmatprep.subr.bf16.mxu1 %v5421_v57 }
 0x35e   : > { %v1426_v12 = vsel %vm7085_vm1, %v5295_v20, %v1422_v17  ;;  %v1430_v48 = vsel %vm7089_vm14, %v1422_v17, %v5295_v20  ;;  %v1471_v20 = vmul.f32 %v1463_v21, %v4772_v47  ;;  %v1473_v17 = vmul.f32 %v1464_v61, %v4772_v47  ;;  %vm7092_vm1 = vmmov %vm7091_vm5 }
 0x35f   : > { %v1437_v53 = vmul.f32 %v1426_v12, %v4738_v63  ;;  %v1438_v60 = vmul.f32 %v1430_v48, %v4735_v62  ;;  %v1488_v31 = vpop.permute.xlu0 %1487  ;;  %v5463_v12 = vpack.c.bf16 %v1474_v0, %v1472_v30  ;;  %v1475_v21 = vmul.f32 %v1465_v28, %v4772_v47  ;;  %vm7093_vm14 = vmmov %vm7092_vm1 }
 0x360   : > { %1620 = vmatpush1.bf16.msra.mxu1 %v5429_v14  ;;  %v5471_v35 = vpack.c.bf16 %v1473_v17, %v1471_v20 }
 0x361   : > { %v5456_v56 = vpack.c.bf16 %v1437_v53, %v1435_v29  ;;  %v5458_v44 = vpack.c.bf16 %v1438_v60, %v1436_v43  ;;  %v1498_v45 = vpop.permute.xlu1 %1497  ;;  %v1476_v43 = vmul.f32 %v1469_v3, %v4769_v46 }
 0x362   : > { %v1508_v50 = vsel %vm7091_vm5, %v1498_v45, %v1490_v59  ;;  %v1504_v28 = vsel %vm7093_vm14, %v1490_v59, %v1498_v45  ;;  %vm7098_vm5 = vmmov %vm7092_vm1 }
 0x363   : > { %v1496_v25 = vpop.permute.xlu0 %1495  ;;  %1621 = vmatprep.subr.bf16.mxu1 %v5458_v44  ;;  %v1514_v17 = vmul.f32 %v1508_v50, %v4846_v36  ;;  %vm7099_vm14 = vmmov %vm7092_vm1 }
 0x364   : > { %v1507_v29 = vsel %vm7090_vm8, %v1496_v25, %v1488_v31  ;;  %1622 = vmatpush1.bf16.msra.mxu1 %v5456_v56  ;;  %v1503_v53 = vsel %vm7092_vm1, %v1488_v31, %v1496_v25  ;;  %vm7097_vm8 = vmmov %vm7092_vm1 }
 0x365   : > { %v1462_v48 = vpop.permute.xlu1 %1461  ;;  %1623 = vmatprep.subr.bf16.mxu1 %v5463_v12  ;;  %v1512_v60 = vmul.f32 %v1507_v29, %v4846_v36  ;;  %v1511_v31 = vmul.f32 %v1503_v53, %v7094_v8 }
 0x366   : > { %v1466_v26 = vsel %vm675_vm12, %v5366_v34, %v1462_v48  ;;  %v1470_v30 = vsel %vm675_vm12, %v1462_v48, %v5366_v34 }
 0x367   : > { %v1477_v61 = vmul.f32 %v1466_v26, %v4772_v47  ;;  %v1478_v0 = vmul.f32 %v1470_v30, %v4769_v46  ;;  %v1492_v20 = vpop.permute.xlu0 %1491  ;;  %v1520_v25 = vpack.c.bf16 %v1514_v17, %v1512_v60  ;;  %v7095_v26 = vld [vmem:[#allocation44_spill] sm:$0xff]  ;;  %v1513_v46 = vmul.f32 %v1504_v28, %v7094_v8  ;;  %v7101_v28 = vld [vmem:[#allocation34_spill] sm:$0xff] }
 0x368   : > { %1624 = vmatpush1.bf16.msra.mxu1 %v5471_v35  ;;  %v1581_v30 = vrot.slane %v7096_v9, %v7095_v26 }
 0x369   : > { %v5493_v3 = vpack.c.bf16 %v1477_v61, %v1475_v21  ;;  %v1482_v34 = vpack.c.bf16 %v1478_v0, %v1476_v43  ;;  %v1494_v48 = vpop.permute.xlu1 %1493  ;;  %v1519_v21 = vpack.c.bf16 %v1513_v46, %v1511_v31  ;;  %v7100_v0 = vmov 0   ;;  %v7103_v31 = vld [vmem:[#allocation46_spill] sm:$0xff] }
 0x36a   : > { %v1589_v17 = vcombine.high %v1581_v30, %v1581_v30 }
 0x36b   : > { %v1500_v29 = vpop.permute.xlu0 %1499  ;;  %1625 = vmatprep.subr.bf16.mxu1 %v1482_v34 }
 0x36c   : > { %v1505_v47 = vsel %vm7097_vm8, %v1492_v20, %v1500_v29  ;;  %v1509_v59 = vsel %vm7098_vm5, %v1500_v29, %v1492_v20  ;;  %1626 = vmatpush1.bf16.msra.mxu1 %v5493_v3  ;;  %vm7104_vm8 = vcmask 392192   ;;  %v7105_v29 = vld [vmem:[#allocation45_spill] sm:$0xff]  ;;  %vm7111_vm5 = vcmp.lt.s32.totalorder %v4486_v19, 15 }
 0x36d   : > { %v1502_v45 = vpop.permute.xlu1 %1501  ;;  %1636 = vmatprep.subr.bf16.mxu1 %v1520_v25  ;;  %v1515_v9 = vmul.f32 %v1505_v47, %v7094_v8  ;;  %v1516_v53 = vmul.f32 %v1509_v59, %v4846_v36  ;;  %v3898_v47 = vld [vmem:[#allocation8 + $0x34] ss:$12 sps:$4 sm:$0xff]  }
 0x36e   : > { %v1506_v43 = vsel %vm7092_vm1, %v1494_v48, %v1502_v45  ;;  %v1510_v50 = vsel %vm7099_vm14, %v1502_v45, %v1494_v48  ;;  %v7102_v48 = vld [vmem:[#allocation33_spill] sm:$0xff]  ;;  %vm7112_vm1 = vmmov %vm7111_vm5  ;;  %vm7113_vm14 = vcmp.lt.s32.totalorder %v4486_v19, 113 }
 0x36f   : > { %v1517_v60 = vmul.f32 %v1506_v43, %v7094_v8  ;;  %v1518_v61 = vmul.f32 %v1510_v50, %v4846_v36  ;;  %1628 = vmatmul.mubr.bf16.vlgmr.msra.gmra.mrb[0].mxu1 %v1581_v30 }
 0x370   : > { %1637 = vmatpush1.bf16.msra.mxu1 %v1519_v21  ;;  %1668 = vmatprep.mubr.bf16.mxu1 %v7100_v0 }
 0x371   : > { %v1521_v20 = vpack.c.bf16 %v1517_v60, %v1515_v9  ;;  %v1522_v46 = vpack.c.bf16 %v1518_v61, %v1516_v53 }
 0x373   : > { %1638 = vmatprep.subr.bf16.mxu1 %v1522_v46 }
 0x374   : > { %1639 = vmatpush1.bf16.msra.mxu1 %v1521_v20 }
 0x375   : > { %1640 = vmatprep.subr.bf16.mxu1 %v7101_v28 }
 0x378   : > { %1641 = vmatpush1.bf16.msra.mxu1 %v7102_v48 }
 0x379   : > { %2024 = vmatprep.subr.bf16.mxu1 %v7103_v31 }
 0x37b   : > { %3745 = vmatmul.mubr.msk.bf16.vlgmr.msra.gmra.mrb[0].mxu1 %vm7104_vm8, %v1589_v17  ;;  %vm7114_vm8 = vmmov %vm7113_vm14 }
 0x37c   : > { %2025 = vmatpush1.bf16.msra.mxu1 %v7105_v29  ;;  %2056 = vmatprep.mubr.bf16.mxu1 %v3898_v47 }
 0x37d   : > { %2026 = vmatprep.subr.bf16.mxu1 %v5204_v15 }
 0x380   : > { %2027 = vmatpush1.bf16.msra.mxu1 %v5202_v1  ;;  %v3896_v1 = vld [vmem:[#allocation8 + $0x30] ss:$12 sps:$4 sm:$0xff]  }
 0x381   : > { %2028 = vmatprep.subr.bf16.mxu1 %v5209_v6 }
 0x384   : > { %2029 = vmatpush1.bf16.msra.mxu1 %v5220_v7 }
 0x385   : > { %2030 = vmatprep.subr.bf16.mxu1 %v5246_v49  ;;  %v7106_v49 = vld [vmem:[#allocation17_spill] sm:$0xff] }
 0x388   : > { %2031 = vmatpush1.bf16.msra.mxu1 %v5244_v4 }
 0x389   : > { %2032 = vmatprep.subr.bf16.mxu1 %v5251_v51 }
 0x38c   : > { %2033 = vmatpush1.bf16.msra.mxu1 %v5263_v5  ;;  %v7108_v5 = vld [vmem:[#allocation16_spill] sm:$0xff] }
 0x38d   : > { %2034 = vmatprep.subr.bf16.mxu1 %v5293_v18  ;;  %v7109_v18 = vld [vmem:[#allocation15_spill] sm:$0xff] }
 0x390   : > { %2035 = vmatpush1.bf16.msra.mxu1 %v5291_v16 }
 0x391   : > { %2036 = vmatprep.subr.bf16.mxu1 %v5298_v11 }
 0x394   : > { %2037 = vmatpush1.bf16.msra.mxu1 %v5310_v38 }
 0x395   : > { %2038 = vmatprep.subr.bf16.mxu1 %v5325_v27 }
 0x398   : > { %2039 = vmatpush1.bf16.msra.mxu1 %v5323_v10 }
 0x399   : > { %2040 = vmatprep.subr.bf16.mxu1 %v5332_v22 }
 0x39c   : > { %2041 = vmatpush1.bf16.msra.mxu1 %v5352_v13  ;;  %v1839_v13 = vld [vmem:[#allocation2 + $0x120] sm:$0x4] }
 0x39d   : > { %2042 = vmatprep.subr.bf16.mxu1 %v5357_v42  ;;  %v1842_v42 = vld [vmem:[#allocation2 + $0x128] sm:$0x4] }
 0x3a0   : > { %2043 = vmatpush1.bf16.msra.mxu1 %v5371_v52 }
 0x3a1   : > { %2044 = vmatprep.subr.bf16.mxu1 %v5374_v39 }
 0x3a4   : > { %2045 = vmatpush1.bf16.msra.mxu1 %v5386_v2 }
 0x3a5   : > { %2046 = vmatprep.subr.bf16.mxu1 %v5416_v37 }
 0x3a8   : > { %2047 = vmatpush1.bf16.msra.mxu1 %v5414_v58 }
 0x3a9   : > { %2048 = vmatprep.subr.bf16.mxu1 %v5421_v57 }
 0x3ac   : > { %2049 = vmatpush1.bf16.msra.mxu1 %v5429_v14  ;;  %v3899_v14 = vld [vmem:[#allocation8 + $0x4c] ss:$12 sps:$4 sm:$0xff]  }
 0x3ad   : > { %2050 = vmatprep.subr.bf16.mxu1 %v5458_v44 }
 0x3b0   : > { %2051 = vmatpush1.bf16.msra.mxu1 %v5456_v56  ;;  %v3901_v56 = vld [vmem:[#allocation8 + $0x48] ss:$12 sps:$4 sm:$0xff]  }
 0x3b1   : > { %2052 = vmatprep.subr.bf16.mxu1 %v5463_v12 }
 0x3b4   : > { %2053 = vmatpush1.bf16.msra.mxu1 %v5471_v35 }
 0x3b5   : > { %2054 = vmatprep.subr.bf16.mxu1 %v1482_v34 }
 0x3b8   : > { %2055 = vmatpush1.bf16.msra.mxu1 %v5493_v3 }
 0x3b9   : > { %2077 = vmatprep.subr.bf16.mxu1 %v1520_v25 }
 0x3bb   : > { %2057 = vmatmul.mubr.bf16.vlgmr.msra.gmra.mrb[4].mxu1 %v3896_v1 }
 0x3bc   : > { %2078 = vmatpush1.bf16.msra.mxu1 %v1519_v21  ;;  %2066 = vmatprep.mubr.bf16.mxu1 %v3899_v14 }
 0x3bd   : > { %2079 = vmatprep.subr.bf16.mxu1 %v1522_v46  ;;  %v1802_v46 = vld [vmem:[#allocation2 + $0x128] sm:$0x2] }
 0x3c0   : > { %2080 = vmatpush1.bf16.msra.mxu1 %v1521_v20  ;;  %v1799_v20 = vld [vmem:[#allocation2 + $0x120] sm:$0x2] }
 0x3c3   : > { %2067 = vmatmul.mubr.bf16.gmra.mrb[8].mxu1 %v3901_v56 }
 0x3c4   : > { %2109 = vmatprep.mubr.bf16.mxu1 %v7100_v0 }
 0x44e   : > { %v1670_v57 = vpop.f32.mrb[0].mxu1 }
 0x44f   : > { %v1672_v2 = vpop.f32.mrb[1].mxu1 }
 0x450   : > { %v1679_v39 = vcombine.low %v1670_v57, %v1672_v2  ;;  %v1674_v15 = vpop.f32.mrb[2].mxu1 }
 0x451   : > { %v1675_v6 = vpop.f32.mrb[3].mxu1 }
 0x452   : > { %v1686_v7 = vrot.slane %v1679_v39, %v7095_v26 }
 0x454   : > { %v1693_v4 = vrot.slane %v1686_v7, %v7095_v26 }
 0x456   : > { %v5550_v51 = vadd.f32 %v7106_v49, %v1693_v4  ;;  %v1887_v4 = vld [vmem:[#allocation2 + $0x120] sm:$0x8]  ;;  %v1890_v49 = vld [vmem:[#allocation2 + $0x128] sm:$0x8] }
 0x458   : > { %7107 = vst [vmem:[#allocation43_spill] sm:$0xff] %v5550_v51  ;;  %v1736_v16 = vrot.slane %v5550_v51, %v7108_v5  ;;  %v1740_v11 = vrot.slane %v5550_v51, %v7109_v18 }
 0x45a   : > { %v1831_v38 = vpack.c.bf16 %v1736_v16, %v1736_v16  ;;  %v1832_v10 = vpack.c.bf16 %v1740_v11, %v1740_v11  ;;  %1785 = vrot.lane.b32.xlu1 %v1740_v11, %s4097_s10  ;;  %1783 = vrot.lane.b32.xlu0 %v1736_v16, %s4097_s10 }
 0x45c   : > { %v1835_v27 = vrot.slane %v1831_v38, 6  ;;  %v1836_v22 = vrot.slane %v1832_v10, 6 }
 0x45e   : > { %v1840_v58 = vsel %vm4531_vm3, %v1835_v27, %v1839_v13  ;;  %v1843_v37 = vsel %vm4531_vm3, %v1836_v22, %v1842_v42  ;;  %1873 = vrot.lane.b32.xlu1 %v1740_v11, %s4100_s15  ;;  %1871 = vrot.lane.b32.xlu0 %v1736_v16, %s4100_s15  ;;  %v1753_v42 = vld [vmem:[#allocation2 + $0x120] sm:$0x1] }
 0x45f   : > { %1841 = vst [vmem:[#allocation2 + $0x120] sm:$0x4] %v1840_v58  ;;  %1844 = vst [vmem:[#allocation2 + $0x128] sm:$0x4] %v1843_v37  ;;  %v1756_v58 = vld [vmem:[#allocation2 + $0x128] sm:$0x1] }
 0x462   : > { %1745 = vrot.lane.b32.xlu1 %v1740_v11, %s4095_s24  ;;  %1743 = vrot.lane.b32.xlu0 %v1736_v16, %s4095_s24 }
 0x466   : > { %1807 = vrot.lane.b32.xlu1 %v1740_v11, %s4098_s7  ;;  %1805 = vrot.lane.b32.xlu0 %v1736_v16, %s4098_s7 }
 0x46a   : > { %1847 = vrot.lane.b32.xlu1 %v1740_v11, %s4099_s13  ;;  %1845 = vrot.lane.b32.xlu0 %v1736_v16, %s4099_s13 }
 0x46e   : > { %1895 = vrot.lane.b32.xlu1 %v1740_v11, %s4101_s16  ;;  %1893 = vrot.lane.b32.xlu0 %v1736_v16, %s4101_s16 }
 0x472   : > { %1761 = vrot.lane.b32.xlu1 %v1740_v11, %s4096_s28  ;;  %1759 = vrot.lane.b32.xlu0 %v1736_v16, %s4096_s28 }
 0x476   : > { %1921 = vrot.lane.b32.xlu1 %v1740_v11, %s4102_s29  ;;  %1919 = vrot.lane.b32.xlu0 %v1736_v16, %s4102_s29 }
 0x4cc   : > { %v1786_v44 = vpop.permute.xlu1 %1785  ;;  %v1784_v12 = vpop.permute.xlu0 %1783 }
 0x4cd   : > { %v1787_v35 = vsel %vm7111_vm5, %v1784_v12, %v1786_v44  ;;  %v1788_v3 = vsel %vm7112_vm1, %v1786_v44, %v1784_v12  ;;  %vm7116_vm5 = vcmp.lt.s32.totalorder %v4486_v19, 17 }
 0x4ce   : > { %v1789_v34 = vmul.f32 %v1788_v3, %v4614_v55  ;;  %v1790_v25 = vmul.f32 %v1787_v35, %v4611_v54  ;;  %vm7117_vm1 = vmmov %vm7116_vm5 }
 0x4d0   : > { %v1791_v30 = vpack.c.bf16 %v1789_v34, %v1789_v34  ;;  %v1792_v59 = vpack.c.bf16 %v1790_v25, %v1790_v25  ;;  %v1874_v45 = vpop.permute.xlu1 %1873  ;;  %v1872_v21 = vpop.permute.xlu0 %1871 }
 0x4d1   : > { %v1875_v43 = vsel %vm7113_vm14, %v1872_v21, %v1874_v45  ;;  %v1876_v50 = vsel %vm7114_vm8, %v1874_v45, %v1872_v21  ;;  %vm7119_vm14 = vcmp.lt.s32.totalorder %v4486_v19, 1 }
 0x4d2   : > { %v1795_v9 = vrot.slane %v1791_v30, 7  ;;  %v1796_v53 = vrot.slane %v1792_v59, 7  ;;  %v1877_v60 = vmul.f32 %v1875_v43, %v4738_v63  ;;  %v1878_v61 = vmul.f32 %v1876_v50, %v4735_v62  ;;  %vm7120_vm8 = vmmov %vm7119_vm14 }
 0x4d4   : > { %v1800_v17 = vsel %vm4805_vm15, %v1795_v9, %v1799_v20  ;;  %v1803_v48 = vsel %vm4805_vm15, %v1796_v53, %v1802_v46  ;;  %v1879_v47 = vpack.c.bf16 %v1877_v60, %v1877_v60  ;;  %v1880_v31 = vpack.c.bf16 %v1878_v61, %v1878_v61  ;;  %v1746_v29 = vpop.permute.xlu1 %1745  ;;  %v1744_v1 = vpop.permute.xlu0 %1743 }
 0x4d5   : > { %1801 = vst [vmem:[#allocation2 + $0x120] sm:$0x2] %v1800_v17  ;;  %1804 = vst [vmem:[#allocation2 + $0x128] sm:$0x2] %v1803_v48  ;;  %v1747_v57 = vsel %vm7116_vm5, %v1744_v1, %v1746_v29  ;;  %v1748_v2 = vsel %vm7117_vm1, %v1746_v29, %v1744_v1  ;;  %vm7128_vm5 = vcmp.lt.s32.totalorder %v4486_v19, 111 }
 0x4d6   : > { %v1883_v39 = vrot.slane %v1879_v47, 5  ;;  %v1884_v15 = vrot.slane %v1880_v31, 5  ;;  %v1749_v6 = vmul.f32 %v1748_v2, %v4500_v24  ;;  %v1750_v7 = vmul.f32 %v1747_v57, %v4497_v23  ;;  %vm7129_vm1 = vmmov %vm7128_vm5 }
 0x4d8   : > { %v1888_v11 = vsel %vm4821_vm11, %v1883_v39, %v1887_v4  ;;  %v1891_v38 = vsel %vm4821_vm11, %v1884_v15, %v1890_v49  ;;  %v1751_v10 = vpack.c.bf16 %v1749_v6, %v1749_v6  ;;  %v1752_v27 = vpack.c.bf16 %v1750_v7, %v1750_v7  ;;  %v1808_v22 = vpop.permute.xlu1 %1807  ;;  %v1806_v13 = vpop.permute.xlu0 %1805  ;;  %v7123_v7 = vld [vmem:[#allocation22_spill] sm:$0xff]  ;;  %v7124_v49 = vld [vmem:[#allocation21_spill] sm:$0xff] }
 0x4d9   : > { %1889 = vst [vmem:[#allocation2 + $0x120] sm:$0x8] %v1888_v11  ;;  %1892 = vst [vmem:[#allocation2 + $0x128] sm:$0x8] %v1891_v38  ;;  %v1809_v37 = vsel %vm7119_vm14, %v1806_v13, %v1808_v22  ;;  %v1810_v14 = vsel %vm7120_vm8, %v1808_v22, %v1806_v13  ;;  %v1868_v13 = vld [vmem:[#allocation2 + $0x128] sm:$0x4] }
 0x4da   : > { %v1754_v44 = vsel %vm4836_vm6, %v1751_v10, %v1753_v42  ;;  %v1757_v12 = vsel %vm4836_vm6, %v1752_v27, %v1756_v58  ;;  %v1811_v35 = vmul.f32 %v1810_v14, %v4662_v41  ;;  %v1812_v3 = vmul.f32 %v1809_v37, %v4659_v40  ;;  %v1865_v42 = vld [vmem:[#allocation2 + $0x120] sm:$0x4] }
 0x4db   : > { %1755 = vst [vmem:[#allocation2 + $0x120] sm:$0x1] %v1754_v44  ;;  %1758 = vst [vmem:[#allocation2 + $0x128] sm:$0x1] %v1757_v12  ;;  %vm7135_vm14 = vcmask 392192  }
 0x4dc   : > { %v1813_v34 = vpack.c.bf16 %v1811_v35, %v1811_v35  ;;  %v1814_v25 = vpack.c.bf16 %v1812_v3, %v1812_v3  ;;  %v1848_v30 = vpop.permute.xlu1 %1847  ;;  %v1846_v59 = vpop.permute.xlu0 %1845  ;;  %v1825_v47 = vld [vmem:[#allocation2 + $0x120] sm:$0x2]  ;;  %v1828_v31 = vld [vmem:[#allocation2 + $0x128] sm:$0x2]  ;;  %vm7136_vm8 = vmmov %vm7135_vm14 }
 0x4dd   : > { %v1849_v45 = vsel %vm571_vm10, %v1846_v59, %v1848_v30  ;;  %v1850_v21 = vsel %vm571_vm10, %v1848_v30, %v1846_v59  ;;  %v7127_v30 = vld [vmem:[#allocation19_spill] sm:$0xff] }
 0x4de   : > { %v1816_v43 = vshll.u32 %v1813_v34, 16  ;;  %v1820_v50 = vshll.u32 %v1814_v25, 16  ;;  %v1851_v9 = vmul.f32 %v1849_v45, %v4700_v33  ;;  %v1852_v53 = vmul.f32 %v1850_v21, %v4695_v32  ;;  %v7126_v34 = vld [vmem:[#allocation20_spill] sm:$0xff] }
 0x4e0   : > { %v1818_v60 = vrot.slane %v1816_v43, 7  ;;  %v1822_v61 = vrot.slane %v1820_v50, 7  ;;  %v1853_v20 = vpack.c.bf16 %v1851_v9, %v1851_v9  ;;  %v1854_v46 = vpack.c.bf16 %v1852_v53, %v1852_v53  ;;  %v1896_v17 = vpop.permute.xlu1 %1895  ;;  %v1894_v48 = vpop.permute.xlu0 %1893 }
 0x4e1   : > { %v1897_v29 = vsel %vm675_vm12, %v1894_v48, %v1896_v17  ;;  %v1898_v1 = vsel %vm675_vm12, %v1896_v17, %v1894_v48  ;;  %v1913_v17 = vld [vmem:[#allocation2 + $0x120] sm:$0x8]  ;;  %v1916_v48 = vld [vmem:[#allocation2 + $0x128] sm:$0x8] }
 0x4e2   : > { %v1826_v2 = vsel %vm4881_vm9, %v1818_v60, %v1825_v47  ;;  %v1829_v39 = vsel %vm4881_vm9, %v1822_v61, %v1828_v31  ;;  %v1856_v15 = vshll.u32 %v1853_v20, 16  ;;  %v1860_v6 = vshll.u32 %v1854_v46, 16 }
 0x4e3   : > { %1827 = vst [vmem:[#allocation2 + $0x120] sm:$0x2] %v1826_v2  ;;  %1830 = vst [vmem:[#allocation2 + $0x128] sm:$0x2] %v1829_v39  ;;  %v1899_v4 = vmul.f32 %v1897_v29, %v7123_v7  ;;  %v1900_v11 = vmul.f32 %v1898_v1, %v7124_v49 }
 0x4e4   : > { %v1858_v38 = vrot.slane %v1856_v15, 6  ;;  %v1862_v10 = vrot.slane %v1860_v6, 6  ;;  %v1762_v27 = vpop.permute.xlu1 %1761  ;;  %v1760_v22 = vpop.permute.xlu0 %1759  ;;  %v1777_v6 = vld [vmem:[#allocation2 + $0x120] sm:$0x1] }
 0x4e5   : > { %v1901_v58 = vpack.c.bf16 %v1899_v4, %v1899_v4  ;;  %v1902_v37 = vpack.c.bf16 %v1900_v11, %v1900_v11  ;;  %v1763_v14 = vsel %vm407_vm4, %v1760_v22, %v1762_v27  ;;  %v1764_v44 = vsel %vm407_vm4, %v1762_v27, %v1760_v22  ;;  %v1780_v4 = vld [vmem:[#allocation2 + $0x128] sm:$0x1] }
 0x4e6   : > { %v1866_v35 = vsel %vm4895_vm13, %v1858_v38, %v1865_v42  ;;  %v1869_v3 = vsel %vm4895_vm13, %v1862_v10, %v1868_v13  ;;  %v1765_v25 = vmul.f32 %v1764_v44, %v7126_v34  ;;  %v1766_v59 = vmul.f32 %v1763_v14, %v7127_v30 }
 0x4e7   : > { %1867 = vst [vmem:[#allocation2 + $0x120] sm:$0x4] %v1866_v35  ;;  %1870 = vst [vmem:[#allocation2 + $0x128] sm:$0x4] %v1869_v3  ;;  %v1904_v45 = vshll.u32 %v1901_v58, 16  ;;  %v1908_v21 = vshll.u32 %v1902_v37, 16 }
 0x4e8   : > { %v1767_v43 = vpack.c.bf16 %v1765_v25, %v1765_v25  ;;  %v1768_v50 = vpack.c.bf16 %v1766_v59, %v1766_v59  ;;  %v1922_v9 = vpop.permute.xlu1 %1921  ;;  %v1920_v53 = vpop.permute.xlu0 %1919  ;;  %v1935_v58 = vld [vmem:[#allocation2 + $0x120] sm:$0x10]  ;;  %v1938_v37 = vld [vmem:[#allocation2 + $0x128] sm:$0x10] }
 0x4e9   : > { %v1906_v60 = vrot.slane %v1904_v45, 5  ;;  %v1910_v61 = vrot.slane %v1908_v21, 5  ;;  %v1923_v20 = vsel %vm7128_vm5, %v1920_v53, %v1922_v9  ;;  %v1924_v46 = vsel %vm7129_vm1, %v1922_v9, %v1920_v53  ;;  %v3902_v59 = vld [vmem:[#allocation8 + $0x38] ss:$12 sps:$4 sm:$0xff]   ;;  %v3903_v45 = vld [vmem:[#allocation8 + $0x50] ss:$12 sps:$4 sm:$0xff]  }
 0x4ea   : > { %v1770_v47 = vshll.u32 %v1767_v43, 16  ;;  %v1773_v31 = vshll.u32 %v1768_v50, 16  ;;  %v1925_v29 = vmul.f32 %v1923_v20, %v7094_v8  ;;  %v1926_v1 = vmul.f32 %v1924_v46, %v4846_v36  ;;  %v7137_v53 = vld [vmem:[#allocation35_spill] sm:$0xff]  ;;  %v7139_v46 = vld [vmem:[#allocation36_spill] sm:$0xff] }
 0x4eb   : > { %v1914_v39 = vsel %vm4906_vm0, %v1906_v60, %v1913_v17  ;;  %v1917_v15 = vsel %vm4906_vm0, %v1910_v61, %v1916_v48  ;;  %vm7154_vm5 = vcmp.lt.s32.totalorder %v4486_v19, 17 }
 0x4ec   : > { %1915 = vst [vmem:[#allocation2 + $0x120] sm:$0x8] %v1914_v39  ;;  %1918 = vst [vmem:[#allocation2 + $0x128] sm:$0x8] %v1917_v15  ;;  %v1778_v38 = vsel %vm4933_vm2, %v1770_v47, %v1777_v6  ;;  %v1781_v10 = vsel %vm4933_vm2, %v1773_v31, %v1780_v4  ;;  %v1927_v27 = vpack.c.bf16 %v1925_v29, %v1925_v29  ;;  %v7141_v15 = vld [vmem:[#allocation37_spill] sm:$0xff]  ;;  %v7143_v4 = vld [vmem:[#allocation38_spill] sm:$0xff] }
 0x4ed   : > { %v1928_v22 = vpack.c.bf16 %v1926_v1, %v1926_v1  ;;  %1779 = vst [vmem:[#allocation2 + $0x120] sm:$0x1] %v1778_v38  ;;  %1782 = vst [vmem:[#allocation2 + $0x128] sm:$0x1] %v1781_v10 }
 0x4ee   : > { %v1931_v13 = vrot.slane %v1927_v27, 4  ;;  %vm7155_vm1 = vmmov %vm7154_vm5 }
 0x4ef   : > { %v1932_v42 = vrot.slane %v1928_v22, 4  ;;  %v7145_v22 = vld [vmem:[#allocation39_spill] sm:$0xff] }
 0x4f0   : > { %v1936_v44 = vsel %vm4949_vm7, %v1931_v13, %v1935_v58 }
 0x4f1   : > { %v1939_v35 = vsel %vm4949_vm7, %v1932_v42, %v1938_v37  ;;  %1937 = vst [vmem:[#allocation2 + $0x120] sm:$0x10] %v1936_v44  ;;  %v7147_v42 = vld [vmem:[#allocation40_spill] sm:$0xff] }
 0x4f2   : > { %1940 = vst [vmem:[#allocation2 + $0x128] sm:$0x10] %v1939_v35  ;;  %v7149_v35 = vld [vmem:[#allocation41_spill] sm:$0xff] }
 0x4f8   : > { %v5659_v25 = vld [vmem:[#allocation2 + $0x120] sm:$0xff] }
 0x4f9   : > { %v5657_v3 = vld [vmem:[#allocation2 + $0x128] sm:$0xff]  ;;  %7134 = vst [vmem:[#allocation33_spill] sm:$0xff] %v5659_v25 }
 0x4fa   : > { %7133 = vst [vmem:[#allocation34_spill] sm:$0xff] %v5657_v3  ;;  %2081 = vmatprep.subr.bf16.mxu1 %v5657_v3 }
 0x4fb   : > { %2082 = vmatpush1.bf16.msra.mxu1 %v5659_v25 }
 0x4fe   : > { %3752 = vmatmul.mubr.msk.bf16.vlgmr.msra.gmra.mrb[4].mxu1 %vm7135_vm14, %v3902_v59  ;;  %vm7156_vm14 = vmmov %vm7155_vm1 }
 0x4ff   : > { %2119 = vmatprep.mubr.bf16.mxu1 %v7100_v0 }
 0x506   : > { %3753 = vmatmul.mubr.msk.bf16.gmra.mrb[8].mxu1 %vm7136_vm8, %v3903_v45  ;;  %v7151_v45 = vld [vmem:[#allocation42_spill] sm:$0xff]  ;;  %vm7157_vm8 = vmmov %vm7155_vm1 }
 0x5d1   : > { %v2111_v21 = vpop.f32.mrb[4].mxu1 }
 0x5d2   : > { %v2130_v43 = vmax.f32 %v2111_v21, 0.0  ;;  %v2113_v50 = vpop.f32.mrb[5].mxu1 }
 0x5d3   : > { %v2115_v9 = vpop.f32.mrb[6].mxu1  ;;  %v2131_v1 = vmax.f32 %v2113_v50, 0.0 }
 0x5d4   : > { %v5667_v60 = vadd.f32 %v2130_v43, %v7137_v53  ;;  %v2132_v61 = vmax.f32 %v2115_v9, 0.0  ;;  %v2117_v20 = vpop.f32.mrb[7].mxu1  ;;  %v5803_v43 = vld.sshfl [vmem:[%s6897_s4 + $0x3] sm:$0x13 pattern:$0x75316420] }
 0x5d5   : > { %v2133_v39 = vmax.f32 %v2117_v20, 0.0  ;;  %v5691_v6 = vadd.f32 %v2131_v1, %v7141_v15  ;;  %7153 = vst [vmem:[#allocation40_spill] sm:$0xff] %v5803_v43  ;;  %v2522_v50 = vcombine.high %v5803_v43, %v5803_v43 }
 0x5d6   : > { %7138 = vst [vmem:[#allocation46_spill] sm:$0xff] %v5667_v60  ;;  %v5670_v17 = vadd.f32 %v2132_v61, %v7139_v46  ;;  %2146 = vrot.lane.b32.xlu0 %v5667_v60, %s4095_s24 }
 0x5d7   : > { %7142 = vst [vmem:[#allocation17_spill] sm:$0xff] %v5691_v6  ;;  %v5696_v38 = vadd.f32 %v2133_v39, %v7143_v4  ;;  %v2536_v9 = vrot.slane %v2522_v50, %v7095_v26 }
 0x5d8   : > { %7140 = vst [vmem:[#allocation45_spill] sm:$0xff] %v5670_v17  ;;  %2148 = vrot.lane.b32.xlu1 %v5670_v17, %s4095_s24 }
 0x5d9   : > { %v2121_v48 = vpop.f32.mrb[8].mxu1  ;;  %7144 = vst [vmem:[#allocation35_spill] sm:$0xff] %v5696_v38  ;;  %2575 = vmatprep.mubr.bf16.mxu0 %v2536_v9 }
 0x5da   : > { %2186 = vrot.lane.b32.xlu0 %v5667_v60, %s4096_s28  ;;  %v2123_v47 = vpop.f32.mrb[9].mxu1  ;;  %v2134_v10 = vmax.f32 %v2121_v48, 0.0 }
 0x5db   : > { %v2125_v31 = vpop.f32.mrb[10].mxu1  ;;  %v2135_v37 = vmax.f32 %v2123_v47, 0.0 }
 0x5dc   : > { %2188 = vrot.lane.b32.xlu1 %v5670_v17, %s4096_s28  ;;  %v2127_v29 = vpop.f32.mrb[11].mxu1  ;;  %v2136_v27 = vmax.f32 %v2125_v31, 0.0  ;;  %v5717_v13 = vadd.f32 %v2134_v10, %v7145_v22 }
 0x5dd   : > { %v2137_v44 = vmax.f32 %v2127_v29, 0.0  ;;  %v5743_v59 = vadd.f32 %v2135_v37, %v7149_v35 }
 0x5de   : > { %2226 = vrot.lane.b32.xlu0 %v5667_v60, %s4097_s10  ;;  %7146 = vst [vmem:[#allocation36_spill] sm:$0xff] %v5717_v13  ;;  %v5722_v58 = vadd.f32 %v2136_v27, %v7147_v42 }
 0x5df   : > { %7150 = vst [vmem:[#allocation38_spill] sm:$0xff] %v5743_v59  ;;  %v5748_v21 = vadd.f32 %v2137_v44, %v7151_v45 }
 0x5e0   : > { %2228 = vrot.lane.b32.xlu1 %v5670_v17, %s4097_s10  ;;  %7148 = vst [vmem:[#allocation37_spill] sm:$0xff] %v5722_v58 }
 0x5e1   : > { %7152 = vst [vmem:[#allocation39_spill] sm:$0xff] %v5748_v21 }
 0x5e2   : > { %2266 = vrot.lane.b32.xlu0 %v5667_v60, %s4098_s7 }
 0x5e4   : > { %2268 = vrot.lane.b32.xlu1 %v5670_v17, %s4098_s7 }
 0x5e6   : > { %2314 = vrot.lane.b32.xlu0 %v5667_v60, %s4099_s13 }
 0x5e8   : > { %2316 = vrot.lane.b32.xlu1 %v5670_v17, %s4099_s13 }
 0x5ea   : > { %2154 = vrot.lane.b32.xlu0 %v5691_v6, %s4095_s24 }
 0x5ec   : > { %2156 = vrot.lane.b32.xlu1 %v5696_v38, %s4095_s24 }
 0x5ee   : > { %2194 = vrot.lane.b32.xlu0 %v5691_v6, %s4096_s28 }
 0x5f0   : > { %2196 = vrot.lane.b32.xlu1 %v5696_v38, %s4096_s28 }
 0x5f2   : > { %2234 = vrot.lane.b32.xlu0 %v5691_v6, %s4097_s10 }
 0x5f4   : > { %2236 = vrot.lane.b32.xlu1 %v5696_v38, %s4097_s10 }
 0x5f6   : > { %2274 = vrot.lane.b32.xlu0 %v5691_v6, %s4098_s7 }
 0x5f8   : > { %2276 = vrot.lane.b32.xlu1 %v5696_v38, %s4098_s7 }
 0x5fa   : > { %2322 = vrot.lane.b32.xlu0 %v5691_v6, %s4099_s13 }
 0x5fc   : > { %2324 = vrot.lane.b32.xlu1 %v5696_v38, %s4099_s13 }
 0x5fe   : > { %2150 = vrot.lane.b32.xlu0 %v5717_v13, %s4095_s24 }
 0x600   : > { %2152 = vrot.lane.b32.xlu1 %v5722_v58, %s4095_s24 }
 0x602   : > { %2190 = vrot.lane.b32.xlu0 %v5717_v13, %s4096_s28 }
 0x604   : > { %2192 = vrot.lane.b32.xlu1 %v5722_v58, %s4096_s28 }
 0x606   : > { %2230 = vrot.lane.b32.xlu0 %v5717_v13, %s4097_s10 }
 0x608   : > { %2232 = vrot.lane.b32.xlu1 %v5722_v58, %s4097_s10 }
 0x60a   : > { %2270 = vrot.lane.b32.xlu0 %v5717_v13, %s4098_s7 }
 0x60c   : > { %2272 = vrot.lane.b32.xlu1 %v5722_v58, %s4098_s7 }
 0x60e   : > { %2318 = vrot.lane.b32.xlu0 %v5717_v13, %s4099_s13 }
 0x610   : > { %2320 = vrot.lane.b32.xlu1 %v5722_v58, %s4099_s13 }
 0x612   : > { %2158 = vrot.lane.b32.xlu0 %v5743_v59, %s4095_s24 }
 0x614   : > { %2160 = vrot.lane.b32.xlu1 %v5748_v21, %s4095_s24 }
 0x616   : > { %2354 = vrot.lane.b32.xlu0 %v5667_v60, %s4100_s15 }
 0x618   : > { %2356 = vrot.lane.b32.xlu1 %v5670_v17, %s4100_s15 }
 0x61a   : > { %2198 = vrot.lane.b32.xlu0 %v5743_v59, %s4096_s28 }
 0x61c   : > { %2200 = vrot.lane.b32.xlu1 %v5748_v21, %s4096_s28 }
 0x61e   : > { %2238 = vrot.lane.b32.xlu0 %v5743_v59, %s4097_s10 }
 0x620   : > { %2364 = vrot.lane.b32.xlu1 %v5696_v38, %s4100_s15 }
 0x622   : > { %2278 = vrot.lane.b32.xlu0 %v5743_v59, %s4098_s7 }
 0x624   : > { %2240 = vrot.lane.b32.xlu1 %v5748_v21, %s4097_s10 }
 0x626   : > { %2326 = vrot.lane.b32.xlu0 %v5743_v59, %s4099_s13 }
 0x628   : > { %2360 = vrot.lane.b32.xlu1 %v5722_v58, %s4100_s15 }
 0x62a   : > { %2362 = vrot.lane.b32.xlu0 %v5691_v6, %s4100_s15 }
 0x62c   : > { %2280 = vrot.lane.b32.xlu1 %v5748_v21, %s4098_s7 }
 0x62e   : > { %2358 = vrot.lane.b32.xlu0 %v5717_v13, %s4100_s15 }
 0x630   : > { %2396 = vrot.lane.b32.xlu1 %v5670_v17, %s4101_s16 }
 0x632   : > { %2366 = vrot.lane.b32.xlu0 %v5743_v59, %s4100_s15 }
 0x634   : > { %2404 = vrot.lane.b32.xlu1 %v5696_v38, %s4101_s16 }
 0x636   : > { %2394 = vrot.lane.b32.xlu0 %v5667_v60, %s4101_s16 }
 0x638   : > { %2400 = vrot.lane.b32.xlu1 %v5722_v58, %s4101_s16 }
 0x63a   : > { %2402 = vrot.lane.b32.xlu0 %v5691_v6, %s4101_s16 }
 0x63c   : > { %2328 = vrot.lane.b32.xlu1 %v5748_v21, %s4099_s13 }
 0x63e   : > { %2398 = vrot.lane.b32.xlu0 %v5717_v13, %s4101_s16 }
 0x640   : > { %2436 = vrot.lane.b32.xlu1 %v5670_v17, %s4102_s29 }
 0x642   : > { %2406 = vrot.lane.b32.xlu0 %v5743_v59, %s4101_s16 }
 0x644   : > { %2368 = vrot.lane.b32.xlu1 %v5748_v21, %s4100_s15 }
 0x646   : > { %2434 = vrot.lane.b32.xlu0 %v5667_v60, %s4102_s29 }
 0x648   : > { %v2147_v53 = vpop.permute.xlu0 %2146  ;;  %2444 = vrot.lane.b32.xlu1 %v5696_v38, %s4102_s29 }
 0x64a   : > { %v2149_v61 = vpop.permute.xlu1 %2148  ;;  %2442 = vrot.lane.b32.xlu0 %v5691_v6, %s4102_s29 }
 0x64c   : > { %v2187_v20 = vpop.permute.xlu0 %2186  ;;  %2408 = vrot.lane.b32.xlu1 %v5748_v21, %s4101_s16 }
 0x64e   : > { %v2189_v46 = vpop.permute.xlu1 %2188  ;;  %2438 = vrot.lane.b32.xlu0 %v5717_v13, %s4102_s29 }
 0x650   : > { %v5820_v48 = vpop.permute.xlu0 %2226  ;;  %2440 = vrot.lane.b32.xlu1 %v5722_v58, %s4102_s29 }
 0x652   : > { %v5824_v47 = vpop.permute.xlu1 %2228  ;;  %2446 = vrot.lane.b32.xlu0 %v5743_v59, %s4102_s29 }
 0x654   : > { %v5828_v31 = vpop.permute.xlu0 %2266  ;;  %2448 = vrot.lane.b32.xlu1 %v5748_v21, %s4102_s29 }
 0x656   : > { %v5832_v29 = vpop.permute.xlu1 %2268 }
 0x658   : > { %v5834_v1 = vpop.permute.xlu0 %2314 }
 0x65a   : > { %v5836_v39 = vpop.permute.xlu1 %2316 }
 0x65c   : > { %v2155_v15 = vpop.permute.xlu0 %2154 }
 0x65d   : > { %v2162_v4 = vsel %vm7154_vm5, %v2147_v53, %v2155_v15  ;;  %v2166_v10 = vsel %vm7155_vm1, %v2155_v15, %v2147_v53  ;;  %vm7160_vm5 = vmmov %vm7155_vm1 }
 0x65e   : > { %v2157_v27 = vpop.permute.xlu1 %2156  ;;  %v2170_v37 = vmul.f32 %v2166_v10, %v4500_v24  ;;  %v2171_v44 = vmul.f32 %v2162_v4, %v4497_v23 }
 0x65f   : > { %v2163_v22 = vsel %vm7156_vm14, %v2149_v61, %v2157_v27  ;;  %v2167_v42 = vsel %vm7157_vm8, %v2157_v27, %v2149_v61  ;;  %vm7161_vm14 = vmmov %vm7155_vm1 }
 0x660   : > { %v2172_v35 = vmul.f32 %v2167_v42, %v4500_v24  ;;  %v2173_v45 = vmul.f32 %v2163_v22, %v4497_v23  ;;  %v2195_v50 = vpop.permute.xlu0 %2194  ;;  %vm7162_vm8 = vmmov %vm7155_vm1 }
 0x661   : > { %v2202_v5 = vsel %vm407_vm4, %v2187_v20, %v2195_v50 }
 0x662   : > { %v5850_v9 = vpack.c.bf16 %v2172_v35, %v2170_v37  ;;  %v5852_v14 = vpack.c.bf16 %v2173_v45, %v2171_v44  ;;  %v2197_v53 = vpop.permute.xlu1 %2196 }
 0x663   : > { %v2203_v16 = vsel %vm407_vm4, %v2189_v46, %v2197_v53 }
 0x664   : > { %7158 = vst [vmem:[#allocation41_spill] sm:$0xff] %v5850_v9  ;;  %7159 = vst [vmem:[#allocation42_spill] sm:$0xff] %v5852_v14  ;;  %v2235_v15 = vpop.permute.xlu0 %2234  ;;  %2543 = vmatprep.subr.bf16.mxu0 %v5852_v14  ;;  %v2213_v14 = vmul.f32 %v2203_v16, %v7127_v30  ;;  %v2211_v16 = vmul.f32 %v2202_v5, %v7127_v30 }
 0x665   : > { %2544 = vmatpush1.bf16.msra.mxu0 %v5850_v9  ;;  %v2207_v9 = vsel %vm407_vm4, %v2197_v53, %v2189_v46  ;;  %v2206_v46 = vsel %vm407_vm4, %v2195_v50, %v2187_v20 }
 0x666   : > { %v2237_v61 = vpop.permute.xlu1 %2236  ;;  %v2212_v53 = vmul.f32 %v2207_v9, %v7126_v34 }
 0x668   : > { %v5856_v27 = vpop.permute.xlu0 %2274 }
 0x66a   : > { %v5858_v10 = vpop.permute.xlu1 %2276 }
 0x66c   : > { %v5860_v4 = vpop.permute.xlu0 %2322 }
 0x66e   : > { %v5862_v42 = vpop.permute.xlu1 %2324 }
 0x670   : > { %v2151_v22 = vpop.permute.xlu0 %2150 }
 0x672   : > { %v2153_v37 = vpop.permute.xlu1 %2152 }
 0x674   : > { %v2191_v35 = vpop.permute.xlu0 %2190 }
 0x676   : > { %v2193_v44 = vpop.permute.xlu1 %2192 }
 0x678   : > { %v2231_v45 = vpop.permute.xlu0 %2230 }
 0x67a   : > { %v5864_v11 = vpop.permute.xlu1 %2232 }
 0x67c   : > { %v5866_v2 = vpop.permute.xlu0 %2270 }
 0x67e   : > { %v5868_v12 = vpop.permute.xlu1 %2272 }
 0x680   : > { %v5870_v57 = vpop.permute.xlu0 %2318 }
 0x682   : > { %v5872_v56 = vpop.permute.xlu1 %2320 }
 0x684   : > { %v2159_v28 = vpop.permute.xlu0 %2158 }
 0x685   : > { %v2164_v52 = vsel %vm7160_vm5, %v2151_v22, %v2159_v28  ;;  %v2168_v18 = vsel %vm7155_vm1, %v2159_v28, %v2151_v22  ;;  %vm7163_vm5 = vcmp.lt.s32.totalorder %v4486_v19, 15 }
 0x686   : > { %v2161_v51 = vpop.permute.xlu1 %2160  ;;  %v2174_v0 = vmul.f32 %v2168_v18, %v4500_v24  ;;  %v2175_v43 = vmul.f32 %v2164_v52, %v4497_v23  ;;  %v2210_v52 = vmul.f32 %v2206_v46, %v7126_v34  ;;  %vm7164_vm1 = vmmov %vm7163_vm5 }
 0x687   : > { %v2165_v25 = vsel %vm7161_vm14, %v2153_v37, %v2161_v51  ;;  %v2169_v3 = vsel %vm7162_vm8, %v2161_v51, %v2153_v37  ;;  %vm7165_vm14 = vmmov %vm7164_vm1 }
 0x688   : > { %v2176_v28 = vmul.f32 %v2169_v3, %v4500_v24  ;;  %v2177_v22 = vmul.f32 %v2165_v25, %v4497_v23  ;;  %v5893_v26 = vpop.permute.xlu0 %2354  ;;  %v5906_v3 = vpack.c.bf16 %v2213_v14, %v2211_v16  ;;  %v2243_v25 = vsel %vm7163_vm5, %v5824_v47, %v2237_v61  ;;  %vm7166_vm8 = vmmov %vm7164_vm1 }
 0x689   : > { %v2242_v14 = vsel %vm7164_vm1, %v5820_v48, %v2235_v15  ;;  %v2247_v50 = vsel %vm7165_vm14, %v2237_v61, %v5824_v47  ;;  %v2253_v9 = vmul.f32 %v2243_v25, %v4611_v54  ;;  %v2246_v47 = vsel %vm7166_vm8, %v2235_v15, %v5820_v48  ;;  %vm7168_vm14 = vmmov %vm7164_vm1 }
 0x68a   : > { %v5899_v8 = vpack.c.bf16 %v2176_v28, %v2174_v0  ;;  %v5901_v51 = vpack.c.bf16 %v2177_v22, %v2175_v43  ;;  %v5903_v18 = vpop.permute.xlu1 %2356  ;;  %v5917_v43 = vpack.c.bf16 %v2212_v53, %v2210_v52  ;;  %v2251_v61 = vmul.f32 %v2242_v14, %v4611_v54 }
 0x68b   : > { %v2252_v25 = vmul.f32 %v2247_v50, %v4614_v55  ;;  %vm7167_vm5 = vcmp.lt.s32.totalorder %v4486_v19, 1 }
 0x68c   : > { %v2199_v37 = vpop.permute.xlu0 %2198  ;;  %2545 = vmatprep.subr.bf16.mxu0 %v5901_v51  ;;  %v2283_v48 = vsel %vm7167_vm5, %v5832_v29, %v5858_v10  ;;  %vm7169_vm8 = vmmov %vm7167_vm5 }
 0x68d   : > { %v2204_v5 = vsel %vm407_vm4, %v2191_v35, %v2199_v37  ;;  %v2208_v0 = vsel %vm407_vm4, %v2199_v37, %v2191_v35  ;;  %2546 = vmatpush1.bf16.msra.mxu0 %v5899_v8 }
 0x68e   : > { %v2201_v20 = vpop.permute.xlu1 %2200  ;;  %2547 = vmatprep.subr.bf16.mxu0 %v5906_v3  ;;  %v2214_v22 = vmul.f32 %v2208_v0, %v7126_v34  ;;  %v2215_v46 = vmul.f32 %v2204_v5, %v7127_v30  ;;  %v2250_v0 = vmul.f32 %v2246_v47, %v4614_v55 }
 0x68f   : > { %v2205_v35 = vsel %vm407_vm4, %v2193_v44, %v2201_v20  ;;  %v2209_v28 = vsel %vm407_vm4, %v2201_v20, %v2193_v44  ;;  %v5948_v20 = vpack.c.bf16 %v2253_v9, %v2251_v61  ;;  %v2282_v9 = vsel %vm7169_vm8, %v5828_v31, %v5856_v27  ;;  %vm7171_vm8 = vmmov %vm7167_vm5 }
 0x690   : > { %v2216_v16 = vmul.f32 %v2209_v28, %v7126_v34  ;;  %v2217_v53 = vmul.f32 %v2205_v35, %v7127_v30  ;;  %v2239_v52 = vpop.permute.xlu0 %2238  ;;  %v5960_v35 = vpack.c.bf16 %v2252_v25, %v2250_v0  ;;  %v7186_v30 = vld [vmem:[#allocation27_spill] sm:$0xff]  ;;  %v7188_v34 = vld [vmem:[#allocation40_spill] sm:$0xff] }
 0x691   : > { %2548 = vmatpush1.bf16.msra.mxu0 %v5917_v43  ;;  %v2244_v14 = vsel %vm7164_vm1, %v2231_v45, %v2239_v52  ;;  %v2248_v50 = vsel %vm7168_vm14, %v2239_v52, %v2231_v45  ;;  %vm7170_vm14 = vmmov %vm7164_vm1 }
 0x692   : > { %v5941_v44 = vpack.c.bf16 %v2216_v16, %v2214_v22  ;;  %v5943_v37 = vpack.c.bf16 %v2217_v53, %v2215_v46  ;;  %v5945_v5 = vpop.permute.xlu1 %2364  ;;  %v2287_v22 = vsel %vm7167_vm5, %v5858_v10, %v5832_v29  ;;  %v2293_v46 = vmul.f32 %v2283_v48, %v4659_v40 }
 0x693   : > { %v2254_v53 = vmul.f32 %v2248_v50, %v4614_v55  ;;  %v2255_v52 = vmul.f32 %v2244_v14, %v4611_v54  ;;  %v2286_v29 = vsel %vm7171_vm8, %v5856_v27, %v5828_v31  ;;  %v2291_v10 = vmul.f32 %v2282_v9, %v4659_v40 }
 0x694   : > { %v2279_v15 = vpop.permute.xlu0 %2278  ;;  %2549 = vmatprep.subr.bf16.mxu0 %v5943_v37  ;;  %v2292_v14 = vmul.f32 %v2287_v22, %v4662_v41 }
 0x695   : > { %2550 = vmatpush1.bf16.msra.mxu0 %v5941_v44  ;;  %v5995_v50 = vpack.c.bf16 %v2293_v46, %v2291_v10  ;;  %v2284_v31 = vsel %vm7167_vm5, %v5866_v2, %v2279_v15 }
 0x696   : > { %v2241_v28 = vpop.permute.xlu1 %2240  ;;  %2551 = vmatprep.subr.bf16.mxu0 %v5948_v20 }
 0x697   : > { %v2245_v45 = vsel %vm7164_vm1, %v5864_v11, %v2241_v28  ;;  %v2249_v16 = vsel %vm7170_vm14, %v2241_v28, %v5864_v11  ;;  %vm7172_vm1 = vmmov %vm7167_vm5  ;;  %vm7175_vm5 = vcmp.lt.s32.totalorder %v4486_v19, 113 }
 0x698   : > { %v2256_v47 = vmul.f32 %v2249_v16, %v4614_v55  ;;  %v2257_v61 = vmul.f32 %v2245_v45, %v4611_v54  ;;  %v2327_v25 = vpop.permute.xlu0 %2326  ;;  %v2290_v45 = vmul.f32 %v2286_v29, %v4662_v41  ;;  %v2288_v27 = vsel %vm7172_vm1, %v2279_v15, %v5866_v2  ;;  %vm7173_vm14 = vmmov %vm7172_vm1 }
 0x699   : > { %2552 = vmatpush1.bf16.msra.mxu0 %v5960_v35  ;;  %vm7174_vm8 = vmmov %vm7172_vm1 }
 0x69a   : > { %v5988_v0 = vpack.c.bf16 %v2256_v47, %v2254_v53  ;;  %v5990_v11 = vpack.c.bf16 %v2257_v61, %v2255_v52  ;;  %v5992_v48 = vpop.permute.xlu1 %2360  ;;  %v6007_v22 = vpack.c.bf16 %v2292_v14, %v2290_v45  ;;  %v2294_v53 = vmul.f32 %v2288_v27, %v4662_v41  ;;  %vm7176_vm1 = vmmov %vm7175_vm5 }
 0x69b   : > { %v2295_v52 = vmul.f32 %v2284_v31, %v4659_v40  ;;  %v2335_v45 = vsel %vm571_vm10, %v5862_v42, %v5836_v39  ;;  %v2334_v27 = vsel %vm571_vm10, %v5860_v4, %v5834_v1 }
 0x69c   : > { %v2363_v28 = vpop.permute.xlu0 %2362  ;;  %2553 = vmatprep.subr.bf16.mxu0 %v5990_v11 }
 0x69d   : > { %2554 = vmatpush1.bf16.msra.mxu0 %v5988_v0 }
 0x69e   : > { %v2281_v9 = vpop.permute.xlu1 %2280  ;;  %2555 = vmatprep.subr.bf16.mxu0 %v5995_v50 }
 0x69f   : > { %v2285_v46 = vsel %vm7173_vm14, %v5868_v12, %v2281_v9  ;;  %v2289_v16 = vsel %vm7174_vm8, %v2281_v9, %v5868_v12  ;;  %v6029_v12 = vpack.c.bf16 %v5696_v38, %v5691_v6  ;;  %v2331_v9 = vsel %vm571_vm10, %v5836_v39, %v5862_v42  ;;  %vm7177_vm14 = vmmov %vm7176_vm1 }
 0x6a0   : > { %v2296_v2 = vmul.f32 %v2289_v16, %v4662_v41  ;;  %v2297_v15 = vmul.f32 %v2285_v46, %v4659_v40  ;;  %v2359_v47 = vpop.permute.xlu0 %2358  ;;  %v6049_v46 = vpack.c.bf16 %v5670_v17, %v5667_v60  ;;  %v2341_v16 = vmul.f32 %v2335_v45, %v4695_v32  ;;  %vm7178_vm8 = vmmov %vm7176_vm1 }
 0x6a1   : > { %2556 = vmatpush1.bf16.msra.mxu0 %v6007_v22  ;;  %v2339_v39 = vmul.f32 %v2334_v27, %v4695_v32  ;;  %v2340_v42 = vmul.f32 %v2331_v9, %v4700_v33  ;;  %v6068_v45 = vpack.c.bf16 %v5722_v58, %v5717_v13  ;;  %v2336_v27 = vsel %vm571_vm10, %v2327_v25, %v5870_v57 }
 0x6a2   : > { %v6020_v61 = vpack.c.bf16 %v2296_v2, %v2294_v53  ;;  %v6022_v29 = vpack.c.bf16 %v2297_v15, %v2295_v52  ;;  %v6024_v10 = vpop.permute.xlu1 %2396  ;;  %v6054_v52 = vpack.c.bf16 %v5748_v21, %v5743_v59  ;;  %v2330_v2 = vsel %vm571_vm10, %v5834_v1, %v5860_v4 }
 0x6a3   : > { %v2338_v21 = vmul.f32 %v2330_v2, %v4700_v33  ;;  %v6071_v59 = vpack.c.bf16 %v2341_v16, %v2339_v39  ;;  %v2332_v1 = vsel %vm571_vm10, %v5870_v57, %v2327_v25  ;;  %v2374_v9 = vsel %vm7175_vm5, %v2363_v28, %v5893_v26  ;;  %vm7179_vm5 = vmmov %vm7176_vm1 }
 0x6a4   : > { %v2367_v14 = vpop.permute.xlu0 %2366  ;;  %2557 = vmatprep.subr.bf16.mxu0 %v6022_v29  ;;  %v2375_v16 = vsel %vm7176_vm1, %v5945_v5, %v5903_v18  ;;  %v2342_v39 = vmul.f32 %v2332_v1, %v4700_v33  ;;  %v2370_v57 = vsel %vm7177_vm14, %v5893_v26, %v2363_v28  ;;  %v2379_v13 = vmul.f32 %v2374_v9, %v4735_v62  ;;  %vm7180_vm14 = vmmov %vm7176_vm1 }
 0x6a5   : > { %2558 = vmatpush1.bf16.msra.mxu0 %v6020_v61  ;;  %v6083_v58 = vpack.c.bf16 %v2340_v42, %v2338_v21  ;;  %v2343_v42 = vmul.f32 %v2336_v27, %v4695_v32  ;;  %v2371_v26 = vsel %vm7178_vm8, %v5903_v18, %v5945_v5  ;;  %v2381_v28 = vmul.f32 %v2375_v16, %v4735_v62  ;;  %vm7181_vm8 = vmmov %vm7176_vm1 }
 0x6a6   : > { %v6036_v31 = vpop.permute.xlu1 %2404  ;;  %2559 = vmatprep.subr.bf16.mxu0 %v6029_v12  ;;  %v2376_v18 = vsel %vm7176_vm1, %v2367_v14, %v2359_v47 }
 0x6a7   : > { %v6118_v17 = vpack.c.bf16 %v2381_v28, %v2379_v13  ;;  %v2415_v13 = vsel %vm675_vm12, %v6036_v31, %v6024_v10 }
 0x6a8   : > { %v2395_v53 = vpop.permute.xlu0 %2394 }
 0x6a9   : > { %2560 = vmatpush1.bf16.msra.mxu0 %v6049_v46 }
 0x6aa   : > { %v6063_v15 = vpop.permute.xlu1 %2400  ;;  %2561 = vmatprep.subr.bf16.mxu0 %v6054_v52 }
 0x6ac   : > { %v2403_v4 = vpop.permute.xlu0 %2402 }
 0x6ad   : > { %2562 = vmatpush1.bf16.msra.mxu0 %v6068_v45 }
 0x6ae   : > { %v2329_v2 = vpop.permute.xlu1 %2328  ;;  %2563 = vmatprep.subr.bf16.mxu0 %v6071_v59 }
 0x6af   : > { %v2333_v25 = vsel %vm571_vm10, %v5872_v56, %v2329_v2  ;;  %v2337_v21 = vsel %vm571_vm10, %v2329_v2, %v5872_v56  ;;  %v2378_v56 = vmul.f32 %v2370_v57, %v4738_v63 }
 0x6b0   : > { %v2344_v38 = vmul.f32 %v2333_v25, %v4700_v33  ;;  %v2345_v1 = vmul.f32 %v2337_v21, %v4695_v32  ;;  %v2399_v6 = vpop.permute.xlu0 %2398  ;;  %v2372_v25 = vsel %vm7179_vm5, %v2359_v47, %v2367_v14  ;;  %v2380_v21 = vmul.f32 %v2371_v26, %v4738_v63 }
 0x6b1   : > { %2564 = vmatpush1.bf16.msra.mxu0 %v6083_v58  ;;  %v2382_v16 = vmul.f32 %v2372_v25, %v4738_v63  ;;  %v2410_v47 = vsel %vm675_vm12, %v2395_v53, %v2403_v4  ;;  %vm7182_vm5 = vcmp.lt.s32.totalorder %v4486_v19, 111 }
 0x6b2   : > { %v6111_v2 = vpack.c.bf16 %v2344_v38, %v2342_v39  ;;  %v6113_v27 = vpack.c.bf16 %v2345_v1, %v2343_v42  ;;  %v2437_v9 = vpop.permute.xlu1 %2436  ;;  %v2414_v38 = vsel %vm675_vm12, %v2403_v4, %v2395_v53  ;;  %v6126_v5 = vpack.c.bf16 %v2380_v21, %v2378_v56  ;;  %vm7183_vm1 = vmmov %vm7182_vm5 }
 0x6b3   : > { %v2383_v42 = vmul.f32 %v2376_v18, %v4735_v62  ;;  %v2419_v1 = vmul.f32 %v2414_v38, %v7124_v49  ;;  %v2411_v53 = vsel %vm675_vm12, %v6024_v10, %v6036_v31  ;;  %v2421_v4 = vmul.f32 %v2415_v13, %v7124_v49 }
 0x6b4   : > { %v2407_v60 = vpop.permute.xlu0 %2406  ;;  %2565 = vmatprep.subr.bf16.mxu0 %v6113_v27 }
 0x6b5   : > { %2566 = vmatpush1.bf16.msra.mxu0 %v6111_v2  ;;  %v2412_v38 = vsel %vm675_vm12, %v2399_v6, %v2407_v60  ;;  %v2416_v10 = vsel %vm675_vm12, %v2407_v60, %v2399_v6 }
 0x6b6   : > { %v2369_v39 = vpop.permute.xlu1 %2368  ;;  %2567 = vmatprep.subr.bf16.mxu0 %v6118_v17 }
 0x6b7   : > { %v2373_v14 = vsel %vm7180_vm14, %v5992_v48, %v2369_v39  ;;  %v2377_v57 = vsel %vm7181_vm8, %v2369_v39, %v5992_v48  ;;  %v2418_v48 = vmul.f32 %v2410_v47, %v7123_v7  ;;  %v2420_v39 = vmul.f32 %v2411_v53, %v7123_v7  ;;  %vm7184_vm14 = vmmov %vm7183_vm1 }
 0x6b8   : > { %v2384_v26 = vmul.f32 %v2373_v14, %v4738_v63  ;;  %v2385_v28 = vmul.f32 %v2377_v57, %v4735_v62  ;;  %v2435_v56 = vpop.permute.xlu0 %2434  ;;  %v6160_v14 = vpack.c.bf16 %v2421_v4, %v2419_v1  ;;  %v2422_v47 = vmul.f32 %v2412_v38, %v7123_v7  ;;  %vm7185_vm8 = vmmov %vm7183_vm1 }
 0x6b9   : > { %2568 = vmatpush1.bf16.msra.mxu0 %v6126_v5  ;;  %v6168_v13 = vpack.c.bf16 %v2420_v39, %v2418_v48 }
 0x6ba   : > { %v6153_v25 = vpack.c.bf16 %v2384_v26, %v2382_v16  ;;  %v6155_v21 = vpack.c.bf16 %v2385_v28, %v2383_v42  ;;  %v2445_v18 = vpop.permute.xlu1 %2444  ;;  %v2423_v42 = vmul.f32 %v2416_v10, %v7124_v49 }
 0x6bb   : > { %v2455_v60 = vsel %vm7183_vm1, %v2445_v18, %v2437_v9  ;;  %v2451_v38 = vsel %vm7185_vm8, %v2437_v9, %v2445_v18  ;;  %vm7191_vm8 = vmmov %vm7183_vm1 }
 0x6bc   : > { %v2443_v31 = vpop.permute.xlu0 %2442  ;;  %2569 = vmatprep.subr.bf16.mxu0 %v6155_v21  ;;  %v2461_v39 = vmul.f32 %v2455_v60, %v4846_v36 }
 0x6bd   : > { %v2454_v16 = vsel %vm7182_vm5, %v2443_v31, %v2435_v56  ;;  %2570 = vmatpush1.bf16.msra.mxu0 %v6153_v25  ;;  %v2450_v26 = vsel %vm7184_vm14, %v2435_v56, %v2443_v31  ;;  %vm7189_vm5 = vmmov %vm7183_vm1 }
 0x6be   : > { %v2409_v57 = vpop.permute.xlu1 %2408  ;;  %2571 = vmatprep.subr.bf16.mxu0 %v6160_v14  ;;  %v2459_v28 = vmul.f32 %v2454_v16, %v4846_v36  ;;  %v2458_v56 = vmul.f32 %v2450_v26, %v7186_v30  ;;  %vm7190_vm14 = vmmov %vm7183_vm1 }
 0x6bf   : > { %v2413_v6 = vsel %vm675_vm12, %v6063_v15, %v2409_v57  ;;  %v2417_v1 = vsel %vm675_vm12, %v2409_v57, %v6063_v15 }
 0x6c0   : > { %v2424_v53 = vmul.f32 %v2413_v6, %v7123_v7  ;;  %v2425_v4 = vmul.f32 %v2417_v1, %v7124_v49  ;;  %v2439_v48 = vpop.permute.xlu0 %2438  ;;  %v2467_v31 = vpack.c.bf16 %v2461_v39, %v2459_v28  ;;  %v7187_v6 = vld [vmem:[#allocation44_spill] sm:$0xff]  ;;  %v2460_v49 = vmul.f32 %v2451_v38, %v7186_v30  ;;  %v7193_v38 = vld [vmem:[#allocation34_spill] sm:$0xff] }
 0x6c1   : > { %2572 = vmatpush1.bf16.msra.mxu0 %v6168_v13  ;;  %v2529_v1 = vrot.slane %v7188_v34, %v7187_v6 }
 0x6c2   : > { %v6190_v10 = vpack.c.bf16 %v2424_v53, %v2422_v47  ;;  %v2429_v15 = vpack.c.bf16 %v2425_v4, %v2423_v42  ;;  %v2441_v57 = vpop.permute.xlu1 %2440  ;;  %v2466_v47 = vpack.c.bf16 %v2460_v49, %v2458_v56  ;;  %v7192_v4 = vmov 0   ;;  %v7195_v56 = vld [vmem:[#allocation42_spill] sm:$0xff] }
 0x6c3   : > { %v2537_v39 = vcombine.high %v2529_v1, %v2529_v1 }
 0x6c4   : > { %v2447_v16 = vpop.permute.xlu0 %2446  ;;  %2573 = vmatprep.subr.bf16.mxu0 %v2429_v15 }
 0x6c5   : > { %v2452_v7 = vsel %vm7189_vm5, %v2439_v48, %v2447_v16  ;;  %v2456_v9 = vsel %vm7183_vm1, %v2447_v16, %v2439_v48  ;;  %2574 = vmatpush1.bf16.msra.mxu0 %v6190_v10  ;;  %vm7196_vm5 = vcmask 392192   ;;  %v7197_v16 = vld [vmem:[#allocation41_spill] sm:$0xff] }
 0x6c6   : > { %v2449_v18 = vpop.permute.xlu1 %2448  ;;  %2584 = vmatprep.subr.bf16.mxu0 %v2467_v31  ;;  %v2462_v34 = vmul.f32 %v2452_v7, %v7186_v30  ;;  %v2463_v26 = vmul.f32 %v2456_v9, %v4846_v36  ;;  %v3906_v7 = vld [vmem:[#allocation8 + $0x64] ss:$12 sps:$4 sm:$0xff]  }
 0x6c7   : > { %v2453_v42 = vsel %vm7190_vm14, %v2441_v57, %v2449_v18  ;;  %v2457_v60 = vsel %vm7191_vm8, %v2449_v18, %v2441_v57  ;;  %v7194_v57 = vld [vmem:[#allocation33_spill] sm:$0xff]  ;;  %vm7205_vm14 = vcmp.lt.s32.totalorder %v4486_v19, 113 }
 0x6c8   : > { %v2464_v28 = vmul.f32 %v2453_v42, %v7186_v30  ;;  %v2465_v53 = vmul.f32 %v2457_v60, %v4846_v36  ;;  %2576 = vmatmul.mubr.bf16.vlgmr.msra.gmra.mrb[8].mxu0 %v2529_v1  ;;  %vm7206_vm8 = vmmov %vm7205_vm14 }
 0x6c9   : > { %2585 = vmatpush1.bf16.msra.mxu0 %v2466_v47  ;;  %2616 = vmatprep.mubr.bf16.mxu0 %v7192_v4 }
 0x6ca   : > { %v2468_v48 = vpack.c.bf16 %v2464_v28, %v2462_v34  ;;  %v2469_v49 = vpack.c.bf16 %v2465_v53, %v2463_v26 }
 0x6cc   : > { %2586 = vmatprep.subr.bf16.mxu0 %v2469_v49 }
 0x6cd   : > { %2587 = vmatpush1.bf16.msra.mxu0 %v2468_v48 }
 0x6ce   : > { %2588 = vmatprep.subr.bf16.mxu0 %v7193_v38 }
 0x6d1   : > { %2589 = vmatpush1.bf16.msra.mxu0 %v7194_v57 }
 0x6d2   : > { %2972 = vmatprep.subr.bf16.mxu0 %v7195_v56 }
 0x6d4   : > { %3756 = vmatmul.mubr.msk.bf16.vlgmr.msra.gmra.mrb[8].mxu0 %vm7196_vm5, %v2537_v39  ;;  %vm7208_vm5 = vcmp.lt.s32.totalorder %v4486_v19, 17 }
 0x6d5   : > { %2973 = vmatpush1.bf16.msra.mxu0 %v7197_v16  ;;  %3004 = vmatprep.mubr.bf16.mxu0 %v3906_v7 }
 0x6d6   : > { %2974 = vmatprep.subr.bf16.mxu0 %v5901_v51 }
 0x6d9   : > { %2975 = vmatpush1.bf16.msra.mxu0 %v5899_v8  ;;  %v3904_v8 = vld [vmem:[#allocation8 + $0x60] ss:$12 sps:$4 sm:$0xff]  }
 0x6da   : > { %2976 = vmatprep.subr.bf16.mxu0 %v5906_v3 }
 0x6dd   : > { %2977 = vmatpush1.bf16.msra.mxu0 %v5917_v43 }
 0x6de   : > { %2978 = vmatprep.subr.bf16.mxu0 %v5943_v37  ;;  %v7198_v37 = vld [vmem:[#allocation43_spill] sm:$0xff] }
 0x6e1   : > { %2979 = vmatpush1.bf16.msra.mxu0 %v5941_v44 }
 0x6e2   : > { %2980 = vmatprep.subr.bf16.mxu0 %v5948_v20 }
 0x6e5   : > { %2981 = vmatpush1.bf16.msra.mxu0 %v5960_v35  ;;  %v7200_v35 = vld [vmem:[#allocation16_spill] sm:$0xff] }
 0x6e6   : > { %2982 = vmatprep.subr.bf16.mxu0 %v5990_v11  ;;  %v7201_v11 = vld [vmem:[#allocation15_spill] sm:$0xff] }
 0x6e9   : > { %2983 = vmatpush1.bf16.msra.mxu0 %v5988_v0 }
 0x6ea   : > { %2984 = vmatprep.subr.bf16.mxu0 %v5995_v50 }
 0x6ed   : > { %2985 = vmatpush1.bf16.msra.mxu0 %v6007_v22 }
 0x6ee   : > { %2986 = vmatprep.subr.bf16.mxu0 %v6022_v29 }
 0x6f1   : > { %2987 = vmatpush1.bf16.msra.mxu0 %v6020_v61 }
 0x6f2   : > { %2988 = vmatprep.subr.bf16.mxu0 %v6029_v12 }
 0x6f5   : > { %2989 = vmatpush1.bf16.msra.mxu0 %v6049_v46  ;;  %v2787_v46 = vld [vmem:[#allocation2 + $0x120] sm:$0x4] }
 0x6f6   : > { %2990 = vmatprep.subr.bf16.mxu0 %v6054_v52  ;;  %v2790_v52 = vld [vmem:[#allocation2 + $0x128] sm:$0x4] }
 0x6f9   : > { %2991 = vmatpush1.bf16.msra.mxu0 %v6068_v45 }
 0x6fa   : > { %2992 = vmatprep.subr.bf16.mxu0 %v6071_v59 }
 0x6fd   : > { %2993 = vmatpush1.bf16.msra.mxu0 %v6083_v58 }
 0x6fe   : > { %2994 = vmatprep.subr.bf16.mxu0 %v6113_v27 }
 0x701   : > { %2995 = vmatpush1.bf16.msra.mxu0 %v6111_v2 }
 0x702   : > { %2996 = vmatprep.subr.bf16.mxu0 %v6118_v17 }
 0x705   : > { %2997 = vmatpush1.bf16.msra.mxu0 %v6126_v5  ;;  %v3907_v5 = vld [vmem:[#allocation8 + $0x7c] ss:$12 sps:$4 sm:$0xff]  }
 0x706   : > { %2998 = vmatprep.subr.bf16.mxu0 %v6155_v21 }
 0x709   : > { %2999 = vmatpush1.bf16.msra.mxu0 %v6153_v25  ;;  %v3909_v25 = vld [vmem:[#allocation8 + $0x78] ss:$12 sps:$4 sm:$0xff]  }
 0x70a   : > { %3000 = vmatprep.subr.bf16.mxu0 %v6160_v14 }
 0x70d   : > { %3001 = vmatpush1.bf16.msra.mxu0 %v6168_v13 }
 0x70e   : > { %3002 = vmatprep.subr.bf16.mxu0 %v2429_v15 }
 0x711   : > { %3003 = vmatpush1.bf16.msra.mxu0 %v6190_v10 }
 0x712   : > { %3025 = vmatprep.subr.bf16.mxu0 %v2467_v31 }
 0x714   : > { %3005 = vmatmul.mubr.bf16.vlgmr.msra.gmra.mrb[12].mxu0 %v3904_v8 }
 0x715   : > { %3026 = vmatpush1.bf16.msra.mxu0 %v2466_v47  ;;  %3014 = vmatprep.mubr.bf16.mxu0 %v3907_v5 }
 0x716   : > { %3027 = vmatprep.subr.bf16.mxu0 %v2469_v49  ;;  %v2750_v49 = vld [vmem:[#allocation2 + $0x128] sm:$0x2] }
 0x719   : > { %3028 = vmatpush1.bf16.msra.mxu0 %v2468_v48  ;;  %v2747_v48 = vld [vmem:[#allocation2 + $0x120] sm:$0x2] }
 0x71c   : > { %3015 = vmatmul.mubr.bf16.gmra.mrb[16].mxu0 %v3909_v25 }
 0x71d   : > { %3057 = vmatprep.mubr.bf16.mxu0 %v7192_v4 }
 0x7a7   : > { %v2618_v17 = vpop.f32.mrb[8].mxu0 }
 0x7a8   : > { %v2620_v58 = vpop.f32.mrb[9].mxu0 }
 0x7a9   : > { %v2627_v59 = vcombine.low %v2618_v17, %v2620_v58  ;;  %v2622_v51 = vpop.f32.mrb[10].mxu0 }
 0x7aa   : > { %v2623_v3 = vpop.f32.mrb[11].mxu0 }
 0x7ab   : > { %v2634_v43 = vrot.slane %v2627_v59, %v7187_v6 }
 0x7ad   : > { %v2641_v44 = vrot.slane %v2634_v43, %v7187_v6 }
 0x7af   : > { %v6247_v20 = vadd.f32 %v2641_v44, %v7198_v37  ;;  %v2835_v44 = vld [vmem:[#allocation2 + $0x120] sm:$0x8]  ;;  %v2838_v37 = vld [vmem:[#allocation2 + $0x128] sm:$0x8] }
 0x7b1   : > { %7199 = vst [vmem:[#allocation27_spill] sm:$0xff] %v6247_v20  ;;  %v2684_v0 = vrot.slane %v6247_v20, %v7200_v35  ;;  %v2688_v50 = vrot.slane %v6247_v20, %v7201_v11 }
 0x7b3   : > { %v2779_v22 = vpack.c.bf16 %v2684_v0, %v2684_v0  ;;  %v2780_v61 = vpack.c.bf16 %v2688_v50, %v2688_v50  ;;  %2733 = vrot.lane.b32.xlu1 %v2688_v50, %s4097_s10  ;;  %2731 = vrot.lane.b32.xlu0 %v2684_v0, %s4097_s10 }
 0x7b5   : > { %v2783_v29 = vrot.slane %v2779_v22, 6  ;;  %v2784_v12 = vrot.slane %v2780_v61, 6 }
 0x7b7   : > { %v2788_v2 = vsel %vm4531_vm3, %v2783_v29, %v2787_v46  ;;  %v2791_v27 = vsel %vm4531_vm3, %v2784_v12, %v2790_v52  ;;  %2821 = vrot.lane.b32.xlu1 %v2688_v50, %s4100_s15  ;;  %2819 = vrot.lane.b32.xlu0 %v2684_v0, %s4100_s15  ;;  %vm7203_vm3 = vcmp.lt.s32.totalorder %v4486_v19, 15  ;;  %v2701_v12 = vld [vmem:[#allocation2 + $0x120] sm:$0x1]  ;;  %v2704_v46 = vld [vmem:[#allocation2 + $0x128] sm:$0x1] }
 0x7b8   : > { %2789 = vst [vmem:[#allocation2 + $0x120] sm:$0x4] %v2788_v2  ;;  %2792 = vst [vmem:[#allocation2 + $0x128] sm:$0x4] %v2791_v27 }
 0x7b9   : > { %vm7204_vm1 = vmmov %vm7203_vm3 }
 0x7bb   : > { %2693 = vrot.lane.b32.xlu1 %v2688_v50, %s4095_s24  ;;  %2691 = vrot.lane.b32.xlu0 %v2684_v0, %s4095_s24 }
 0x7bf   : > { %2755 = vrot.lane.b32.xlu1 %v2688_v50, %s4098_s7  ;;  %2753 = vrot.lane.b32.xlu0 %v2684_v0, %s4098_s7 }
 0x7c3   : > { %2795 = vrot.lane.b32.xlu1 %v2688_v50, %s4099_s13  ;;  %2793 = vrot.lane.b32.xlu0 %v2684_v0, %s4099_s13 }
 0x7c7   : > { %2843 = vrot.lane.b32.xlu1 %v2688_v50, %s4101_s16  ;;  %2841 = vrot.lane.b32.xlu0 %v2684_v0, %s4101_s16 }
 0x7cb   : > { %2709 = vrot.lane.b32.xlu1 %v2688_v50, %s4096_s28  ;;  %2707 = vrot.lane.b32.xlu0 %v2684_v0, %s4096_s28 }
 0x7cf   : > { %2869 = vrot.lane.b32.xlu1 %v2688_v50, %s4102_s29  ;;  %2867 = vrot.lane.b32.xlu0 %v2684_v0, %s4102_s29 }
 0x825   : > { %v2734_v21 = vpop.permute.xlu1 %2733  ;;  %v2732_v14 = vpop.permute.xlu0 %2731 }
 0x826   : > { %v2735_v13 = vsel %vm7203_vm3, %v2732_v14, %v2734_v21  ;;  %v2736_v10 = vsel %vm7204_vm1, %v2734_v21, %v2732_v14  ;;  %vm7209_vm3 = vmmov %vm7208_vm5 }
 0x827   : > { %v2737_v15 = vmul.f32 %v2736_v10, %v4614_v55  ;;  %v2738_v31 = vmul.f32 %v2735_v13, %v4611_v54 }
 0x829   : > { %v2739_v1 = vpack.c.bf16 %v2737_v15, %v2737_v15  ;;  %v2740_v9 = vpack.c.bf16 %v2738_v31, %v2738_v31  ;;  %v2822_v18 = vpop.permute.xlu1 %2821  ;;  %v2820_v47 = vpop.permute.xlu0 %2819 }
 0x82a   : > { %v2823_v42 = vsel %vm7205_vm14, %v2820_v47, %v2822_v18  ;;  %v2824_v60 = vsel %vm7206_vm8, %v2822_v18, %v2820_v47  ;;  %vm7242_vm8 = vcmp.lt.s32.totalorder %v4486_v19, 15 }
 0x82b   : > { %v2743_v34 = vrot.slane %v2739_v1, 7  ;;  %v2744_v26 = vrot.slane %v2740_v9, 7  ;;  %v2825_v28 = vmul.f32 %v2823_v42, %v4738_v63  ;;  %v2826_v53 = vmul.f32 %v2824_v60, %v4735_v62 }
 0x82d   : > { %v2748_v39 = vsel %vm4805_vm15, %v2743_v34, %v2747_v48  ;;  %v2751_v57 = vsel %vm4805_vm15, %v2744_v26, %v2750_v49  ;;  %v2827_v7 = vpack.c.bf16 %v2825_v28, %v2825_v28  ;;  %v2828_v56 = vpack.c.bf16 %v2826_v53, %v2826_v53  ;;  %v2694_v16 = vpop.permute.xlu1 %2693  ;;  %v2692_v8 = vpop.permute.xlu0 %2691 }
 0x82e   : > { %2749 = vst [vmem:[#allocation2 + $0x120] sm:$0x2] %v2748_v39  ;;  %2752 = vst [vmem:[#allocation2 + $0x128] sm:$0x2] %v2751_v57  ;;  %v2695_v17 = vsel %vm7208_vm5, %v2692_v8, %v2694_v16  ;;  %v2696_v58 = vsel %vm7209_vm3, %v2694_v16, %v2692_v8  ;;  %vm7211_vm15 = vcmp.lt.s32.totalorder %v4486_v19, 1 }
 0x82f   : > { %v2831_v59 = vrot.slane %v2827_v7, 5  ;;  %v2832_v51 = vrot.slane %v2828_v56, 5  ;;  %v2697_v3 = vmul.f32 %v2696_v58, %v4500_v24  ;;  %v2698_v43 = vmul.f32 %v2695_v17, %v4497_v23  ;;  %vm7212_vm1 = vmmov %vm7211_vm15  ;;  %v7215_v58 = vld [vmem:[#allocation22_spill] sm:$0xff] }
 0x830   : > { %vm7243_vm5 = vmmov %vm7242_vm8 }
 0x831   : > { %v2836_v0 = vsel %vm4821_vm11, %v2831_v59, %v2835_v44  ;;  %v2839_v11 = vsel %vm4821_vm11, %v2832_v51, %v2838_v37  ;;  %v2699_v50 = vpack.c.bf16 %v2697_v3, %v2697_v3  ;;  %v2700_v22 = vpack.c.bf16 %v2698_v43, %v2698_v43  ;;  %v2756_v61 = vpop.permute.xlu1 %2755  ;;  %v2754_v29 = vpop.permute.xlu0 %2753  ;;  %v7216_v51 = vld [vmem:[#allocation21_spill] sm:$0xff] }
 0x832   : > { %2837 = vst [vmem:[#allocation2 + $0x120] sm:$0x8] %v2836_v0  ;;  %2840 = vst [vmem:[#allocation2 + $0x128] sm:$0x8] %v2839_v11  ;;  %v2757_v52 = vsel %vm7211_vm15, %v2754_v29, %v2756_v61  ;;  %v2758_v45 = vsel %vm7212_vm1, %v2756_v61, %v2754_v29  ;;  %v2816_v0 = vld [vmem:[#allocation2 + $0x128] sm:$0x4] }
 0x833   : > { %v2702_v27 = vsel %vm4836_vm6, %v2699_v50, %v2701_v12  ;;  %v2705_v5 = vsel %vm4836_vm6, %v2700_v22, %v2704_v46  ;;  %v2759_v25 = vmul.f32 %v2758_v45, %v4662_v41  ;;  %v2760_v21 = vmul.f32 %v2757_v52, %v4659_v40  ;;  %v2813_v11 = vld [vmem:[#allocation2 + $0x120] sm:$0x4]  ;;  %v7218_v45 = vld [vmem:[#allocation20_spill] sm:$0xff] }
 0x834   : > { %2703 = vst [vmem:[#allocation2 + $0x120] sm:$0x1] %v2702_v27  ;;  %2706 = vst [vmem:[#allocation2 + $0x128] sm:$0x1] %v2705_v5  ;;  %v7219_v27 = vld [vmem:[#allocation19_spill] sm:$0xff]  ;;  %vm7227_vm6 = vcmask 392192  }
 0x835   : > { %v2761_v14 = vpack.c.bf16 %v2759_v25, %v2759_v25  ;;  %v2762_v13 = vpack.c.bf16 %v2760_v21, %v2760_v21  ;;  %v2796_v10 = vpop.permute.xlu1 %2795  ;;  %v2794_v15 = vpop.permute.xlu0 %2793  ;;  %v2773_v49 = vld [vmem:[#allocation2 + $0x120] sm:$0x2]  ;;  %v2776_v38 = vld [vmem:[#allocation2 + $0x128] sm:$0x2] }
 0x836   : > { %v2797_v31 = vsel %vm571_vm10, %v2794_v15, %v2796_v10  ;;  %v2798_v1 = vsel %vm571_vm10, %v2796_v10, %v2794_v15 }
 0x837   : > { %v2764_v9 = vshll.u32 %v2761_v14, 16  ;;  %v2768_v18 = vshll.u32 %v2762_v13, 16  ;;  %v2799_v47 = vmul.f32 %v2797_v31, %v4700_v33  ;;  %v2800_v42 = vmul.f32 %v2798_v1, %v4695_v32 }
 0x839   : > { %v2766_v60 = vrot.slane %v2764_v9, 7  ;;  %v2770_v34 = vrot.slane %v2768_v18, 7  ;;  %v2801_v26 = vpack.c.bf16 %v2799_v47, %v2799_v47  ;;  %v2802_v28 = vpack.c.bf16 %v2800_v42, %v2800_v42  ;;  %v2844_v53 = vpop.permute.xlu1 %2843  ;;  %v2842_v48 = vpop.permute.xlu0 %2841  ;;  %v2861_v47 = vld [vmem:[#allocation2 + $0x120] sm:$0x8]  ;;  %v2864_v42 = vld [vmem:[#allocation2 + $0x128] sm:$0x8] }
 0x83a   : > { %v2845_v39 = vsel %vm675_vm12, %v2842_v48, %v2844_v53  ;;  %v2846_v57 = vsel %vm675_vm12, %v2844_v53, %v2842_v48 }
 0x83b   : > { %v2774_v56 = vsel %vm4881_vm9, %v2766_v60, %v2773_v49  ;;  %v2777_v16 = vsel %vm4881_vm9, %v2770_v34, %v2776_v38  ;;  %v2804_v8 = vshll.u32 %v2801_v26, 16  ;;  %v2808_v17 = vshll.u32 %v2802_v28, 16  ;;  %v2725_v38 = vld [vmem:[#allocation2 + $0x120] sm:$0x1] }
 0x83c   : > { %2775 = vst [vmem:[#allocation2 + $0x120] sm:$0x2] %v2774_v56  ;;  %2778 = vst [vmem:[#allocation2 + $0x128] sm:$0x2] %v2777_v16  ;;  %v2847_v59 = vmul.f32 %v2845_v39, %v7215_v58  ;;  %v2848_v3 = vmul.f32 %v2846_v57, %v7216_v51  ;;  %vm7220_vm9 = vcmp.lt.s32.totalorder %v4486_v19, 111  ;;  %v7234_v57 = vld [vmem:[#allocation37_spill] sm:$0xff] }
 0x83d   : > { %v2806_v43 = vrot.slane %v2804_v8, 6  ;;  %v2810_v44 = vrot.slane %v2808_v17, 6  ;;  %v2710_v37 = vpop.permute.xlu1 %2709  ;;  %v2708_v35 = vpop.permute.xlu0 %2707  ;;  %vm7221_vm11 = vmmov %vm7220_vm9  ;;  %v2728_v39 = vld [vmem:[#allocation2 + $0x128] sm:$0x1] }
 0x83e   : > { %v2849_v50 = vpack.c.bf16 %v2847_v59, %v2847_v59  ;;  %v2850_v22 = vpack.c.bf16 %v2848_v3, %v2848_v3  ;;  %v2711_v61 = vsel %vm407_vm4, %v2708_v35, %v2710_v37  ;;  %v2712_v29 = vsel %vm407_vm4, %v2710_v37, %v2708_v35  ;;  %v2883_v3 = vld [vmem:[#allocation2 + $0x120] sm:$0x10] }
 0x83f   : > { %v2814_v46 = vsel %vm4895_vm13, %v2806_v43, %v2813_v11  ;;  %v2817_v52 = vsel %vm4895_vm13, %v2810_v44, %v2816_v0  ;;  %v2713_v2 = vmul.f32 %v2712_v29, %v7218_v45  ;;  %v2714_v5 = vmul.f32 %v2711_v61, %v7219_v27  ;;  %v2886_v43 = vld [vmem:[#allocation2 + $0x128] sm:$0x10]  ;;  %vm7228_vm13 = vmmov %vm7227_vm6 }
 0x840   : > { %2815 = vst [vmem:[#allocation2 + $0x120] sm:$0x4] %v2814_v46  ;;  %2818 = vst [vmem:[#allocation2 + $0x128] sm:$0x4] %v2817_v52  ;;  %v2852_v25 = vshll.u32 %v2849_v50, 16  ;;  %v2856_v21 = vshll.u32 %v2850_v22, 16 }
 0x841   : > { %v2715_v14 = vpack.c.bf16 %v2713_v2, %v2713_v2  ;;  %v2716_v13 = vpack.c.bf16 %v2714_v5, %v2714_v5  ;;  %v2870_v10 = vpop.permute.xlu1 %2869  ;;  %v2868_v15 = vpop.permute.xlu0 %2867  ;;  %v3910_v50 = vld [vmem:[#allocation8 + $0x68] ss:$12 sps:$4 sm:$0xff]   ;;  %v3911_v22 = vld [vmem:[#allocation8 + $0x80] ss:$12 sps:$4 sm:$0xff]  }
 0x842   : > { %v2854_v31 = vrot.slane %v2852_v25, 5  ;;  %v2858_v1 = vrot.slane %v2856_v21, 5  ;;  %v2871_v9 = vsel %vm7220_vm9, %v2868_v15, %v2870_v10  ;;  %v2872_v18 = vsel %vm7221_vm11, %v2870_v10, %v2868_v15  ;;  %v7229_v2 = vld [vmem:[#allocation46_spill] sm:$0xff]  ;;  %v7231_v15 = vld [vmem:[#allocation17_spill] sm:$0xff]  ;;  %vm7246_vm9 = vmmov %vm7212_vm1 }
 0x843   : > { %v2718_v60 = vshll.u32 %v2715_v14, 16  ;;  %v2721_v34 = vshll.u32 %v2716_v13, 16  ;;  %v2873_v26 = vmul.f32 %v2871_v9, %v7186_v30  ;;  %v2874_v28 = vmul.f32 %v2872_v18, %v4846_v36  ;;  %v7230_v13 = vld [vmem:[#allocation45_spill] sm:$0xff]  ;;  %vm7247_vm11 = vmmov %vm7212_vm1 }
 0x844   : > { %v2862_v48 = vsel %vm4906_vm0, %v2854_v31, %v2861_v47  ;;  %v2865_v49 = vsel %vm4906_vm0, %v2858_v1, %v2864_v42  ;;  %v7232_v1 = vld [vmem:[#allocation35_spill] sm:$0xff]  ;;  %vm7238_vm0 = vmmov %vm7209_vm3 }
 0x845   : > { %2863 = vst [vmem:[#allocation2 + $0x120] sm:$0x8] %v2862_v48  ;;  %2866 = vst [vmem:[#allocation2 + $0x128] sm:$0x8] %v2865_v49  ;;  %v2726_v7 = vsel %vm4933_vm2, %v2718_v60, %v2725_v38  ;;  %v2729_v56 = vsel %vm4933_vm2, %v2721_v34, %v2728_v39  ;;  %v2875_v16 = vpack.c.bf16 %v2873_v26, %v2873_v26  ;;  %v7233_v38 = vld [vmem:[#allocation36_spill] sm:$0xff] }
 0x846   : > { %v2876_v8 = vpack.c.bf16 %v2874_v28, %v2874_v28  ;;  %2727 = vst [vmem:[#allocation2 + $0x120] sm:$0x1] %v2726_v7  ;;  %2730 = vst [vmem:[#allocation2 + $0x128] sm:$0x1] %v2729_v56  ;;  %v7235_v56 = vld [vmem:[#allocation38_spill] sm:$0xff] }
 0x847   : > { %v2879_v17 = vrot.slane %v2875_v16, 4  ;;  %vm7239_vm2 = vmmov %vm7238_vm0 }
 0x848   : > { %v2880_v59 = vrot.slane %v2876_v8, 4  ;;  %v7236_v8 = vld [vmem:[#allocation39_spill] sm:$0xff]  ;;  %vm7241_vm14 = vmmov %vm7238_vm0 }
 0x849   : > { %v2884_v37 = vsel %vm4949_vm7, %v2879_v17, %v2883_v3  ;;  %vm7244_vm3 = vmmov %vm7243_vm5 }
 0x84a   : > { %v2887_v35 = vsel %vm4949_vm7, %v2880_v59, %v2886_v43  ;;  %2885 = vst [vmem:[#allocation2 + $0x120] sm:$0x10] %v2884_v37  ;;  %v6508_v43 = vld.sshfl [vmem:[%s6897_s4 + $0x6] sm:$0x13 pattern:$0x75316420]  ;;  %vm7240_vm7 = vmmov %vm7238_vm0 }
 0x84b   : > { %2888 = vst [vmem:[#allocation2 + $0x128] sm:$0x10] %v2887_v35  ;;  %7237 = vst [vmem:[#allocation33_spill] sm:$0xff] %v6508_v43  ;;  %v3470_v44 = vcombine.high %v6508_v43, %v6508_v43 }
 0x84c   : > { %vm7245_vm15 = vmmov %vm7244_vm3 }
 0x84d   : > { %v3484_v37 = vrot.slane %v3470_v44, %v7187_v6 }
 0x84f   : > { %3523 = vmatprep.mubr.bf16.mxu1 %v3484_v37 }
 0x851   : > { %v6356_v11 = vld [vmem:[#allocation2 + $0x120] sm:$0xff] }
 0x852   : > { %v6354_v0 = vld [vmem:[#allocation2 + $0x128] sm:$0xff]  ;;  %7226 = vst [vmem:[#allocation34_spill] sm:$0xff] %v6356_v11 }
 0x853   : > { %7225 = vst [vmem:[#allocation40_spill] sm:$0xff] %v6354_v0  ;;  %3029 = vmatprep.subr.bf16.mxu0 %v6354_v0 }
 0x854   : > { %3030 = vmatpush1.bf16.msra.mxu0 %v6356_v11 }
 0x857   : > { %3763 = vmatmul.mubr.msk.bf16.vlgmr.msra.gmra.mrb[12].mxu0 %vm7227_vm6, %v3910_v50  ;;  %vm7248_vm6 = vmmov %vm7212_vm1 }
 0x858   : > { %3067 = vmatprep.mubr.bf16.mxu0 %v7192_v4 }
 0x85f   : > { %3764 = vmatmul.mubr.msk.bf16.gmra.mrb[16].mxu0 %vm7228_vm13, %v3911_v22  ;;  %vm7249_vm13 = vmmov %vm7238_vm0 }
 0x92a   : > { %v3059_v61 = vpop.f32.mrb[12].mxu0 }
 0x92b   : > { %v3078_v29 = vmax.f32 %v3059_v61, 0.0  ;;  %v3061_v12 = vpop.f32.mrb[13].mxu0 }
 0x92c   : > { %v3079_v46 = vmax.f32 %v3061_v12, 0.0  ;;  %v3063_v52 = vpop.f32.mrb[14].mxu0 }
 0x92d   : > { %v6364_v5 = vadd.f32 %v3078_v29, %v7229_v2  ;;  %v3080_v25 = vmax.f32 %v3063_v52, 0.0  ;;  %v3065_v21 = vpop.f32.mrb[15].mxu0 }
 0x92e   : > { %v3081_v14 = vmax.f32 %v3065_v21, 0.0  ;;  %v6372_v31 = vadd.f32 %v3079_v46, %v7231_v15 }
 0x92f   : > { %v6367_v10 = vadd.f32 %v3080_v25, %v7230_v13  ;;  %3094 = vrot.lane.b32.xlu0 %v6364_v5, %s4095_s24 }
 0x930   : > { %v6375_v9 = vadd.f32 %v3081_v14, %v7232_v1 }
 0x931   : > { %3096 = vrot.lane.b32.xlu1 %v6367_v10, %s4095_s24 }
 0x932   : > { %v3069_v47 = vpop.f32.mrb[16].mxu0 }
 0x933   : > { %v3082_v60 = vmax.f32 %v3069_v47, 0.0  ;;  %3134 = vrot.lane.b32.xlu0 %v6364_v5, %s4096_s28  ;;  %v3071_v34 = vpop.f32.mrb[17].mxu0 }
 0x934   : > { %v3083_v26 = vmax.f32 %v3071_v34, 0.0  ;;  %v3073_v28 = vpop.f32.mrb[18].mxu0 }
 0x935   : > { %v3084_v53 = vmax.f32 %v3073_v28, 0.0  ;;  %3136 = vrot.lane.b32.xlu1 %v6367_v10, %s4096_s28  ;;  %v3075_v48 = vpop.f32.mrb[19].mxu0  ;;  %v6388_v39 = vadd.f32 %v3082_v60, %v7233_v38 }
 0x936   : > { %v3085_v49 = vmax.f32 %v3075_v48, 0.0  ;;  %v6396_v16 = vadd.f32 %v3083_v26, %v7235_v56 }
 0x937   : > { %v6391_v7 = vadd.f32 %v3084_v53, %v7234_v57  ;;  %3174 = vrot.lane.b32.xlu0 %v6364_v5, %s4097_s10 }
 0x938   : > { %v6399_v17 = vadd.f32 %v3085_v49, %v7236_v8 }
 0x939   : > { %3176 = vrot.lane.b32.xlu1 %v6367_v10, %s4097_s10 }
 0x93b   : > { %3214 = vrot.lane.b32.xlu0 %v6364_v5, %s4098_s7 }
 0x93d   : > { %3216 = vrot.lane.b32.xlu1 %v6367_v10, %s4098_s7 }
 0x93f   : > { %3262 = vrot.lane.b32.xlu0 %v6364_v5, %s4099_s13 }
 0x941   : > { %3264 = vrot.lane.b32.xlu1 %v6367_v10, %s4099_s13 }
 0x943   : > { %3102 = vrot.lane.b32.xlu0 %v6372_v31, %s4095_s24 }
 0x945   : > { %3104 = vrot.lane.b32.xlu1 %v6375_v9, %s4095_s24 }
 0x947   : > { %3142 = vrot.lane.b32.xlu0 %v6372_v31, %s4096_s28 }
 0x949   : > { %3144 = vrot.lane.b32.xlu1 %v6375_v9, %s4096_s28 }
 0x94b   : > { %3182 = vrot.lane.b32.xlu0 %v6372_v31, %s4097_s10 }
 0x94d   : > { %3184 = vrot.lane.b32.xlu1 %v6375_v9, %s4097_s10 }
 0x94f   : > { %3222 = vrot.lane.b32.xlu0 %v6372_v31, %s4098_s7 }
 0x951   : > { %3224 = vrot.lane.b32.xlu1 %v6375_v9, %s4098_s7 }
 0x953   : > { %3270 = vrot.lane.b32.xlu0 %v6372_v31, %s4099_s13 }
 0x955   : > { %3272 = vrot.lane.b32.xlu1 %v6375_v9, %s4099_s13 }
 0x957   : > { %3098 = vrot.lane.b32.xlu0 %v6388_v39, %s4095_s24 }
 0x959   : > { %3100 = vrot.lane.b32.xlu1 %v6391_v7, %s4095_s24 }
 0x95b   : > { %3138 = vrot.lane.b32.xlu0 %v6388_v39, %s4096_s28 }
 0x95d   : > { %3140 = vrot.lane.b32.xlu1 %v6391_v7, %s4096_s28 }
 0x95f   : > { %3178 = vrot.lane.b32.xlu0 %v6388_v39, %s4097_s10 }
 0x961   : > { %3180 = vrot.lane.b32.xlu1 %v6391_v7, %s4097_s10 }
 0x963   : > { %3218 = vrot.lane.b32.xlu0 %v6388_v39, %s4098_s7 }
 0x965   : > { %3220 = vrot.lane.b32.xlu1 %v6391_v7, %s4098_s7 }
 0x967   : > { %3266 = vrot.lane.b32.xlu0 %v6388_v39, %s4099_s13 }
 0x969   : > { %3268 = vrot.lane.b32.xlu1 %v6391_v7, %s4099_s13 }
 0x96b   : > { %3106 = vrot.lane.b32.xlu0 %v6396_v16, %s4095_s24 }
 0x96d   : > { %3108 = vrot.lane.b32.xlu1 %v6399_v17, %s4095_s24 }
 0x96f   : > { %3302 = vrot.lane.b32.xlu0 %v6364_v5, %s4100_s15 }
 0x971   : > { %3304 = vrot.lane.b32.xlu1 %v6367_v10, %s4100_s15 }
 0x973   : > { %3146 = vrot.lane.b32.xlu0 %v6396_v16, %s4096_s28 }
 0x975   : > { %3148 = vrot.lane.b32.xlu1 %v6399_v17, %s4096_s28 }
 0x977   : > { %3186 = vrot.lane.b32.xlu0 %v6396_v16, %s4097_s10 }
 0x979   : > { %3312 = vrot.lane.b32.xlu1 %v6375_v9, %s4100_s15 }
 0x97b   : > { %3226 = vrot.lane.b32.xlu0 %v6396_v16, %s4098_s7 }
 0x97d   : > { %3188 = vrot.lane.b32.xlu1 %v6399_v17, %s4097_s10  ;;  %s3775_s10 = sshll.u32 %s4157_s22, 5  ;;  %s3598_s22 = scalar_lea.sflag [#allocation5], %s4305_s8 }
 0x97f   : > { %3274 = vrot.lane.b32.xlu0 %v6396_v16, %s4099_s13 }
 0x981   : > { %3308 = vrot.lane.b32.xlu1 %v6391_v7, %s4100_s15 }
 0x983   : > { %3310 = vrot.lane.b32.xlu0 %v6372_v31, %s4100_s15 }
 0x985   : > { %3228 = vrot.lane.b32.xlu1 %v6399_v17, %s4098_s7  ;;  %s294_s7 = scalar_lea.vmem [#allocation9], %s3726_s3 }
 0x987   : > { %3306 = vrot.lane.b32.xlu0 %v6388_v39, %s4100_s15 }
 0x989   : > { %3344 = vrot.lane.b32.xlu1 %v6367_v10, %s4101_s16 }
 0x98b   : > { %3314 = vrot.lane.b32.xlu0 %v6396_v16, %s4100_s15 }
 0x98d   : > { %3352 = vrot.lane.b32.xlu1 %v6375_v9, %s4101_s16 }
 0x98f   : > { %3342 = vrot.lane.b32.xlu0 %v6364_v5, %s4101_s16 }
 0x991   : > { %3348 = vrot.lane.b32.xlu1 %v6391_v7, %s4101_s16 }
 0x993   : > { %3350 = vrot.lane.b32.xlu0 %v6372_v31, %s4101_s16 }
 0x995   : > { %3276 = vrot.lane.b32.xlu1 %v6399_v17, %s4099_s13  ;;  %s3612_s13 = sshll.u32 %s294_s7, 4  ;;  %s6851_s13 = int_to_ptr.vmem [resolvable:$true] %s3612_s13 }
 0x996   : > { %s4012_s3 = scalar_lea.vmem %s6851_s13, 32  ;;  %p4019_p9 = scmp.lt.s32.totalorder %s6851_s13, %s4017_s6 }
 0x997   : > { %3346 = vrot.lane.b32.xlu0 %v6388_v39, %s4101_s16  ;;  %p4013_p10 = scmp.ne.s32.totalorder %s6851_s13, %s4012_s3  ;;  %p4020_p2 = scmp.lt.s32.totalorder %s4018_s0, %s4012_s3 }
 0x999   : > { %3384 = vrot.lane.b32.xlu1 %v6367_v10, %s4102_s29  ;;  %p4014_p3 = pnand %p4013_p10, %p7296_p13  ;;  %p4021_p5 = por %p4020_p2, %p4019_p9 }
 0x99b   : > { %3354 = vrot.lane.b32.xlu0 %v6396_v16, %s4101_s16  ;;  %p4015_p7 = pneg %p4014_p3 }
 0x99d   : > { %3316 = vrot.lane.b32.xlu1 %v6399_v17, %s4100_s15  ;;  %p4022_p1 = pnand %p4021_p5, %p4015_p7 }
 0x99f   : > { %3382 = vrot.lane.b32.xlu0 %v6364_v5, %s4102_s29 }
 0x9a1   : > { %v3095_v35 = vpop.permute.xlu0 %3094  ;;  %3392 = vrot.lane.b32.xlu1 %v6375_v9, %s4102_s29 }
 0x9a3   : > { %v3097_v50 = vpop.permute.xlu1 %3096  ;;  %3390 = vrot.lane.b32.xlu0 %v6372_v31, %s4102_s29 }
 0x9a5   : > { %v3135_v22 = vpop.permute.xlu0 %3134  ;;  %3356 = vrot.lane.b32.xlu1 %v6399_v17, %s4101_s16 }
 0x9a7   : > { %v3137_v61 = vpop.permute.xlu1 %3136  ;;  %3386 = vrot.lane.b32.xlu0 %v6388_v39, %s4102_s29 }
 0x9a9   : > { %v3175_v29 = vpop.permute.xlu0 %3174  ;;  %3388 = vrot.lane.b32.xlu1 %v6391_v7, %s4102_s29 }
 0x9ab   : > { %v3177_v12 = vpop.permute.xlu1 %3176  ;;  %3394 = vrot.lane.b32.xlu0 %v6396_v16, %s4102_s29 }
 0x9ad   : > { %v3215_v46 = vpop.permute.xlu0 %3214  ;;  %3396 = vrot.lane.b32.xlu1 %v6399_v17, %s4102_s29  ;;  %s6849_s29 = scalar_lea.hbm %s6898_s5, %s3775_s10 }
 0x9af   : > { %v3217_v52 = vpop.permute.xlu1 %3216 }
 0x9b1   : > { %v3263_v2 = vpop.permute.xlu0 %3262 }
 0x9b3   : > { %v3265_v25 = vpop.permute.xlu1 %3264 }
 0x9b5   : > { %v3103_v21 = vpop.permute.xlu0 %3102 }
 0x9b6   : > { %v3110_v14 = vsel %vm7238_vm0, %v3095_v35, %v3103_v21  ;;  %v3114_v13 = vsel %vm7239_vm2, %v3103_v21, %v3095_v35  ;;  %vm7250_vm2 = vmmov %vm7238_vm0 }
 0x9b7   : > { %v3105_v15 = vpop.permute.xlu1 %3104  ;;  %v3118_v60 = vmul.f32 %v3114_v13, %v4500_v24  ;;  %v3119_v34 = vmul.f32 %v3110_v14, %v4497_v23 }
 0x9b8   : > { %v3111_v1 = vsel %vm7240_vm7, %v3097_v50, %v3105_v15  ;;  %v3115_v47 = vsel %vm7241_vm14, %v3105_v15, %v3097_v50  ;;  %vm7251_vm7 = vmmov %vm7238_vm0 }
 0x9b9   : > { %v3120_v26 = vmul.f32 %v3115_v47, %v4500_v24  ;;  %v3121_v28 = vmul.f32 %v3111_v1, %v4497_v23  ;;  %v3143_v53 = vpop.permute.xlu0 %3142  ;;  %vm7255_vm14 = vmmov %vm7244_vm3 }
 0x9ba   : > { %v3150_v48 = vsel %vm407_vm4, %v3135_v22, %v3143_v53  ;;  %v3154_v49 = vsel %vm407_vm4, %v3143_v53, %v3135_v22 }
 0x9bb   : > { %v3126_v38 = vpack.c.bf16 %v3120_v26, %v3118_v60  ;;  %v3127_v57 = vpack.c.bf16 %v3121_v28, %v3119_v34  ;;  %v3145_v56 = vpop.permute.xlu1 %3144  ;;  %v6552_v37 = vmul.f32 %v3154_v49, %v7218_v45  ;;  %v6555_v35 = vmul.f32 %v3150_v48, %v7219_v27 }
 0x9bc   : > { %v3151_v8 = vsel %vm407_vm4, %v3137_v61, %v3145_v56  ;;  %v3155_v44 = vsel %vm407_vm4, %v3145_v56, %v3137_v61 }
 0x9bd   : > { %v6558_v50 = vmul.f32 %v3155_v44, %v7218_v45  ;;  %v6561_v22 = vmul.f32 %v3151_v8, %v7219_v27  ;;  %v3183_v21 = vpop.permute.xlu0 %3182  ;;  %3491 = vmatprep.subr.bf16.mxu1 %v3127_v57 }
 0x9be   : > { %v3190_v14 = vsel %vm7242_vm8, %v3175_v29, %v3183_v21  ;;  %v3194_v61 = vsel %vm7243_vm5, %v3183_v21, %v3175_v29  ;;  %3492 = vmatpush1.bf16.msra.mxu1 %v3126_v38  ;;  %vm7257_vm8 = vmmov %vm7244_vm3 }
 0x9bf   : > { %v3185_v1 = vpop.permute.xlu1 %3184  ;;  %v6576_v34 = vmul.f32 %v3194_v61, %v4614_v55  ;;  %v6579_v26 = vmul.f32 %v3190_v14, %v4611_v54  ;;  %vm7258_vm5 = vmmov %vm7244_vm3 }
 0x9c0   : > { %v3191_v47 = vsel %vm7244_vm3, %v3177_v12, %v3185_v1  ;;  %v3195_v60 = vsel %vm7245_vm15, %v3185_v1, %v3177_v12 }
 0x9c1   : > { %v6582_v29 = vmul.f32 %v3195_v60, %v4614_v55  ;;  %v6585_v28 = vmul.f32 %v3191_v47, %v4611_v54  ;;  %v3223_v53 = vpop.permute.xlu0 %3222 }
 0x9c2   : > { %v3230_v48 = vsel %vm7212_vm1, %v3215_v46, %v3223_v53  ;;  %v3234_v49 = vsel %vm7246_vm9, %v3223_v53, %v3215_v46  ;;  %vm7262_vm9 = vmmov %vm7212_vm1 }
 0x9c3   : > { %v3225_v57 = vpop.permute.xlu1 %3224  ;;  %v6600_v44 = vmul.f32 %v3234_v49, %v4662_v41  ;;  %v6603_v21 = vmul.f32 %v3230_v48, %v4659_v40 }
 0x9c4   : > { %v3231_v56 = vsel %vm7247_vm11, %v3217_v52, %v3225_v57  ;;  %v3235_v8 = vsel %vm7248_vm6, %v3225_v57, %v3217_v52 }
 0x9c5   : > { %v6606_v46 = vmul.f32 %v3235_v8, %v4662_v41  ;;  %v6609_v14 = vmul.f32 %v3231_v56, %v4659_v40  ;;  %v3271_v61 = vpop.permute.xlu0 %3270 }
 0x9c6   : > { %v3278_v1 = vsel %vm571_vm10, %v3263_v2, %v3271_v61  ;;  %v3282_v47 = vsel %vm571_vm10, %v3271_v61, %v3263_v2 }
 0x9c7   : > { %v3273_v53 = vpop.permute.xlu1 %3272  ;;  %v6624_v57 = vmul.f32 %v3278_v1, %v4700_v33  ;;  %v6627_v56 = vmul.f32 %v3282_v47, %v4695_v32 }
 0x9c8   : > { %v3279_v48 = vsel %vm571_vm10, %v3265_v25, %v3273_v53  ;;  %v3283_v49 = vsel %vm571_vm10, %v3273_v53, %v3265_v25 }
 0x9c9   : > { %v6630_v2 = vmul.f32 %v3279_v48, %v4700_v33  ;;  %v6633_v8 = vmul.f32 %v3283_v49, %v4695_v32  ;;  %v3099_v61 = vpop.permute.xlu0 %3098 }
 0x9cb   : > { %v3101_v25 = vpop.permute.xlu1 %3100 }
 0x9cd   : > { %v3139_v53 = vpop.permute.xlu0 %3138 }
 0x9cf   : > { %v3141_v1 = vpop.permute.xlu1 %3140 }
 0x9d1   : > { %v3179_v18 = vpop.permute.xlu0 %3178 }
 0x9d3   : > { %v3181_v42 = vpop.permute.xlu1 %3180 }
 0x9d5   : > { %v3219_v47 = vpop.permute.xlu0 %3218 }
 0x9d7   : > { %v6639_v52 = vpop.permute.xlu1 %3220 }
 0x9d9   : > { %v6641_v48 = vpop.permute.xlu0 %3266 }
 0x9db   : > { %v6643_v60 = vpop.permute.xlu1 %3268 }
 0x9dd   : > { %v3107_v49 = vpop.permute.xlu0 %3106 }
 0x9de   : > { %v3112_v12 = vsel %vm7249_vm13, %v3099_v61, %v3107_v49  ;;  %v3116_v59 = vsel %vm7238_vm0, %v3107_v49, %v3099_v61  ;;  %vm7266_vm13 = vmmov %vm7212_vm1 }
 0x9df   : > { %v3109_v3 = vpop.permute.xlu1 %3108  ;;  %v3122_v15 = vmul.f32 %v3116_v59, %v4500_v24  ;;  %v3123_v20 = vmul.f32 %v3112_v12, %v4497_v23  ;;  %v7252_v12 = vpack.c.bf16 %v6561_v22, %v6555_v35  ;;  %vm7267_vm0 = vmmov %vm7212_vm1 }
 0x9e0   : > { %v3113_v38 = vsel %vm7250_vm2, %v3101_v25, %v3109_v3  ;;  %v3117_v13 = vsel %vm7251_vm7, %v3109_v3, %v3101_v25 }
 0x9e1   : > { %v3124_v11 = vmul.f32 %v3117_v13, %v4500_v24  ;;  %v3125_v0 = vmul.f32 %v3113_v38, %v4497_v23  ;;  %v3303_v4 = vpop.permute.xlu0 %3302  ;;  %v7253_v13 = vpack.c.bf16 %v6558_v50, %v6552_v37 }
 0x9e3   : > { %v3128_v43 = vpack.c.bf16 %v3124_v11, %v3122_v15  ;;  %v3129_v6 = vpack.c.bf16 %v3125_v0, %v3123_v20  ;;  %v3305_v36 = vpop.permute.xlu1 %3304 }
 0x9e5   : > { %v3147_v61 = vpop.permute.xlu0 %3146  ;;  %3493 = vmatprep.subr.bf16.mxu1 %v3129_v6 }
 0x9e6   : > { %v3152_v49 = vsel %vm407_vm4, %v3139_v53, %v3147_v61  ;;  %v3156_v3 = vsel %vm407_vm4, %v3147_v61, %v3139_v53  ;;  %3494 = vmatpush1.bf16.msra.mxu1 %v3128_v43 }
 0x9e7   : > { %v3149_v59 = vpop.permute.xlu1 %3148  ;;  %3495 = vmatprep.subr.bf16.mxu1 %v7252_v12  ;;  %v3162_v6 = vmul.f32 %v3156_v3, %v7218_v45  ;;  %v3163_v20 = vmul.f32 %v3152_v49, %v7219_v27 }
 0x9e8   : > { %v3153_v23 = vsel %vm407_vm4, %v3141_v1, %v3149_v59  ;;  %v3157_v24 = vsel %vm407_vm4, %v3149_v59, %v3141_v1  ;;  %vm7254_vm4 = vmmov %vm7244_vm3  ;;  %v7259_v59 = vpack.c.bf16 %v6582_v29, %v6576_v34  ;;  %vm7260_vm3 = vcmp.lt.s32.totalorder %v4486_v19, 113 }
 0x9e9   : > { %v3164_v0 = vmul.f32 %v3157_v24, %v7218_v45  ;;  %v3165_v11 = vmul.f32 %v3153_v23, %v7219_v27  ;;  %v3187_v43 = vpop.permute.xlu0 %3186  ;;  %v7256_v27 = vpack.c.bf16 %v6585_v28, %v6579_v26  ;;  %vm7261_vm15 = vmmov %vm7260_vm3 }
 0x9ea   : > { %3496 = vmatpush1.bf16.msra.mxu1 %v7253_v13  ;;  %v3192_v25 = vsel %vm7254_vm4, %v3179_v18, %v3187_v43  ;;  %v3196_v53 = vsel %vm7255_vm14, %v3187_v43, %v3179_v18  ;;  %vm7263_vm11 = vmmov %vm7260_vm3  ;;  %vm7279_vm14 = vcmp.lt.s32.totalorder %v4486_v19, 111  ;;  %v7291_v19 = vld [vmem:[#allocation40_spill] sm:$0xff] }
 0x9eb   : > { %v3168_v35 = vpack.c.bf16 %v3164_v0, %v3162_v6  ;;  %v3169_v22 = vpack.c.bf16 %v3165_v11, %v3163_v20  ;;  %v3313_v15 = vpop.permute.xlu1 %3312  ;;  %v3202_v1 = vmul.f32 %v3196_v53, %v4614_v55  ;;  %v3203_v61 = vmul.f32 %v3192_v25, %v4611_v54  ;;  %vm7264_vm6 = vmmov %vm7260_vm3 }
 0x9ec   : > { %v3323_v23 = vsel %vm7261_vm15, %v3313_v15, %v3305_v36  ;;  %v7265_v11 = vpack.c.bf16 %v6609_v14, %v6603_v21  ;;  %v7268_v25 = vpack.c.bf16 %v6606_v46, %v6600_v44  ;;  %v7271_v44 = vpack.c.bf16 %v6399_v17, %v6396_v16  ;;  %vm7275_vm2 = vmmov %vm7260_vm3 }
 0x9ed   : > { %v3227_v38 = vpop.permute.xlu0 %3226  ;;  %3497 = vmatprep.subr.bf16.mxu1 %v3169_v22  ;;  %v7272_v17 = vpack.c.bf16 %v6391_v7, %v6388_v39  ;;  %vm7277_vm7 = vmmov %vm7275_vm2 }
 0x9ee   : > { %3498 = vmatpush1.bf16.msra.mxu1 %v3168_v35  ;;  %vm7278_vm4 = vmmov %vm7275_vm2 }
 0x9ef   : > { %v3189_v45 = vpop.permute.xlu1 %3188  ;;  %3499 = vmatprep.subr.bf16.mxu1 %v7256_v27 }
 0x9f0   : > { %v3193_v37 = vsel %vm7257_vm8, %v3181_v42, %v3189_v45  ;;  %v3197_v50 = vsel %vm7258_vm5, %v3189_v45, %v3181_v42  ;;  %v3319_v42 = vsel %vm7260_vm3, %v3305_v36, %v3313_v15  ;;  %v3329_v36 = vmul.f32 %v3323_v23, %v4735_v62  ;;  %vm7280_vm8 = vmmov %vm7279_vm14 }
 0x9f1   : > { %v3204_v49 = vmul.f32 %v3197_v50, %v4614_v55  ;;  %v3205_v18 = vmul.f32 %v3193_v37, %v4611_v54  ;;  %v3275_v3 = vpop.permute.xlu0 %3274  ;;  %v3232_v55 = vsel %vm7212_vm1, %v3219_v47, %v3227_v38  ;;  %v3236_v54 = vsel %vm7262_vm9, %v3227_v38, %v3219_v47  ;;  %vm7281_vm5 = vmmov %vm7280_vm8 }
 0x9f2   : > { %3500 = vmatpush1.bf16.msra.mxu1 %v7259_v59  ;;  %v6708_v6 = vmul.f32 %v3319_v42, %v4738_v63  ;;  %v3242_v43 = vmul.f32 %v3236_v54, %v4662_v41  ;;  %v7269_v50 = vpack.c.bf16 %v6375_v9, %v6372_v31  ;;  %v3280_v31 = vsel %vm571_vm10, %v6641_v48, %v3275_v3  ;;  %vm7282_vm3 = vmmov %vm7281_vm5 }
 0x9f3   : > { %v3208_v26 = vpack.c.bf16 %v3204_v49, %v3202_v1  ;;  %v3209_v28 = vpack.c.bf16 %v3205_v18, %v3203_v61  ;;  %v6693_v12 = vpop.permute.xlu1 %3308  ;;  %vm7286_vm15 = vmmov %vm7282_vm3 }
 0x9f4   : > { %vm7288_vm1 = vmmov %vm7282_vm3 }
 0x9f5   : > { %v3311_v24 = vpop.permute.xlu0 %3310  ;;  %3501 = vmatprep.subr.bf16.mxu1 %v3209_v28  ;;  %v3290_v28 = vmul.f32 %v3280_v31, %v4700_v33  ;;  %vm7289_vm9 = vmmov %vm7288_vm1 }
 0x9f6   : > { %v3318_v34 = vsel %vm7263_vm11, %v3303_v4, %v3311_v24  ;;  %v3322_v29 = vsel %vm7264_vm6, %v3311_v24, %v3303_v4  ;;  %3502 = vmatpush1.bf16.msra.mxu1 %v3208_v26  ;;  %v3243_v4 = vmul.f32 %v3232_v55, %v4659_v40  ;;  %vm7293_vm11 = vcmask 392192  }
 0x9f7   : > { %v6712_v20 = vmul.f32 %v3318_v34, %v4738_v63  ;;  %v3327_v0 = vmul.f32 %v3322_v29, %v4735_v62  ;;  %v3229_v47 = vpop.permute.xlu1 %3228  ;;  %3503 = vmatprep.subr.bf16.mxu1 %v7265_v11 }
 0x9f8   : > { %v3233_v13 = vsel %vm7266_vm13, %v6639_v52, %v3229_v47  ;;  %v3237_v35 = vsel %vm7267_vm0, %v3229_v47, %v6639_v52 }
 0x9f9   : > { %v3334_v22 = vpack.c.bf16 %v6708_v6, %v6712_v20  ;;  %v3335_v15 = vpack.c.bf16 %v3329_v36, %v3327_v0  ;;  %v3244_v38 = vmul.f32 %v3237_v35, %v4662_v41  ;;  %v3245_v21 = vmul.f32 %v3233_v13, %v4659_v40  ;;  %v3307_v14 = vpop.permute.xlu0 %3306 }
 0x9fa   : > { %3504 = vmatpush1.bf16.msra.mxu1 %v7268_v25  ;;  %v7270_v40 = vpack.c.bf16 %v6367_v10, %v6364_v5  ;;  %v3284_v5 = vsel %vm571_vm10, %v3275_v3, %v6641_v48  ;;  %v7273_v3 = vpack.c.bf16 %v6633_v8, %v6627_v56  ;;  %v7274_v8 = vpack.c.bf16 %v6630_v2, %v6624_v57  ;;  %v7283_v25 = vld [vmem:[#allocation26_spill] sm:$0xff] }
 0x9fb   : > { %v3248_v53 = vpack.c.bf16 %v3244_v38, %v3242_v43  ;;  %v3249_v45 = vpack.c.bf16 %v3245_v21, %v3243_v4  ;;  %v3345_v27 = vpop.permute.xlu1 %3344  ;;  %v3291_v42 = vmul.f32 %v3284_v5, %v4695_v32 }
 0x9fd   : > { %v3315_v37 = vpop.permute.xlu0 %3314  ;;  %3505 = vmatprep.subr.bf16.mxu1 %v3249_v45 }
 0x9fe   : > { %3506 = vmatpush1.bf16.msra.mxu1 %v3248_v53  ;;  %v3320_v20 = vsel %vm7275_vm2, %v3307_v14, %v3315_v37 }
 0x9ff   : > { %v3353_v52 = vpop.permute.xlu1 %3352  ;;  %3507 = vmatprep.subr.bf16.mxu1 %v7269_v50  ;;  %v3330_v2 = vmul.f32 %v3320_v20, %v4738_v63  ;;  %v7294_v20 = vlaneseq }
 0xa00   : > { %v3359_v46 = vsel %vm675_vm12, %v3345_v27, %v3353_v52  ;;  %v3363_v61 = vsel %vm675_vm12, %v3353_v52, %v3345_v27 }
 0xa01   : > { %v3343_v1 = vpop.permute.xlu0 %3342  ;;  %v3368_v49 = vmul.f32 %v3359_v46, %v7215_v58  ;;  %v3369_v18 = vmul.f32 %v3363_v61, %v7216_v51  ;;  %vm3594_vm6 = vcmp.lt.s32.totalorder %v7294_v20, 256 }
 0xa02   : > { %3508 = vmatpush1.bf16.msra.mxu1 %v7270_v40 }
 0xa03   : > { %v6739_v41 = vpop.permute.xlu1 %3348  ;;  %3509 = vmatprep.subr.bf16.mxu1 %v7271_v44 }
 0xa05   : > { %v3351_v10 = vpop.permute.xlu0 %3350 }
 0xa06   : > { %v3358_v9 = vsel %vm675_vm12, %v3343_v1, %v3351_v10  ;;  %v3362_v16 = vsel %vm675_vm12, %v3351_v10, %v3343_v1  ;;  %3510 = vmatpush1.bf16.msra.mxu1 %v7272_v17 }
 0xa07   : > { %v3366_v59 = vmul.f32 %v3358_v9, %v7215_v58  ;;  %v3367_v26 = vmul.f32 %v3362_v16, %v7216_v51  ;;  %v3277_v48 = vpop.permute.xlu1 %3276  ;;  %3511 = vmatprep.subr.bf16.mxu1 %v7273_v3 }
 0xa08   : > { %v3281_v39 = vsel %vm571_vm10, %v6643_v60, %v3277_v48  ;;  %v3285_v7 = vsel %vm571_vm10, %v3277_v48, %v6643_v60  ;;  %vm7276_vm10 = vmmov %vm7275_vm2 }
 0xa09   : > { %v3374_v23 = vpack.c.bf16 %v3368_v49, %v3366_v59  ;;  %v3375_v55 = vpack.c.bf16 %v3369_v18, %v3367_v26  ;;  %v3292_v54 = vmul.f32 %v3281_v39, %v4700_v33  ;;  %v3293_v24 = vmul.f32 %v3285_v7, %v4695_v32  ;;  %v3347_v56 = vpop.permute.xlu0 %3346  ;;  %v7284_v49 = vld [vmem:[#allocation44_spill] sm:$0xff]  ;;  %v7285_v18 = vld [vmem:[#allocation33_spill] sm:$0xff] }
 0xa0a   : > { %3512 = vmatpush1.bf16.msra.mxu1 %v7274_v8  ;;  %v3324_v60 = vsel %vm7276_vm10, %v3315_v37, %v3307_v14  ;;  %v3477_v59 = vrot.slane %v7285_v18, %v7284_v49  ;;  %v7290_v7 = vmov 0  }
 0xa0b   : > { %v3296_v34 = vpack.c.bf16 %v3292_v54, %v3290_v28  ;;  %v3297_v29 = vpack.c.bf16 %v3293_v24, %v3291_v42  ;;  %v3385_v6 = vpop.permute.xlu1 %3384  ;;  %v3331_v0 = vmul.f32 %v3324_v60, %v4735_v62  ;;  %v7292_v24 = vld [vmem:[#allocation34_spill] sm:$0xff]  ;;  %v7295_v60 = vld [vmem:[#allocation27_spill] sm:$0xff] }
 0xa0c   : > { %v3485_v54 = vcombine.high %v3477_v59, %v3477_v59 }
 0xa0d   : > { %v3355_v36 = vpop.permute.xlu0 %3354  ;;  %3513 = vmatprep.subr.bf16.mxu1 %v3297_v29 }
 0xa0e   : > { %3514 = vmatpush1.bf16.msra.mxu1 %v3296_v34  ;;  %v3364_v21 = vsel %vm675_vm12, %v3355_v36, %v3347_v56 }
 0xa0f   : > { %v3317_v33 = vpop.permute.xlu1 %3316  ;;  %3515 = vmatprep.subr.bf16.mxu1 %v3335_v15  ;;  %v3371_v50 = vmul.f32 %v3364_v21, %v7216_v51 }
 0xa10   : > { %v3321_v32 = vsel %vm7277_vm7, %v6693_v12, %v3317_v33  ;;  %v3325_v57 = vsel %vm7278_vm4, %v3317_v33, %v6693_v12  ;;  %v3360_v12 = vsel %vm675_vm12, %v3347_v56, %v3355_v36 }
 0xa11   : > { %v3332_v47 = vmul.f32 %v3321_v32, %v4738_v63  ;;  %v3333_v11 = vmul.f32 %v3325_v57, %v4735_v62  ;;  %v3383_v43 = vpop.permute.xlu0 %3382  ;;  %v3370_v52 = vmul.f32 %v3360_v12, %v7215_v58 }
 0xa12   : > { %3516 = vmatpush1.bf16.msra.mxu1 %v3334_v22 }
 0xa13   : > { %v3336_v4 = vpack.c.bf16 %v3332_v47, %v3330_v2  ;;  %v3337_v13 = vpack.c.bf16 %v3333_v11, %v3331_v0  ;;  %v3393_v35 = vpop.permute.xlu1 %3392 }
 0xa14   : > { %v3399_v15 = vsel %vm7279_vm14, %v3385_v6, %v3393_v35  ;;  %v3403_v38 = vsel %vm7280_vm8, %v3393_v35, %v3385_v6 }
 0xa15   : > { %v3391_v63 = vpop.permute.xlu0 %3390  ;;  %3517 = vmatprep.subr.bf16.mxu1 %v3337_v13  ;;  %v3408_v14 = vmul.f32 %v3399_v15, %v7186_v30  ;;  %v3409_v53 = vmul.f32 %v3403_v38, %v7283_v25 }
 0xa16   : > { %v3398_v62 = vsel %vm7281_vm5, %v3383_v43, %v3391_v63  ;;  %v3402_v22 = vsel %vm7282_vm3, %v3391_v63, %v3383_v43  ;;  %3518 = vmatpush1.bf16.msra.mxu1 %v3336_v4 }
 0xa17   : > { %v3406_v45 = vmul.f32 %v3398_v62, %v7186_v30  ;;  %v3407_v27 = vmul.f32 %v3402_v22, %v7283_v25  ;;  %v3357_v37 = vpop.permute.xlu1 %3356  ;;  %3519 = vmatprep.subr.bf16.mxu1 %v3375_v55 }
 0xa18   : > { %v3361_v1 = vsel %vm675_vm12, %v6739_v41, %v3357_v37  ;;  %v3365_v40 = vsel %vm675_vm12, %v3357_v37, %v6739_v41  ;;  %vm7287_vm12 = vmmov %vm7282_vm3 }
 0xa19   : > { %v3414_v44 = vpack.c.bf16 %v3408_v14, %v3406_v45  ;;  %v3415_v46 = vpack.c.bf16 %v3409_v53, %v3407_v27  ;;  %v3372_v61 = vmul.f32 %v3361_v1, %v7215_v58  ;;  %v3373_v31 = vmul.f32 %v3365_v40, %v7216_v51  ;;  %v3387_v5 = vpop.permute.xlu0 %3386 }
 0xa1a   : > { %3520 = vmatpush1.bf16.msra.mxu1 %v3374_v23 }
 0xa1b   : > { %v3376_v10 = vpack.c.bf16 %v3372_v61, %v3370_v52  ;;  %v3377_v9 = vpack.c.bf16 %v3373_v31, %v3371_v50  ;;  %v3389_v16 = vpop.permute.xlu1 %3388 }
 0xa1d   : > { %v3395_v17 = vpop.permute.xlu0 %3394  ;;  %3521 = vmatprep.subr.bf16.mxu1 %v3377_v9 }
 0xa1e   : > { %v3400_v26 = vsel %vm7286_vm15, %v3387_v5, %v3395_v17  ;;  %v3404_v41 = vsel %vm7287_vm12, %v3395_v17, %v3387_v5  ;;  %3522 = vmatpush1.bf16.msra.mxu1 %v3376_v10 }
 0xa1f   : > { %v3397_v58 = vpop.permute.xlu1 %3396  ;;  %3532 = vmatprep.subr.bf16.mxu1 %v3415_v46  ;;  %v3410_v3 = vmul.f32 %v3400_v26, %v7186_v30  ;;  %v3411_v28 = vmul.f32 %v3404_v41, %v7283_v25 }
 0xa20   : > { %v3401_v51 = vsel %vm7288_vm1, %v3389_v16, %v3397_v58  ;;  %v3405_v48 = vsel %vm7289_vm9, %v3397_v58, %v3389_v16 }
 0xa21   : > { %v3412_v42 = vmul.f32 %v3401_v51, %v7186_v30  ;;  %v3413_v39 = vmul.f32 %v3405_v48, %v7283_v25  ;;  %3524 = vmatmul.mubr.bf16.vlgmr.msra.gmra.mrb[12].mxu1 %v3477_v59 }
 0xa22   : > { %3533 = vmatpush1.bf16.msra.mxu1 %v3414_v44  ;;  %3564 = vmatprep.mubr.bf16.mxu1 %v7290_v7 }
 0xa23   : > { %v3416_v23 = vpack.c.bf16 %v3412_v42, %v3410_v3  ;;  %v3417_v55 = vpack.c.bf16 %v3413_v39, %v3411_v28 }
 0xa25   : > { %3534 = vmatprep.subr.bf16.mxu1 %v3417_v55 }
 0xa26   : > { %3535 = vmatpush1.bf16.msra.mxu1 %v3416_v23 }
 0xa27   : > { %3536 = vmatprep.subr.bf16.mxu1 %v7291_v19 }
 0xa2a   : > { %3537 = vmatpush1.bf16.msra.mxu1 %v7292_v24 }
 0xa2d   : > { %3767 = vmatmul.mubr.msk.bf16.vlgmr.msra.gmra.mrb[12].mxu1 %vm7293_vm11, %v3485_v54 }
 0xb00   : > { %v3566_v30 = vpop.f32.mrb[12].mxu1 }
 0xb01   : > { %v3568_v56 = vpop.f32.mrb[13].mxu1 }
 0xb02   : > { %v3575_v8 = vcombine.low %v3566_v30, %v3568_v56  ;;  %v3570_v34 = vpop.f32.mrb[14].mxu1 }
 0xb03   : > { %v3571_v29 = vpop.f32.mrb[15].mxu1 }
 0xb04   : > { %v3582_v6 = vrot.slane %v3575_v8, %v7284_v49 }
 0xb06   : > { %v3589_v36 = vrot.slane %v3582_v6, %v7284_v49 }
 0xb08   : > { %v3591_v33 = vadd.f32 %v3589_v36, %v7295_v60 }
 0xb0a   : > { %3596 = vst.msk [vmem:[%s294_s7] sm:$0x3] %vm3594_vm6, %v3591_v33 }
 0xb0b   : > { %4025 = shalt.err (!%p4022_p1)
}
 0xb0c   : > { %s4026_s8 = scalar_lea.hbm %s6849_s29, 32  ;;  %s4030_s17 = scalar_lea.hbm %s6898_s5, 64 }
 0xb0d   : > { %p4027_p6 = scmp.ne.s32.totalorder %s6849_s29, %s4026_s8  ;;  %p4031_p12 = scmp.lt.u32.totalorder %s6849_s29, %s6898_s5 }
 0xb0e   : > { %p4032_p11 = scmp.lt.u32.totalorder %s4030_s17, %s4026_s8  ;;  %p4034_p10 = scmp.lt.u32.totalorder %s4026_s8, %s6849_s29 }
 0xb0f   : > { %p4028_p8 = pnand %p4027_p6, %p7296_p13 }
 0xb10   : > { %p4033_p0 = por %p4032_p11, %p4031_p12 }
 0xb11   : > { %p4029_p4 = pneg %p4028_p8 }
 0xb12   : > { %p4035_p3 = por %p4034_p10, %p4033_p0 }
 0xb14   : > { %p4036_p7 = pnand %p4035_p3, %p4029_p4 }
 0xb16   : > { %4039 = shalt.err (!%p4036_p7)
}
 0xb17   : > { %3820 = dma.vmem_to_hbm [thread:$0]  (%p7296_p13), %s6851_s13, 32, %s6849_s29, %s3598_s22  }
 0xb18 PF: > { %s3624_s11 = sand.u32 1, %s4074_s18   ;;  %p7297_p9 = scmp.ne.s32.totalorder %s7001_s25, 0 }
 0xb19   : > { %p7298_p2 = scmp.ge.s32.totalorder %s4086_s21, 2  ;;  %s3625_s24 = scalar_lea.sflag [#allocation5], %s3624_s11 }
 0xb1b   : > { %p3834_p5 = pnand %p7298_p2, %p7297_p9 }
 0xb1d   : > { %4069 = dma.done.wait (!%p3834_p5), %s3625_s24, 32  }
 0xb1e   : > { %4071 = vsyncadd (!%p3834_p5), %s3625_s24, 4294967264  ;;  %s7299_s28 = sld [smem:[#allocation14_spill]]  ;;  %p21_p1 = scmp.ge.s32.totalorder %s4192_s30, 4  }
 0xb1f   : > { %s7300_s18 = smov %s4078_s19  ;;  %s7301_s19 = smov %s4082_s20 }
 0xb20   : > { %s7303_s21 = smov %s4192_s30  ;;  %23 = sbr.rel (!%p21_p1) target bundleno = 10 (0xa), region = 113 }
 0xb24   : > { %s7302_s20 = smov %s7299_s28 }
 0xb27   :  { %3630 = vsyncpa [#allocation4], 1 }
 0xb28   :  { %3632 = vsyncpa [#allocation4 + $0x1], 1 }
 0xb29   :  { %3633 = vsyncpa [#allocation7], 1 }
 0xb2a   :  { %3635 = vsyncpa [#allocation7 + $0x1], 1 }
 0xb2b   :  { %3636 = vsyncpa [#allocation5], 1 }
 0xb2c   :  { %3638 = vsyncpa [#allocation5 + $0x1], 1 }

</bundles_post_ra>
